<compile_context>
chip_gen: v5e
topology: v5e:2x2
jax: 0.10.0
libtpu: 0.0.40
codegen_flags: <defaults>
</compile_context>

<pallas_src>
import math

import jax
import jax.numpy as jnp
from jax.experimental import pallas as pl
from jax.experimental.pallas import tpu as pltpu


# ---------------- fused Pallas kernel (hot path) ----------------

def _make_fused_kernel(H, W, C):
    Wp = W + 2                       # padded width
    P2 = H * Wp                      # rows computed per conv (padded-width layout)
    PF = (H + 3) * Wp                # rows of the zero-padded, flattened image
    SHIFT = Wp + 1                   # flat offset of pixel (0, 0) inside the padded image
    OFFS = tuple(dy * Wp + dx for dy in range(3) for dx in range(3))

    def kernel(xpf_ref, w0_ref, b0_ref, w1_ref, b1_ref, mask_ref,
               out_ref, y0p_ref):
        # ---- conv0 on relu(x): 9 shifted (P2, C) @ (C, C) MXU matmuls ----
        acc0 = jnp.zeros((P2, C), jnp.float32)
        for t, off in enumerate(OFFS):
            xs = jnp.maximum(xpf_ref[0, off:off + P2, :], 0.0)   # relu(0)=0 keeps padding valid
            acc0 = acc0 + jnp.dot(xs.astype(jnp.bfloat16),
                                  w0_ref[t * C:(t + 1) * C, :],
                                  preferred_element_type=jnp.float32)

        # bias + relu; zero the junk columns (w >= W) so they act as conv1's
        # zero padding in the padded-width layout.
        y0 = jnp.maximum(acc0 + b0_ref[...], 0.0) * mask_ref[...]

        # Place relu(conv0(...)) into a zero-padded flat VMEM buffer (halo stays
        # in VMEM, no HBM round trip for the intermediate).
        y0p_ref[...] = jnp.zeros_like(y0p_ref)
        y0p_ref[SHIFT:SHIFT + P2, :] = y0

        # ---- conv1 + bias + residual add ----
        acc1 = jnp.zeros((P2, C), jnp.float32)
        for t, off in enumerate(OFFS):
            zs = y0p_ref[off:off + P2, :]
            acc1 = acc1 + jnp.dot(zs.astype(jnp.bfloat16),
                                  w1_ref[t * C:(t + 1) * C, :],
                                  preferred_element_type=jnp.float32)

        res = xpf_ref[0, SHIFT:SHIFT + P2, :]        # x (pre-relu) in the same layout
        out_ref[0] = res + acc1 + b1_ref[...]

    return kernel


# ---------------- JAX glue (one-time layout / params) ----------------

def _flatten_weight(w_oihw):
    """(Cout, Cin, 3, 3) -> (9*Cin, Cout), row index = (dy*3+dx)*Cin + cin."""
    Cout, Cin, _, _ = w_oihw.shape
    return jnp.transpose(w_oihw, (2, 3, 1, 0)).reshape(9 * Cin, Cout)


def cnn_basic_block(x_nchw, w0, b0, w1, b1):
    N, C, H, W = x_nchw.shape
    Wp = W + 2
    P2 = H * Wp
    PF = (H + 3) * Wp

    # one-time layout glue (outside the hot path): pad with 1 top / 2 bottom
    # rows (extra safety row for the junk-column taps) and 1 col each side,
    # then flatten (H+3, W+2) row-major.
    x_nhwc = jnp.transpose(x_nchw, (0, 2, 3, 1))
    xpf = jnp.pad(x_nhwc, ((0, 0), (1, 2), (1, 1), (0, 0))).reshape(N, PF, C)

    w0f = _flatten_weight(w0).astype(jnp.bfloat16)            # (9C, C) resident
    w1f = _flatten_weight(w1).astype(jnp.bfloat16)
    b0r = b0.reshape(1, C).astype(jnp.float32)
    b1r = b1.reshape(1, C).astype(jnp.float32)
    # valid-column mask in the padded-width layout (precomputed, resident)
    mask = (jnp.arange(P2) % Wp < W).astype(jnp.float32).reshape(P2, 1)

    kernel = _make_fused_kernel(H, W, C)
    resident = lambda shape: pl.BlockSpec(shape, lambda n: (0,) * len(shape))

    out_pw = pl.pallas_call(
        kernel,
        out_shape=jax.ShapeDtypeStruct((N, P2, C), jnp.float32),
        grid=(N,),
        in_specs=[
            pl.BlockSpec((1, PF, C), lambda n: (n, 0, 0)),     # per-image block
            resident((9 * C, C)), resident((1, C)),            # conv0 weight / bias
            resident((9 * C, C)), resident((1, C)),            # conv1 weight / bias
            resident((P2, 1)),                                  # valid-column mask
        ],
        out_specs=pl.BlockSpec((1, P2, C), lambda n: (n, 0, 0)),
        scratch_shapes=[pltpu.VMEM((PF, C), jnp.float32)],      # padded intermediate
        compiler_params=pltpu.CompilerParams(
            dimension_semantics=("parallel",)),
        cost_estimate=pl.CostEstimate(
            flops=4 * N * P2 * 9 * C * C,                       # 2 convs, 2*P*9C*C each
            transcendentals=0,
            bytes_accessed=4 * N * C * (PF + P2) + 4 * 9 * C * C),
    )(xpf, w0f, b0r, w1f, b1r, mask)

    # drop the junk edge columns of the padded-width layout, back to NCHW
    out = out_pw.reshape(N, H, Wp, C)[:, :, :W, :]
    return jnp.transpose(out, (0, 3, 1, 2))


def make_params(key, inchan, scale=1.0):
    """Deterministic NormedConv2d init: Conv2d default uniform, per-output-filter
    L2-normalized to sqrt(scale); bias zeroed."""
    s = math.sqrt(scale)
    fan_in = inchan * 3 * 3
    bound = 1.0 / math.sqrt(fan_in)
    k0, k1 = jax.random.split(key)

    def one(k):
        w = jax.random.uniform(k, (inchan, inchan, 3, 3),
                               minval=-bound, maxval=bound, dtype=jnp.float32)
        norm = jnp.sqrt(jnp.sum(w * w, axis=(1, 2, 3), keepdims=True))
        return w * (s / norm)

    b = jnp.zeros((inchan,), jnp.float32)
    return one(k0), b, one(k1), b


# ---------------- reference (plain JAX, f32) for sanity ----------------

def ref_forward(x_nchw, w0, b0, w1, b1):
    def conv(x, w, b):
        y = jax.lax.conv_general_dilated(
            x, w, window_strides=(1, 1), padding='SAME',
            dimension_numbers=('NCHW', 'OIHW', 'NCHW'))
        return y + b.reshape(1, -1, 1, 1)

    r = conv(jax.nn.relu(x_nchw), w0, b0)
    r = conv(jax.nn.relu(r), w1, b1)
    return x_nchw + r


if __name__ == "__main__":
    key = jax.random.PRNGKey(0)
    kp, kx = jax.random.split(key)

    N, C, H, W = 2, 4, 16, 16
    w0, b0, w1, b1 = make_params(kp, C, scale=1.0)
    x = jax.random.normal(kx, (N, C, H, W), dtype=jnp.float32)

    fwd = jax.jit(cnn_basic_block)
    out = jax.block_until_ready(fwd(x, w0, b0, w1, b1))

    ref = jax.block_until_ready(ref_forward(x, w0, b0, w1, b1))
    assert out.shape == (N, C, H, W)
    # bf16 matmul inputs (f32 accumulation) vs. a pure-f32 reference
    assert jnp.allclose(out, ref, rtol=3e-2, atol=3e-2), "mismatch vs reference"

    print("KERNEL_OK")
</pallas_src>

<mosaic_0001>
module attributes {stable_mosaic.version = 11 : i64} {
  func.func @kernel(%arg0: i32, %arg1: memref<1x342x4xf32, #tpu.memory_space<vmem>>, %arg2: memref<36x4xbf16, #tpu.memory_space<vmem>>, %arg3: memref<1x4xf32, #tpu.memory_space<vmem>>, %arg4: memref<36x4xbf16, #tpu.memory_space<vmem>>, %arg5: memref<1x4xf32, #tpu.memory_space<vmem>>, %arg6: memref<288x1xf32, #tpu.memory_space<vmem>>, %arg7: memref<1x288x4xf32, #tpu.memory_space<vmem>>, %arg8: memref<342x4xf32, #tpu.memory_space<vmem>>) attributes {dimension_semantics = [#tpu.dimension_semantics<parallel>], iteration_bounds = array<i64: 2>, scalar_prefetch = 0 : i64, scratch_operands = 1 : i64, tpu.core_type = #tpu.core_type<tc>, window_params = [{transform_indices = @transform_0, window_bounds = array<i64: 1, 342, 4>}, {pipeline_mode = #tpu.pipeline_mode<synchronous>, transform_indices = @transform_1, window_bounds = array<i64: 36, 4>}, {pipeline_mode = #tpu.pipeline_mode<synchronous>, transform_indices = @transform_2, window_bounds = array<i64: 1, 4>}, {pipeline_mode = #tpu.pipeline_mode<synchronous>, transform_indices = @transform_3, window_bounds = array<i64: 36, 4>}, {pipeline_mode = #tpu.pipeline_mode<synchronous>, transform_indices = @transform_4, window_bounds = array<i64: 1, 4>}, {pipeline_mode = #tpu.pipeline_mode<synchronous>, transform_indices = @transform_5, window_bounds = array<i64: 288, 1>}, {transform_indices = @transform_6, window_bounds = array<i64: 1, 288, 4>}]} {
    %cst = arith.constant 0.000000e+00 : f32
    %0 = vector.broadcast %cst : f32 to vector<288x4xf32>
    %c0 = arith.constant 0 : index
    %c0_0 = arith.constant 0 : index
    %c0_1 = arith.constant 0 : index
    %1 = vector.load %arg1[%c0, %c0_0, %c0_1] : memref<1x342x4xf32, #tpu.memory_space<vmem>>, vector<1x288x4xf32>
    %2 = vector.shape_cast %1 : vector<1x288x4xf32> to vector<288x4xf32>
    %cst_2 = arith.constant 0.000000e+00 : f32
    %3 = vector.broadcast %cst_2 : f32 to vector<288x4xf32>
    %4 = arith.maximumf %2, %3 : vector<288x4xf32>
    %5 = arith.truncf %4 : vector<288x4xf32> to vector<288x4xbf16>
    %c0_3 = arith.constant 0 : index
    %c0_4 = arith.constant 0 : index
    %6 = vector.load %arg2[%c0_3, %c0_4] : memref<36x4xbf16, #tpu.memory_space<vmem>>, vector<4x4xbf16>
    %cst_5 = arith.constant dense<0.000000e+00> : vector<288x4xf32>
    %7 = tpu.matmul %5, %6, %cst_5 {dimension_numbers = #tpu.dot_dimension_numbers<[1], [0], [0], [1], [0, 0, 1, 1], [], []>} : vector<288x4xbf16>, vector<4x4xbf16>, vector<288x4xf32> -> vector<288x4xf32>
    %8 = arith.addf %0, %7 : vector<288x4xf32>
    %c0_6 = arith.constant 0 : index
    %c1 = arith.constant 1 : index
    %c0_7 = arith.constant 0 : index
    %9 = vector.load %arg1[%c0_6, %c1, %c0_7] : memref<1x342x4xf32, #tpu.memory_space<vmem>>, vector<1x288x4xf32>
    %10 = vector.shape_cast %9 : vector<1x288x4xf32> to vector<288x4xf32>
    %cst_8 = arith.constant 0.000000e+00 : f32
    %11 = vector.broadcast %cst_8 : f32 to vector<288x4xf32>
    %12 = arith.maximumf %10, %11 : vector<288x4xf32>
    %13 = arith.truncf %12 : vector<288x4xf32> to vector<288x4xbf16>
    %c4 = arith.constant 4 : index
    %c0_9 = arith.constant 0 : index
    %14 = vector.load %arg2[%c4, %c0_9] : memref<36x4xbf16, #tpu.memory_space<vmem>>, vector<4x4xbf16>
    %cst_10 = arith.constant dense<0.000000e+00> : vector<288x4xf32>
    %15 = tpu.matmul %13, %14, %cst_10 {dimension_numbers = #tpu.dot_dimension_numbers<[1], [0], [0], [1], [0, 0, 1, 1], [], []>} : vector<288x4xbf16>, vector<4x4xbf16>, vector<288x4xf32> -> vector<288x4xf32>
    %16 = arith.addf %8, %15 : vector<288x4xf32>
    %c0_11 = arith.constant 0 : index
    %c2 = arith.constant 2 : index
    %c0_12 = arith.constant 0 : index
    %17 = vector.load %arg1[%c0_11, %c2, %c0_12] : memref<1x342x4xf32, #tpu.memory_space<vmem>>, vector<1x288x4xf32>
    %18 = vector.shape_cast %17 : vector<1x288x4xf32> to vector<288x4xf32>
    %cst_13 = arith.constant 0.000000e+00 : f32
    %19 = vector.broadcast %cst_13 : f32 to vector<288x4xf32>
    %20 = arith.maximumf %18, %19 : vector<288x4xf32>
    %21 = arith.truncf %20 : vector<288x4xf32> to vector<288x4xbf16>
    %c8 = arith.constant 8 : index
    %c0_14 = arith.constant 0 : index
    %22 = vector.load %arg2[%c8, %c0_14] : memref<36x4xbf16, #tpu.memory_space<vmem>>, vector<4x4xbf16>
    %cst_15 = arith.constant dense<0.000000e+00> : vector<288x4xf32>
    %23 = tpu.matmul %21, %22, %cst_15 {dimension_numbers = #tpu.dot_dimension_numbers<[1], [0], [0], [1], [0, 0, 1, 1], [], []>} : vector<288x4xbf16>, vector<4x4xbf16>, vector<288x4xf32> -> vector<288x4xf32>
    %24 = arith.addf %16, %23 : vector<288x4xf32>
    %c0_16 = arith.constant 0 : index
    %c18 = arith.constant 18 : index
    %c0_17 = arith.constant 0 : index
    %25 = vector.load %arg1[%c0_16, %c18, %c0_17] : memref<1x342x4xf32, #tpu.memory_space<vmem>>, vector<1x288x4xf32>
    %26 = vector.shape_cast %25 : vector<1x288x4xf32> to vector<288x4xf32>
    %cst_18 = arith.constant 0.000000e+00 : f32
    %27 = vector.broadcast %cst_18 : f32 to vector<288x4xf32>
    %28 = arith.maximumf %26, %27 : vector<288x4xf32>
    %29 = arith.truncf %28 : vector<288x4xf32> to vector<288x4xbf16>
    %c12 = arith.constant 12 : index
    %c0_19 = arith.constant 0 : index
    %30 = vector.load %arg2[%c12, %c0_19] : memref<36x4xbf16, #tpu.memory_space<vmem>>, vector<4x4xbf16>
    %cst_20 = arith.constant dense<0.000000e+00> : vector<288x4xf32>
    %31 = tpu.matmul %29, %30, %cst_20 {dimension_numbers = #tpu.dot_dimension_numbers<[1], [0], [0], [1], [0, 0, 1, 1], [], []>} : vector<288x4xbf16>, vector<4x4xbf16>, vector<288x4xf32> -> vector<288x4xf32>
    %32 = arith.addf %24, %31 : vector<288x4xf32>
    %c0_21 = arith.constant 0 : index
    %c19 = arith.constant 19 : index
    %c0_22 = arith.constant 0 : index
    %33 = vector.load %arg1[%c0_21, %c19, %c0_22] : memref<1x342x4xf32, #tpu.memory_space<vmem>>, vector<1x288x4xf32>
    %34 = vector.shape_cast %33 : vector<1x288x4xf32> to vector<288x4xf32>
    %cst_23 = arith.constant 0.000000e+00 : f32
    %35 = vector.broadcast %cst_23 : f32 to vector<288x4xf32>
    %36 = arith.maximumf %34, %35 : vector<288x4xf32>
    %37 = arith.truncf %36 : vector<288x4xf32> to vector<288x4xbf16>
    %c16 = arith.constant 16 : index
    %c0_24 = arith.constant 0 : index
    %38 = vector.load %arg2[%c16, %c0_24] : memref<36x4xbf16, #tpu.memory_space<vmem>>, vector<4x4xbf16>
    %cst_25 = arith.constant dense<0.000000e+00> : vector<288x4xf32>
    %39 = tpu.matmul %37, %38, %cst_25 {dimension_numbers = #tpu.dot_dimension_numbers<[1], [0], [0], [1], [0, 0, 1, 1], [], []>} : vector<288x4xbf16>, vector<4x4xbf16>, vector<288x4xf32> -> vector<288x4xf32>
    %40 = arith.addf %32, %39 : vector<288x4xf32>
    %c0_26 = arith.constant 0 : index
    %c20 = arith.constant 20 : index
    %c0_27 = arith.constant 0 : index
    %41 = vector.load %arg1[%c0_26, %c20, %c0_27] : memref<1x342x4xf32, #tpu.memory_space<vmem>>, vector<1x288x4xf32>
    %42 = vector.shape_cast %41 : vector<1x288x4xf32> to vector<288x4xf32>
    %cst_28 = arith.constant 0.000000e+00 : f32
    %43 = vector.broadcast %cst_28 : f32 to vector<288x4xf32>
    %44 = arith.maximumf %42, %43 : vector<288x4xf32>
    %45 = arith.truncf %44 : vector<288x4xf32> to vector<288x4xbf16>
    %c20_29 = arith.constant 20 : index
    %c0_30 = arith.constant 0 : index
    %46 = vector.load %arg2[%c20_29, %c0_30] : memref<36x4xbf16, #tpu.memory_space<vmem>>, vector<4x4xbf16>
    %cst_31 = arith.constant dense<0.000000e+00> : vector<288x4xf32>
    %47 = tpu.matmul %45, %46, %cst_31 {dimension_numbers = #tpu.dot_dimension_numbers<[1], [0], [0], [1], [0, 0, 1, 1], [], []>} : vector<288x4xbf16>, vector<4x4xbf16>, vector<288x4xf32> -> vector<288x4xf32>
    %48 = arith.addf %40, %47 : vector<288x4xf32>
    %c0_32 = arith.constant 0 : index
    %c36 = arith.constant 36 : index
    %c0_33 = arith.constant 0 : index
    %49 = vector.load %arg1[%c0_32, %c36, %c0_33] : memref<1x342x4xf32, #tpu.memory_space<vmem>>, vector<1x288x4xf32>
    %50 = vector.shape_cast %49 : vector<1x288x4xf32> to vector<288x4xf32>
    %cst_34 = arith.constant 0.000000e+00 : f32
    %51 = vector.broadcast %cst_34 : f32 to vector<288x4xf32>
    %52 = arith.maximumf %50, %51 : vector<288x4xf32>
    %53 = arith.truncf %52 : vector<288x4xf32> to vector<288x4xbf16>
    %c24 = arith.constant 24 : index
    %c0_35 = arith.constant 0 : index
    %54 = vector.load %arg2[%c24, %c0_35] : memref<36x4xbf16, #tpu.memory_space<vmem>>, vector<4x4xbf16>
    %cst_36 = arith.constant dense<0.000000e+00> : vector<288x4xf32>
    %55 = tpu.matmul %53, %54, %cst_36 {dimension_numbers = #tpu.dot_dimension_numbers<[1], [0], [0], [1], [0, 0, 1, 1], [], []>} : vector<288x4xbf16>, vector<4x4xbf16>, vector<288x4xf32> -> vector<288x4xf32>
    %56 = arith.addf %48, %55 : vector<288x4xf32>
    %c0_37 = arith.constant 0 : index
    %c37 = arith.constant 37 : index
    %c0_38 = arith.constant 0 : index
    %57 = vector.load %arg1[%c0_37, %c37, %c0_38] : memref<1x342x4xf32, #tpu.memory_space<vmem>>, vector<1x288x4xf32>
    %58 = vector.shape_cast %57 : vector<1x288x4xf32> to vector<288x4xf32>
    %cst_39 = arith.constant 0.000000e+00 : f32
    %59 = vector.broadcast %cst_39 : f32 to vector<288x4xf32>
    %60 = arith.maximumf %58, %59 : vector<288x4xf32>
    %61 = arith.truncf %60 : vector<288x4xf32> to vector<288x4xbf16>
    %c28 = arith.constant 28 : index
    %c0_40 = arith.constant 0 : index
    %62 = vector.load %arg2[%c28, %c0_40] : memref<36x4xbf16, #tpu.memory_space<vmem>>, vector<4x4xbf16>
    %cst_41 = arith.constant dense<0.000000e+00> : vector<288x4xf32>
    %63 = tpu.matmul %61, %62, %cst_41 {dimension_numbers = #tpu.dot_dimension_numbers<[1], [0], [0], [1], [0, 0, 1, 1], [], []>} : vector<288x4xbf16>, vector<4x4xbf16>, vector<288x4xf32> -> vector<288x4xf32>
    %64 = arith.addf %56, %63 : vector<288x4xf32>
    %c0_42 = arith.constant 0 : index
    %c38 = arith.constant 38 : index
    %c0_43 = arith.constant 0 : index
    %65 = vector.load %arg1[%c0_42, %c38, %c0_43] : memref<1x342x4xf32, #tpu.memory_space<vmem>>, vector<1x288x4xf32>
    %66 = vector.shape_cast %65 : vector<1x288x4xf32> to vector<288x4xf32>
    %cst_44 = arith.constant 0.000000e+00 : f32
    %67 = vector.broadcast %cst_44 : f32 to vector<288x4xf32>
    %68 = arith.maximumf %66, %67 : vector<288x4xf32>
    %69 = arith.truncf %68 : vector<288x4xf32> to vector<288x4xbf16>
    %c32 = arith.constant 32 : index
    %c0_45 = arith.constant 0 : index
    %70 = vector.load %arg2[%c32, %c0_45] : memref<36x4xbf16, #tpu.memory_space<vmem>>, vector<4x4xbf16>
    %cst_46 = arith.constant dense<0.000000e+00> : vector<288x4xf32>
    %71 = tpu.matmul %69, %70, %cst_46 {dimension_numbers = #tpu.dot_dimension_numbers<[1], [0], [0], [1], [0, 0, 1, 1], [], []>} : vector<288x4xbf16>, vector<4x4xbf16>, vector<288x4xf32> -> vector<288x4xf32>
    %72 = arith.addf %64, %71 : vector<288x4xf32>
    %c0_47 = arith.constant 0 : index
    %c0_48 = arith.constant 0 : index
    %73 = vector.load %arg3[%c0_47, %c0_48] : memref<1x4xf32, #tpu.memory_space<vmem>>, vector<1x4xf32>
    %74 = vector.broadcast %73 : vector<1x4xf32> to vector<288x4xf32>
    %75 = arith.addf %72, %74 : vector<288x4xf32>
    %cst_49 = arith.constant 0.000000e+00 : f32
    %76 = vector.broadcast %cst_49 : f32 to vector<288x4xf32>
    %77 = arith.maximumf %75, %76 : vector<288x4xf32>
    %c0_50 = arith.constant 0 : index
    %c0_51 = arith.constant 0 : index
    %78 = vector.load %arg6[%c0_50, %c0_51] : memref<288x1xf32, #tpu.memory_space<vmem>>, vector<288x1xf32>
    %79 = vector.broadcast %78 : vector<288x1xf32> to vector<288x4xf32>
    %80 = arith.mulf %77, %79 : vector<288x4xf32>
    %cst_52 = arith.constant 0.000000e+00 : f32
    %81 = vector.broadcast %cst_52 : f32 to vector<342x4xf32>
    %c0_53 = arith.constant 0 : index
    %c0_54 = arith.constant 0 : index
    %82 = vector.load %arg8[%c0_53, %c0_54] : memref<342x4xf32, #tpu.memory_space<vmem>>, vector<342x4xf32>
    tpu.vector_store %arg8[%c0_53, %c0_54], %81 {strides = array<i32>} : memref<342x4xf32, #tpu.memory_space<vmem>>, vector<342x4xf32>,
    %c19_55 = arith.constant 19 : index
    %c0_56 = arith.constant 0 : index
    %83 = vector.load %arg8[%c19_55, %c0_56] : memref<342x4xf32, #tpu.memory_space<vmem>>, vector<288x4xf32>
    tpu.vector_store %arg8[%c19_55, %c0_56], %80 {strides = array<i32>} : memref<342x4xf32, #tpu.memory_space<vmem>>, vector<288x4xf32>,
    %cst_57 = arith.constant 0.000000e+00 : f32
    %84 = vector.broadcast %cst_57 : f32 to vector<288x4xf32>
    %c0_58 = arith.constant 0 : index
    %c0_59 = arith.constant 0 : index
    %85 = vector.load %arg8[%c0_58, %c0_59] : memref<342x4xf32, #tpu.memory_space<vmem>>, vector<288x4xf32>
    %86 = arith.truncf %85 : vector<288x4xf32> to vector<288x4xbf16>
    %c0_60 = arith.constant 0 : index
    %c0_61 = arith.constant 0 : index
    %87 = vector.load %arg4[%c0_60, %c0_61] : memref<36x4xbf16, #tpu.memory_space<vmem>>, vector<4x4xbf16>
    %cst_62 = arith.constant dense<0.000000e+00> : vector<288x4xf32>
    %88 = tpu.matmul %86, %87, %cst_62 {dimension_numbers = #tpu.dot_dimension_numbers<[1], [0], [0], [1], [0, 0, 1, 1], [], []>} : vector<288x4xbf16>, vector<4x4xbf16>, vector<288x4xf32> -> vector<288x4xf32>
    %89 = arith.addf %84, %88 : vector<288x4xf32>
    %c1_63 = arith.constant 1 : index
    %c0_64 = arith.constant 0 : index
    %90 = vector.load %arg8[%c1_63, %c0_64] : memref<342x4xf32, #tpu.memory_space<vmem>>, vector<288x4xf32>
    %91 = arith.truncf %90 : vector<288x4xf32> to vector<288x4xbf16>
    %c4_65 = arith.constant 4 : index
    %c0_66 = arith.constant 0 : index
    %92 = vector.load %arg4[%c4_65, %c0_66] : memref<36x4xbf16, #tpu.memory_space<vmem>>, vector<4x4xbf16>
    %cst_67 = arith.constant dense<0.000000e+00> : vector<288x4xf32>
    %93 = tpu.matmul %91, %92, %cst_67 {dimension_numbers = #tpu.dot_dimension_numbers<[1], [0], [0], [1], [0, 0, 1, 1], [], []>} : vector<288x4xbf16>, vector<4x4xbf16>, vector<288x4xf32> -> vector<288x4xf32>
    %94 = arith.addf %89, %93 : vector<288x4xf32>
    %c2_68 = arith.constant 2 : index
    %c0_69 = arith.constant 0 : index
    %95 = vector.load %arg8[%c2_68, %c0_69] : memref<342x4xf32, #tpu.memory_space<vmem>>, vector<288x4xf32>
    %96 = arith.truncf %95 : vector<288x4xf32> to vector<288x4xbf16>
    %c8_70 = arith.constant 8 : index
    %c0_71 = arith.constant 0 : index
    %97 = vector.load %arg4[%c8_70, %c0_71] : memref<36x4xbf16, #tpu.memory_space<vmem>>, vector<4x4xbf16>
    %cst_72 = arith.constant dense<0.000000e+00> : vector<288x4xf32>
    %98 = tpu.matmul %96, %97, %cst_72 {dimension_numbers = #tpu.dot_dimension_numbers<[1], [0], [0], [1], [0, 0, 1, 1], [], []>} : vector<288x4xbf16>, vector<4x4xbf16>, vector<288x4xf32> -> vector<288x4xf32>
    %99 = arith.addf %94, %98 : vector<288x4xf32>
    %c18_73 = arith.constant 18 : index
    %c0_74 = arith.constant 0 : index
    %100 = vector.load %arg8[%c18_73, %c0_74] : memref<342x4xf32, #tpu.memory_space<vmem>>, vector<288x4xf32>
    %101 = arith.truncf %100 : vector<288x4xf32> to vector<288x4xbf16>
    %c12_75 = arith.constant 12 : index
    %c0_76 = arith.constant 0 : index
    %102 = vector.load %arg4[%c12_75, %c0_76] : memref<36x4xbf16, #tpu.memory_space<vmem>>, vector<4x4xbf16>
    %cst_77 = arith.constant dense<0.000000e+00> : vector<288x4xf32>
    %103 = tpu.matmul %101, %102, %cst_77 {dimension_numbers = #tpu.dot_dimension_numbers<[1], [0], [0], [1], [0, 0, 1, 1], [], []>} : vector<288x4xbf16>, vector<4x4xbf16>, vector<288x4xf32> -> vector<288x4xf32>
    %104 = arith.addf %99, %103 : vector<288x4xf32>
    %c19_78 = arith.constant 19 : index
    %c0_79 = arith.constant 0 : index
    %105 = vector.load %arg8[%c19_78, %c0_79] : memref<342x4xf32, #tpu.memory_space<vmem>>, vector<288x4xf32>
    %106 = arith.truncf %105 : vector<288x4xf32> to vector<288x4xbf16>
    %c16_80 = arith.constant 16 : index
    %c0_81 = arith.constant 0 : index
    %107 = vector.load %arg4[%c16_80, %c0_81] : memref<36x4xbf16, #tpu.memory_space<vmem>>, vector<4x4xbf16>
    %cst_82 = arith.constant dense<0.000000e+00> : vector<288x4xf32>
    %108 = tpu.matmul %106, %107, %cst_82 {dimension_numbers = #tpu.dot_dimension_numbers<[1], [0], [0], [1], [0, 0, 1, 1], [], []>} : vector<288x4xbf16>, vector<4x4xbf16>, vector<288x4xf32> -> vector<288x4xf32>
    %109 = arith.addf %104, %108 : vector<288x4xf32>
    %c20_83 = arith.constant 20 : index
    %c0_84 = arith.constant 0 : index
    %110 = vector.load %arg8[%c20_83, %c0_84] : memref<342x4xf32, #tpu.memory_space<vmem>>, vector<288x4xf32>
    %111 = arith.truncf %110 : vector<288x4xf32> to vector<288x4xbf16>
    %c20_85 = arith.constant 20 : index
    %c0_86 = arith.constant 0 : index
    %112 = vector.load %arg4[%c20_85, %c0_86] : memref<36x4xbf16, #tpu.memory_space<vmem>>, vector<4x4xbf16>
    %cst_87 = arith.constant dense<0.000000e+00> : vector<288x4xf32>
    %113 = tpu.matmul %111, %112, %cst_87 {dimension_numbers = #tpu.dot_dimension_numbers<[1], [0], [0], [1], [0, 0, 1, 1], [], []>} : vector<288x4xbf16>, vector<4x4xbf16>, vector<288x4xf32> -> vector<288x4xf32>
    %114 = arith.addf %109, %113 : vector<288x4xf32>
    %c36_88 = arith.constant 36 : index
    %c0_89 = arith.constant 0 : index
    %115 = vector.load %arg8[%c36_88, %c0_89] : memref<342x4xf32, #tpu.memory_space<vmem>>, vector<288x4xf32>
    %116 = arith.truncf %115 : vector<288x4xf32> to vector<288x4xbf16>
    %c24_90 = arith.constant 24 : index
    %c0_91 = arith.constant 0 : index
    %117 = vector.load %arg4[%c24_90, %c0_91] : memref<36x4xbf16, #tpu.memory_space<vmem>>, vector<4x4xbf16>
    %cst_92 = arith.constant dense<0.000000e+00> : vector<288x4xf32>
    %118 = tpu.matmul %116, %117, %cst_92 {dimension_numbers = #tpu.dot_dimension_numbers<[1], [0], [0], [1], [0, 0, 1, 1], [], []>} : vector<288x4xbf16>, vector<4x4xbf16>, vector<288x4xf32> -> vector<288x4xf32>
    %119 = arith.addf %114, %118 : vector<288x4xf32>
    %c37_93 = arith.constant 37 : index
    %c0_94 = arith.constant 0 : index
    %120 = vector.load %arg8[%c37_93, %c0_94] : memref<342x4xf32, #tpu.memory_space<vmem>>, vector<288x4xf32>
    %121 = arith.truncf %120 : vector<288x4xf32> to vector<288x4xbf16>
    %c28_95 = arith.constant 28 : index
    %c0_96 = arith.constant 0 : index
    %122 = vector.load %arg4[%c28_95, %c0_96] : memref<36x4xbf16, #tpu.memory_space<vmem>>, vector<4x4xbf16>
    %cst_97 = arith.constant dense<0.000000e+00> : vector<288x4xf32>
    %123 = tpu.matmul %121, %122, %cst_97 {dimension_numbers = #tpu.dot_dimension_numbers<[1], [0], [0], [1], [0, 0, 1, 1], [], []>} : vector<288x4xbf16>, vector<4x4xbf16>, vector<288x4xf32> -> vector<288x4xf32>
    %124 = arith.addf %119, %123 : vector<288x4xf32>
    %c38_98 = arith.constant 38 : index
    %c0_99 = arith.constant 0 : index
    %125 = vector.load %arg8[%c38_98, %c0_99] : memref<342x4xf32, #tpu.memory_space<vmem>>, vector<288x4xf32>
    %126 = arith.truncf %125 : vector<288x4xf32> to vector<288x4xbf16>
    %c32_100 = arith.constant 32 : index
    %c0_101 = arith.constant 0 : index
    %127 = vector.load %arg4[%c32_100, %c0_101] : memref<36x4xbf16, #tpu.memory_space<vmem>>, vector<4x4xbf16>
    %cst_102 = arith.constant dense<0.000000e+00> : vector<288x4xf32>
    %128 = tpu.matmul %126, %127, %cst_102 {dimension_numbers = #tpu.dot_dimension_numbers<[1], [0], [0], [1], [0, 0, 1, 1], [], []>} : vector<288x4xbf16>, vector<4x4xbf16>, vector<288x4xf32> -> vector<288x4xf32>
    %129 = arith.addf %124, %128 : vector<288x4xf32>
    %c0_103 = arith.constant 0 : index
    %c19_104 = arith.constant 19 : index
    %c0_105 = arith.constant 0 : index
    %130 = vector.load %arg1[%c0_103, %c19_104, %c0_105] : memref<1x342x4xf32, #tpu.memory_space<vmem>>, vector<1x288x4xf32>
    %131 = vector.shape_cast %130 : vector<1x288x4xf32> to vector<288x4xf32>
    %132 = arith.addf %131, %129 : vector<288x4xf32>
    %c0_106 = arith.constant 0 : index
    %c0_107 = arith.constant 0 : index
    %133 = vector.load %arg5[%c0_106, %c0_107] : memref<1x4xf32, #tpu.memory_space<vmem>>, vector<1x4xf32>
    %134 = vector.broadcast %133 : vector<1x4xf32> to vector<288x4xf32>
    %135 = arith.addf %132, %134 : vector<288x4xf32>
    %c0_108 = arith.constant 0 : index
    %c0_109 = arith.constant 0 : index
    %c0_110 = arith.constant 0 : index
    %136 = vector.load %arg7[%c0_108, %c0_109, %c0_110] : memref<1x288x4xf32, #tpu.memory_space<vmem>>, vector<1x288x4xf32>
    %137 = vector.shape_cast %136 : vector<1x288x4xf32> to vector<288x4xf32>
    %138 = vector.shape_cast %135 : vector<288x4xf32> to vector<1x288x4xf32>
    tpu.vector_store %arg7[%c0_108, %c0_109, %c0_110], %138 {strides = array<i32>} : memref<1x288x4xf32, #tpu.memory_space<vmem>>, vector<1x288x4xf32>,
    return
  }
  func.func @transform_0(%arg0: i32) -> (i32, i32, i32) {
    %c0_i32 = arith.constant 0 : i32
    %c0_i32_0 = arith.constant 0 : i32
    %c0_i32_1 = arith.constant 0 : i32
    return %arg0, %c0_i32, %c0_i32_0 : i32, i32, i32
  }
  func.func @transform_1(%arg0: i32) -> (i32, i32) {
    %c0_i32 = arith.constant 0 : i32
    %c0_i32_0 = arith.constant 0 : i32
    %c0_i32_1 = arith.constant 0 : i32
    return %c0_i32, %c0_i32_0 : i32, i32
  }
  func.func @transform_2(%arg0: i32) -> (i32, i32) {
    %c0_i32 = arith.constant 0 : i32
    %c0_i32_0 = arith.constant 0 : i32
    %c0_i32_1 = arith.constant 0 : i32
    return %c0_i32, %c0_i32_0 : i32, i32
  }
  func.func @transform_3(%arg0: i32) -> (i32, i32) {
    %c0_i32 = arith.constant 0 : i32
    %c0_i32_0 = arith.constant 0 : i32
    %c0_i32_1 = arith.constant 0 : i32
    return %c0_i32, %c0_i32_0 : i32, i32
  }
  func.func @transform_4(%arg0: i32) -> (i32, i32) {
    %c0_i32 = arith.constant 0 : i32
    %c0_i32_0 = arith.constant 0 : i32
    %c0_i32_1 = arith.constant 0 : i32
    return %c0_i32, %c0_i32_0 : i32, i32
  }
  func.func @transform_5(%arg0: i32) -> (i32, i32) {
    %c0_i32 = arith.constant 0 : i32
    %c0_i32_0 = arith.constant 0 : i32
    %c0_i32_1 = arith.constant 0 : i32
    return %c0_i32, %c0_i32_0 : i32, i32
  }
  func.func @transform_6(%arg0: i32) -> (i32, i32, i32) {
    %c0_i32 = arith.constant 0 : i32
    %c0_i32_0 = arith.constant 0 : i32
    %c0_i32_1 = arith.constant 0 : i32
    return %arg0, %c0_i32, %c0_i32_0 : i32, i32, i32
  }
}

</mosaic_0001>

<bundles_post_ra>
// kernel: cnn_basic_block.1
= control target key start
LH: loop header
LB: loop body
LE: loop exit
PB: predicated region body
PF: predicated region fallthrough
CT: control target
= control target key end

     0   :  { %s5922_s21 = smov 0   ;;  %s7708_s0 = inlined_call_operand.vmem [shape: f32[2,342,4], index: 0, kind: input, shape index: {}]   ;;  %s7709_s1 = inlined_call_operand.vmem [shape: bf16[36,4], index: 1, kind: input, shape index: {}]   ;;  %s7710_s2 = inlined_call_operand.vmem [shape: f32[1,4], index: 2, kind: input, shape index: {}]   ;;  %s7711_s3 = inlined_call_operand.vmem [shape: bf16[36,4], index: 3, kind: input, shape index: {}]   ;;  %s7712_s4 = inlined_call_operand.vmem [shape: f32[1,4], index: 4, kind: input, shape index: {}]   ;;  %s7713_s5 = inlined_call_operand.vmem [shape: f32[288,1], index: 5, kind: input, shape index: {}]   ;;  %s7714_s6 = inlined_call_operand.vmem [shape: f32[2,288,4], index: 6, kind: output, shape index: {}]  }
   0x1 LB: > { %s5524_s22 = sadd.s32 4294967295, %s5883_s21   ;;  %p5528_p0 = scmp.ge.s32.totalorder %s5883_s21, 1  ;;  %s5883_s21 = sphi %s5922_s21, %s16_s21  }
   0x2   : > { %p212_p1 = scmp.lt.s32.totalorder %s5883_s21, 3 }
   0x4   : > { %p213_p2 = pnand %p5528_p0, %p212_p1 }
   0x6   : > { %216 = sbr.rel (%p213_p2) target bundleno = 1591 (0x637), region = 44 }
   0xb   : > { %v434_v0 = vld [vmem:[%s7709_s1] sm:$0xc]  ;;  %vm494_vm0 = vcmask 1041408   ;;  %v343_v1 = vld [vmem:[%s7709_s1] sm:$0x3]  ;;  %p242_p3 = scmp.lt.s32.totalorder %s5524_s22, 1 }
   0xc   : > { %v436_v2 = vunpack.c.l.b16 %v434_v0  ;;  %v652_v3 = vsel %vm494_vm0, %v343_v1, 0  ;;  %v1126_v4 = vld [vmem:[%s7709_s1 + $0x4] sm:$0xc]  ;;  %v843_v7 = vld [vmem:[%s7709_s1 + $0x4] sm:$0x3]  ;;  %vm439_vm1 = vcmask 31744  }
   0xd   : > { %5858 = vmatpush.bf16.msra.mxu3 %v652_v3  ;;  %661 = vmatpush.bf16.msra.mxu1 %v652_v3  ;;  %s7734_s22 = smov (!%p242_p3, %s5524_s22), 1  ;;  %v1128_v5 = vunpack.c.l.b16 %v1126_v4  ;;  %v1413_v8 = vld [vmem:[%s7709_s1 + $0x8] sm:$0x3]  ;;  %v899_v11 = vsel %vm494_vm0, %v843_v7, 0 }
   0xe   : > { %v437_v6 = vpack.c.b16 %v436_v2, %v436_v2  ;;  %s5859_s9 = smul.u32 344, %s7734_s22  ;;  %v1469_v13 = vsel %vm494_vm0, %v1413_v8, 0 }
   0xf   : > { %v1129_v9 = vpack.c.b16 %v1128_v5, %v1128_v5 }
  0x10   : > { %v438_v10 = vrot.slane %v437_v6, 2  ;;  %s5952_s12 = scalar_lea.vmem %s7708_s0, %s5859_s9  ;;  %s5860_s9 = smul.u32 288, %s7734_s22 }
  0x11   : > { %v1130_v12 = vrot.slane %v1129_v9, 2  ;;  %v344_v15 = vld [vmem:[%s5952_s12 + $0x1] sm:$0xff]  ;;  %v345_v16 = vld [vmem:[%s5952_s12 + $0x9] sm:$0xff]  ;;  %v362_v17 = vld [vmem:[%s5952_s12 + $0x91] sm:$0xff] }
  0x12   : > { %v496_v14 = vsel %vm494_vm0, %v438_v10, 0  ;;  %v380_v18 = vmax.f32 %v344_v15, 0.0  ;;  %v381_v19 = vmax.f32 %v345_v16, 0.0  ;;  %v363_v20 = vld [vmem:[%s5952_s12 + $0x99] sm:$0xff]  ;;  %v398_v21 = vmax.f32 %v362_v17, 0.0  ;;  %v271_v22 = vld [vmem:[%s5952_s12 + $0x90] sm:$0xff]  ;;  %s7474_s14 = scalar_lea.vmem %s7714_s6, %s5860_s9 }
  0x13   : > { %505 = vmatpush.bf16.msra.mxu0 %v496_v14  ;;  %5857 = vmatpush.bf16.msra.mxu2 %v496_v14  ;;  %v272_v23 = vld [vmem:[%s5952_s12 + $0x98] sm:$0xff]  ;;  %v399_v24 = vmax.f32 %v363_v20, 0.0  ;;  %v307_v25 = vmax.f32 %v271_v22, 0.0  ;;  %v253_v27 = vld [vmem:[%s5952_s12] sm:$0xff]  ;;  %v254_v28 = vld [vmem:[%s5952_s12 + $0x8] sm:$0xff]  ;;  %v1186_v29 = vsel %vm494_vm0, %v1130_v12, 0 }
  0x14   : > { %v308_v26 = vmax.f32 %v272_v23, 0.0  ;;  %v416_v30 = vpack.c.bf16 %v381_v19, %v380_v18  ;;  %v289_v31 = vmax.f32 %v253_v27, 0.0  ;;  %v290_v32 = vmax.f32 %v254_v28, 0.0  ;;  %1195 = vmatpush.bf16.msrb.mxu3 %v1186_v29  ;;  %v346_v36 = vld [vmem:[%s5952_s12 + $0x11] sm:$0xff]  ;;  %v347_v37 = vld [vmem:[%s5952_s12 + $0x19] sm:$0xff]  ;;  %v364_v38 = vld [vmem:[%s5952_s12 + $0xa1] sm:$0xff] }
  0x15   : > { %v425_v33 = vpack.c.bf16 %v399_v24, %v398_v21  ;;  %v365_v39 = vld [vmem:[%s5952_s12 + $0xa9] sm:$0xff]  ;;  %v273_v40 = vld [vmem:[%s5952_s12 + $0xa0] sm:$0xff]  ;;  %v256_v43 = vld [vmem:[%s5952_s12 + $0x18] sm:$0xff]  ;;  %v382_v44 = vmax.f32 %v346_v36, 0.0  ;;  %v383_v45 = vmax.f32 %v347_v37, 0.0  ;;  %v400_v46 = vmax.f32 %v364_v38, 0.0 }
  0x16   : > { %v334_v34 = vpack.c.bf16 %v308_v26, %v307_v25  ;;  %5531 = vmatmul.msk.bf16.vlgmr.msra.gmra.mxu0 %vm439_vm1, %v416_v30  ;;  %v325_v35 = vpack.c.bf16 %v290_v32, %v289_v31  ;;  %v274_v41 = vld [vmem:[%s5952_s12 + $0xa8] sm:$0xff]  ;;  %v255_v42 = vld [vmem:[%s5952_s12 + $0x10] sm:$0xff]  ;;  %v401_v47 = vmax.f32 %v365_v39, 0.0  ;;  %v309_v48 = vmax.f32 %v273_v40, 0.0  ;;  %v367_v59 = vld [vmem:[%s5952_s12 + $0xb9] sm:$0xff] }
  0x17   : > { %908 = vmatpush.bf16.msrb.mxu2 %v899_v11  ;;  %1478 = vmatpush.bf16.msrb.mxu0 %v1469_v13  ;;  %v310_v49 = vmax.f32 %v274_v41, 0.0  ;;  %v291_v50 = vmax.f32 %v255_v42, 0.0  ;;  %v292_v51 = vmax.f32 %v256_v43, 0.0  ;;  %v417_v52 = vpack.c.bf16 %v383_v45, %v382_v44  ;;  %v348_v56 = vld [vmem:[%s5952_s12 + $0x21] sm:$0xff]  ;;  %v349_v57 = vld [vmem:[%s5952_s12 + $0x29] sm:$0xff]  ;;  %v366_v58 = vld [vmem:[%s5952_s12 + $0xb1] sm:$0xff] }
  0x18   : > { %5540 = vmatmul.msk.bf16.vlgmr.msra.gmra.mxu2 %vm439_vm1, %v425_v33  ;;  %5558 = vmatmul.msk.bf16.vlgmr.msra.gmra.mxu3 %vm439_vm1, %v334_v34  ;;  %v426_v53 = vpack.c.bf16 %v401_v47, %v400_v46  ;;  %v275_v60 = vld [vmem:[%s5952_s12 + $0xb0] sm:$0xff]  ;;  %v276_v61 = vld [vmem:[%s5952_s12 + $0xb8] sm:$0xff]  ;;  %v257_v62 = vld [vmem:[%s5952_s12 + $0x20] sm:$0xff]  ;;  %v384_v0 = vmax.f32 %v348_v56, 0.0  ;;  %v385_v1 = vmax.f32 %v349_v57, 0.0  ;;  %v402_v2 = vmax.f32 %v366_v58, 0.0 }
  0x19   : > { %5549 = vmatmul.msk.bf16.vlgmr.msra.gmra.mxu1 %vm439_vm1, %v325_v35  ;;  %v335_v54 = vpack.c.bf16 %v310_v49, %v309_v48  ;;  %v326_v55 = vpack.c.bf16 %v292_v51, %v291_v50  ;;  %v258_v63 = vld [vmem:[%s5952_s12 + $0x28] sm:$0xff]  ;;  %v403_v3 = vmax.f32 %v367_v59, 0.0  ;;  %v311_v4 = vmax.f32 %v275_v60, 0.0  ;;  %v350_v12 = vld [vmem:[%s5952_s12 + $0x31] sm:$0xff]  ;;  %v351_v13 = vld [vmem:[%s5952_s12 + $0x39] sm:$0xff] }
  0x1a   : > { %v312_v5 = vmax.f32 %v276_v61, 0.0  ;;  %v293_v6 = vmax.f32 %v257_v62, 0.0  ;;  %v294_v7 = vmax.f32 %v258_v63, 0.0  ;;  %v418_v8 = vpack.c.bf16 %v385_v1, %v384_v0  ;;  %v368_v14 = vld [vmem:[%s5952_s12 + $0xc1] sm:$0xff]  ;;  %v369_v15 = vld [vmem:[%s5952_s12 + $0xc9] sm:$0xff]  ;;  %v260_v19 = vld [vmem:[%s5952_s12 + $0x38] sm:$0xff] }
  0x1b   : > { %v427_v9 = vpack.c.bf16 %v403_v3, %v402_v2  ;;  %v277_v16 = vld [vmem:[%s5952_s12 + $0xc0] sm:$0xff]  ;;  %v278_v17 = vld [vmem:[%s5952_s12 + $0xc8] sm:$0xff]  ;;  %v259_v18 = vld [vmem:[%s5952_s12 + $0x30] sm:$0xff]  ;;  %v386_v20 = vmax.f32 %v350_v12, 0.0  ;;  %v387_v21 = vmax.f32 %v351_v13, 0.0  ;;  %v404_v22 = vmax.f32 %v368_v14, 0.0 }
  0x1c   : > { %v336_v10 = vpack.c.bf16 %v312_v5, %v311_v4  ;;  %v327_v11 = vpack.c.bf16 %v294_v7, %v293_v6  ;;  %v405_v23 = vmax.f32 %v369_v15, 0.0  ;;  %v313_v24 = vmax.f32 %v277_v16, 0.0  ;;  %v352_v32 = vld [vmem:[%s5952_s12 + $0x41] sm:$0xff]  ;;  %v353_v33 = vld [vmem:[%s5952_s12 + $0x49] sm:$0xff]  ;;  %v370_v34 = vld [vmem:[%s5952_s12 + $0xd1] sm:$0xff] }
  0x1d   : > { %v314_v25 = vmax.f32 %v278_v17, 0.0  ;;  %v295_v26 = vmax.f32 %v259_v18, 0.0  ;;  %v296_v27 = vmax.f32 %v260_v19, 0.0  ;;  %v419_v28 = vpack.c.bf16 %v387_v21, %v386_v20  ;;  %v371_v35 = vld [vmem:[%s5952_s12 + $0xd9] sm:$0xff]  ;;  %v279_v36 = vld [vmem:[%s5952_s12 + $0xd0] sm:$0xff]  ;;  %v262_v39 = vld [vmem:[%s5952_s12 + $0x48] sm:$0xff] }
  0x1e   : > { %v428_v29 = vpack.c.bf16 %v405_v23, %v404_v22  ;;  %v280_v37 = vld [vmem:[%s5952_s12 + $0xd8] sm:$0xff]  ;;  %v261_v38 = vld [vmem:[%s5952_s12 + $0x40] sm:$0xff]  ;;  %v388_v40 = vmax.f32 %v352_v32, 0.0  ;;  %v389_v41 = vmax.f32 %v353_v33, 0.0  ;;  %v406_v42 = vmax.f32 %v370_v34, 0.0  ;;  %v282_v57 = vld [vmem:[%s5952_s12 + $0xe8] sm:$0xff] }
  0x1f   : > { %v337_v30 = vpack.c.bf16 %v314_v25, %v313_v24  ;;  %v328_v31 = vpack.c.bf16 %v296_v27, %v295_v26  ;;  %v407_v43 = vmax.f32 %v371_v35, 0.0  ;;  %v315_v44 = vmax.f32 %v279_v36, 0.0  ;;  %v281_v56 = vld [vmem:[%s5952_s12 + $0xe0] sm:$0xff]  ;;  %v263_v58 = vld [vmem:[%s5952_s12 + $0x50] sm:$0xff]  ;;  %v264_v59 = vld [vmem:[%s5952_s12 + $0x58] sm:$0xff] }
  0x20   : > { %v316_v45 = vmax.f32 %v280_v37, 0.0  ;;  %v297_v46 = vmax.f32 %v261_v38, 0.0  ;;  %v298_v47 = vmax.f32 %v262_v39, 0.0  ;;  %v420_v48 = vpack.c.bf16 %v389_v41, %v388_v40  ;;  %v283_v12 = vld [vmem:[%s5952_s12 + $0xf0] sm:$0xff]  ;;  %v284_v13 = vld [vmem:[%s5952_s12 + $0xf8] sm:$0xff]  ;;  %v265_v14 = vld [vmem:[%s5952_s12 + $0x60] sm:$0xff] }
  0x21   : > { %v429_v49 = vpack.c.bf16 %v407_v43, %v406_v42  ;;  %v317_v0 = vmax.f32 %v281_v56, 0.0  ;;  %v318_v1 = vmax.f32 %v282_v57, 0.0  ;;  %v299_v2 = vmax.f32 %v263_v58, 0.0  ;;  %v266_v15 = vld [vmem:[%s5952_s12 + $0x68] sm:$0xff]  ;;  %v285_v32 = vld [vmem:[%s5952_s12 + $0x100] sm:$0xff]  ;;  %v267_v34 = vld [vmem:[%s5952_s12 + $0x70] sm:$0xff] }
  0x22   : > { %v338_v50 = vpack.c.bf16 %v316_v45, %v315_v44  ;;  %v329_v51 = vpack.c.bf16 %v298_v47, %v297_v46  ;;  %v300_v3 = vmax.f32 %v264_v59, 0.0  ;;  %v319_v20 = vmax.f32 %v283_v12, 0.0  ;;  %v286_v33 = vld [vmem:[%s5952_s12 + $0x108] sm:$0xff]  ;;  %v268_v35 = vld [vmem:[%s5952_s12 + $0x78] sm:$0xff] }
  0x23   : > { %v339_v6 = vpack.c.bf16 %v318_v1, %v317_v0  ;;  %v320_v21 = vmax.f32 %v284_v13, 0.0  ;;  %v301_v22 = vmax.f32 %v265_v14, 0.0  ;;  %v302_v23 = vmax.f32 %v266_v15, 0.0  ;;  %v361_v57 = vld [vmem:[%s5952_s12 + $0x89] sm:$0xff]  ;;  %v378_v58 = vld [vmem:[%s5952_s12 + $0x111] sm:$0xff]  ;;  %v379_v59 = vld [vmem:[%s5952_s12 + $0x119] sm:$0xff] }
  0x24   : > { %v330_v7 = vpack.c.bf16 %v300_v3, %v299_v2  ;;  %v321_v40 = vmax.f32 %v285_v32, 0.0  ;;  %v322_v41 = vmax.f32 %v286_v33, 0.0  ;;  %v303_v42 = vmax.f32 %v267_v34, 0.0  ;;  %v269_v1 = vld [vmem:[%s5952_s12 + $0x80] sm:$0xff]  ;;  %v270_v2 = vld [vmem:[%s5952_s12 + $0x88] sm:$0xff]  ;;  %v1606_v32 = vld [vmem:[%s5952_s12 + $0x14] sm:$0xff] }
  0x25   : > { %v340_v26 = vpack.c.bf16 %v320_v21, %v319_v20  ;;  %v331_v27 = vpack.c.bf16 %v302_v23, %v301_v22  ;;  %v304_v43 = vmax.f32 %v268_v35, 0.0  ;;  %v397_v3 = vmax.f32 %v361_v57, 0.0  ;;  %v1607_v33 = vld [vmem:[%s5952_s12 + $0x1c] sm:$0xff] }
  0x26   : > { %5532 = vmatmul.msk.bf16.gmra.mxu0 %vm439_vm1, %v417_v52  ;;  %v354_v52 = vld [vmem:[%s5952_s12 + $0x51] sm:$0xff]  ;;  %v341_v46 = vpack.c.bf16 %v322_v41, %v321_v40  ;;  %v305_v12 = vmax.f32 %v269_v1, 0.0  ;;  %v306_v13 = vmax.f32 %v270_v2, 0.0  ;;  %v1642_v41 = vmax.f32 %v1606_v32, 0.0  ;;  %v1325_v57 = vld [vmem:[%s5952_s12 + $0x23] sm:$0xff] }
  0x27   : > { %v390_v60 = vmax.f32 %v354_v52, 0.0  ;;  %v332_v47 = vpack.c.bf16 %v304_v43, %v303_v42  ;;  %v1643_v42 = vmax.f32 %v1607_v33, 0.0  ;;  %v1361_v1 = vmax.f32 %v1325_v57, 0.0 }
  0x28   : > { %5541 = vmatmul.msk.bf16.gmra.mxu2 %vm439_vm1, %v426_v53  ;;  %5559 = vmatmul.msk.bf16.gmra.mxu3 %vm439_vm1, %v335_v54  ;;  %v355_v53 = vld [vmem:[%s5952_s12 + $0x59] sm:$0xff]  ;;  %v372_v54 = vld [vmem:[%s5952_s12 + $0xe1] sm:$0xff] }
  0x29   : > { %5550 = vmatmul.msk.bf16.gmra.mxu1 %vm439_vm1, %v326_v55  ;;  %v373_v55 = vld [vmem:[%s5952_s12 + $0xe9] sm:$0xff]  ;;  %v391_v61 = vmax.f32 %v355_v53, 0.0  ;;  %v408_v62 = vmax.f32 %v372_v54, 0.0  ;;  %v360_v54 = vld [vmem:[%s5952_s12 + $0x81] sm:$0xff] }
  0x2a   : > { %v409_v63 = vmax.f32 %v373_v55, 0.0  ;;  %v396_v0 = vmax.f32 %v360_v54, 0.0 }
  0x2b   : > { %v421_v4 = vpack.c.bf16 %v391_v61, %v390_v60  ;;  %v287_v60 = vld [vmem:[%s5952_s12 + $0x110] sm:$0xff]  ;;  %v288_v61 = vld [vmem:[%s5952_s12 + $0x118] sm:$0xff] }
  0x2c   : > { %v430_v5 = vpack.c.bf16 %v409_v63, %v408_v62  ;;  %v424_v14 = vpack.c.bf16 %v397_v3, %v396_v0 }
  0x36   : > { %5533 = vmatmul.msk.bf16.gmra.mxu0 %vm439_vm1, %v418_v8  ;;  %v356_v8 = vld [vmem:[%s5952_s12 + $0x61] sm:$0xff] }
  0x37   : > { %v392_v16 = vmax.f32 %v356_v8, 0.0  ;;  %v415_v8 = vmax.f32 %v379_v59, 0.0  ;;  %v1038_v59 = vld [vmem:[%s5952_s12 + $0x22] sm:$0xff] }
  0x38   : > { %5542 = vmatmul.msk.bf16.gmra.mxu2 %vm439_vm1, %v427_v9  ;;  %5560 = vmatmul.msk.bf16.gmra.mxu3 %vm439_vm1, %v336_v10  ;;  %v357_v9 = vld [vmem:[%s5952_s12 + $0x69] sm:$0xff]  ;;  %v374_v10 = vld [vmem:[%s5952_s12 + $0xf1] sm:$0xff]  ;;  %v1074_v3 = vmax.f32 %v1038_v59, 0.0 }
  0x39   : > { %5551 = vmatmul.msk.bf16.gmra.mxu1 %vm439_vm1, %v327_v11  ;;  %v375_v11 = vld [vmem:[%s5952_s12 + $0xf9] sm:$0xff]  ;;  %v393_v17 = vmax.f32 %v357_v9, 0.0  ;;  %v410_v18 = vmax.f32 %v374_v10, 0.0  ;;  %v323_v9 = vmax.f32 %v287_v60, 0.0  ;;  %v324_v10 = vmax.f32 %v288_v61, 0.0  ;;  %v1039_v60 = vld [vmem:[%s5952_s12 + $0x2a] sm:$0xff] }
  0x3a   : > { %v411_v19 = vmax.f32 %v375_v11, 0.0  ;;  %v1613_v59 = vld [vmem:[%s5952_s12 + $0x4c] sm:$0xff] }
  0x3b   : > { %v422_v24 = vpack.c.bf16 %v393_v17, %v392_v16  ;;  %v342_v17 = vpack.c.bf16 %v324_v10, %v323_v9 }
  0x3c   : > { %v431_v25 = vpack.c.bf16 %v411_v19, %v410_v18  ;;  %v333_v18 = vpack.c.bf16 %v306_v13, %v305_v12 }
  0x46   : > { %5534 = vmatmul.msk.bf16.gmra.mxu0 %vm439_vm1, %v419_v28  ;;  %v358_v28 = vld [vmem:[%s5952_s12 + $0x71] sm:$0xff] }
  0x47   : > { %v394_v36 = vmax.f32 %v358_v28, 0.0  ;;  %v754_v28 = vld [vmem:[%s5952_s12 + $0xa] sm:$0xff] }
  0x48   : > { %5543 = vmatmul.msk.bf16.gmra.mxu2 %vm439_vm1, %v428_v29  ;;  %5561 = vmatmul.msk.bf16.gmra.mxu3 %vm439_vm1, %v337_v30  ;;  %v359_v29 = vld [vmem:[%s5952_s12 + $0x79] sm:$0xff]  ;;  %v376_v30 = vld [vmem:[%s5952_s12 + $0x101] sm:$0xff] }
  0x49   : > { %5552 = vmatmul.msk.bf16.gmra.mxu1 %vm439_vm1, %v328_v31  ;;  %v377_v31 = vld [vmem:[%s5952_s12 + $0x109] sm:$0xff]  ;;  %v395_v37 = vmax.f32 %v359_v29, 0.0  ;;  %v412_v38 = vmax.f32 %v376_v30, 0.0  ;;  %v1036_v29 = vld [vmem:[%s5952_s12 + $0x12] sm:$0xff]  ;;  %v1037_v30 = vld [vmem:[%s5952_s12 + $0x1a] sm:$0xff] }
  0x4a   : > { %v413_v39 = vmax.f32 %v377_v31, 0.0  ;;  %v1073_v40 = vmax.f32 %v1037_v30, 0.0 }
  0x4b   : > { %v423_v44 = vpack.c.bf16 %v395_v37, %v394_v36 }
  0x4c   : > { %v432_v45 = vpack.c.bf16 %v413_v39, %v412_v38  ;;  %v790_v38 = vmax.f32 %v754_v28, 0.0  ;;  %v1072_v39 = vmax.f32 %v1036_v29, 0.0  ;;  %v1611_v28 = vld [vmem:[%s5952_s12 + $0x3c] sm:$0xff] }
  0x56   : > { %5535 = vmatmul.msk.bf16.gmra.mxu0 %vm439_vm1, %v420_v48  ;;  %v1983_v48 = vld [vmem:[%s7709_s1 + $0xc] sm:$0x3] }
  0x58   : > { %5544 = vmatmul.msk.bf16.gmra.mxu2 %vm439_vm1, %v429_v49  ;;  %5562 = vmatmul.msk.bf16.gmra.mxu3 %vm439_vm1, %v338_v50  ;;  %v1696_v49 = vld [vmem:[%s7709_s1 + $0x8] sm:$0xc]  ;;  %v2266_v50 = vld [vmem:[%s7709_s1 + $0xc] sm:$0xc] }
  0x59   : > { %5553 = vmatmul.msk.bf16.gmra.mxu1 %vm439_vm1, %v329_v51  ;;  %v2039_v51 = vsel %vm494_vm0, %v1983_v48, 0  ;;  %v1698_v52 = vunpack.c.l.b16 %v1696_v49  ;;  %v2268_v53 = vunpack.c.l.b16 %v2266_v50  ;;  %v1108_v49 = vpack.c.bf16 %v1073_v40, %v1072_v39 }
  0x5a   : > { %2048 = vmatpush.bf16.msra.mxu2 %v2039_v51  ;;  %v1678_v50 = vpack.c.bf16 %v1643_v42, %v1642_v41 }
  0x5b   : > { %v1699_v55 = vpack.c.b16 %v1698_v52, %v1698_v52  ;;  %v2269_v56 = vpack.c.b16 %v2268_v53, %v2268_v53 }
  0x5d   : > { %v1700_v62 = vrot.slane %v1699_v55, 2  ;;  %v2270_v63 = vrot.slane %v2269_v56, 2 }
  0x66   : > { %5536 = vmatmul.msk.bf16.gmra.mxu0 %vm439_vm1, %v421_v4  ;;  %v414_v4 = vmax.f32 %v378_v58, 0.0  ;;  %v1326_v58 = vld [vmem:[%s5952_s12 + $0x2b] sm:$0xff] }
  0x67   : > { %v1362_v2 = vmax.f32 %v1326_v58, 0.0  ;;  %v1612_v58 = vld [vmem:[%s5952_s12 + $0x44] sm:$0xff] }
  0x68   : > { %5545 = vmatmul.msk.bf16.gmra.mxu2 %vm439_vm1, %v430_v5  ;;  %5563 = vmatmul.msk.bf16.gmra.mxu3 %vm439_vm1, %v339_v6  ;;  %v1756_v5 = vsel %vm494_vm0, %v1700_v62, 0  ;;  %v2326_v6 = vsel %vm494_vm0, %v2270_v63, 0  ;;  %v433_v16 = vpack.c.bf16 %v415_v8, %v414_v4  ;;  %v1608_v62 = vld [vmem:[%s5952_s12 + $0x24] sm:$0xff]  ;;  %v1609_v63 = vld [vmem:[%s5952_s12 + $0x2c] sm:$0xff]  ;;  %v1075_v4 = vmax.f32 %v1039_v60, 0.0 }
  0x69   : > { %5554 = vmatmul.msk.bf16.gmra.mxu1 %vm439_vm1, %v330_v7  ;;  %v2553_v7 = vld [vmem:[%s7709_s1 + $0x10] sm:$0x3]  ;;  %2335 = vmatpush.bf16.msra.mxu3 %v2326_v6  ;;  %v1645_v6 = vmax.f32 %v1609_v63, 0.0  ;;  %v1396_v9 = vpack.c.bf16 %v1362_v2, %v1361_v1  ;;  %v1648_v2 = vmax.f32 %v1612_v58, 0.0 }
  0x6a   : > { %1765 = vmatpush.bf16.msrb.mxu1 %v1756_v5  ;;  %v2609_v11 = vsel %vm494_vm0, %v2553_v7, 0  ;;  %v1644_v5 = vmax.f32 %v1608_v62, 0.0  ;;  %v1109_v12 = vpack.c.bf16 %v1075_v4, %v1074_v3  ;;  %v1649_v3 = vmax.f32 %v1613_v59, 0.0  ;;  %v1334_v58 = vld [vmem:[%s5952_s12 + $0x6b] sm:$0xff]  ;;  %v1046_v59 = vld [vmem:[%s5952_s12 + $0x62] sm:$0xff] }
  0x6b   : > { %2618 = vmatpush.bf16.msra.mxu0 %v2609_v11 }
  0x6c   : > { %v1679_v13 = vpack.c.bf16 %v1645_v6, %v1644_v5 }
  0x76   : > { %5537 = vmatmul.msk.bf16.gmra.mxu0 %vm439_vm1, %v422_v24 }
  0x78   : > { %5546 = vmatmul.msk.bf16.gmra.mxu2 %vm439_vm1, %v431_v25  ;;  %5564 = vmatmul.msk.bf16.gmra.mxu3 %vm439_vm1, %v340_v26  ;;  %v753_v25 = vld [vmem:[%s5952_s12 + $0x2] sm:$0xff]  ;;  %v1323_v26 = vld [vmem:[%s5952_s12 + $0x13] sm:$0xff] }
  0x79   : > { %5555 = vmatmul.msk.bf16.gmra.mxu1 %vm439_vm1, %v331_v27  ;;  %v1324_v27 = vld [vmem:[%s5952_s12 + $0x1b] sm:$0xff]  ;;  %v1359_v35 = vmax.f32 %v1323_v26, 0.0  ;;  %v789_v37 = vmax.f32 %v753_v25, 0.0 }
  0x7a   : > { %v1360_v36 = vmax.f32 %v1324_v27, 0.0  ;;  %v1041_v25 = vld [vmem:[%s5952_s12 + $0x3a] sm:$0xff] }
  0x7b   : > { %v825_v48 = vpack.c.bf16 %v790_v38, %v789_v37  ;;  %v1610_v27 = vld [vmem:[%s5952_s12 + $0x34] sm:$0xff]  ;;  %v1077_v33 = vmax.f32 %v1041_v25, 0.0 }
  0x7c   : > { %v1045_v25 = vld [vmem:[%s5952_s12 + $0x5a] sm:$0xff] }
  0x86   : > { %5538 = vmatmul.msk.bf16.gmra.mxu0 %vm439_vm1, %v423_v44 }
  0x88   : > { %5547 = vmatmul.msk.bf16.gmra.mxu2 %vm439_vm1, %v432_v45  ;;  %5565 = vmatmul.msk.bf16.gmra.mxu3 %vm439_vm1, %v341_v46  ;;  %v1395_v45 = vpack.c.bf16 %v1360_v36, %v1359_v35  ;;  %v1646_v35 = vmax.f32 %v1610_v27, 0.0  ;;  %v1647_v36 = vmax.f32 %v1611_v28, 0.0  ;;  %v1614_v27 = vld [vmem:[%s5952_s12 + $0x54] sm:$0xff]  ;;  %v1615_v28 = vld [vmem:[%s5952_s12 + $0x5c] sm:$0xff] }
  0x89   : > { %5556 = vmatmul.msk.bf16.gmra.mxu1 %vm439_vm1, %v332_v47 }
  0x93   : > { %v507_v15 = vpop.f32.mrf.mxu0 }
  0x96   : > { %v663_v19 = vpop.f32.mrf.mxu1  ;;  %5539 = vmatmul.msk.bf16.gmra.mxu0 %vm439_vm1, %v424_v14 }
  0x97   : > { %v6078_v20 = vadd.f32 %v663_v19, %v507_v15 }
  0x98   : > { %5548 = vmatmul.msk.bf16.gmra.mxu2 %vm439_vm1, %v433_v16  ;;  %5566 = vmatmul.msk.bf16.gmra.mxu3 %vm439_vm1, %v342_v17 }
  0x99   : > { %5557 = vmatmul.msk.bf16.gmra.mxu1 %vm439_vm1, %v333_v18 }
  0x9b   : > { %v552_v21 = vpop.f32.mrf.mxu2  ;;  %v708_v22 = vpop.f32.mrf.mxu3 }
  0x9c   : > { %v6084_v23 = vadd.f32 %v708_v22, %v552_v21  ;;  %v509_v24 = vpop.f32.mrf.mxu0  ;;  %v1327_v21 = vld [vmem:[%s5952_s12 + $0x33] sm:$0xff]  ;;  %v1328_v22 = vld [vmem:[%s5952_s12 + $0x3b] sm:$0xff] }
  0x9d   : > { %v1363_v30 = vmax.f32 %v1327_v21, 0.0  ;;  %v1331_v21 = vld [vmem:[%s5952_s12 + $0x53] sm:$0xff] }
  0x9e   : > { %v665_v31 = vpop.f32.mrf.mxu1 }
  0x9f   : > { %v6094_v34 = vadd.f32 %v665_v31, %v509_v24  ;;  %v1040_v24 = vld [vmem:[%s5952_s12 + $0x32] sm:$0xff]  ;;  %v1364_v31 = vmax.f32 %v1328_v22, 0.0  ;;  %v1332_v22 = vld [vmem:[%s5952_s12 + $0x5b] sm:$0xff] }
  0xa0   : > { %v1076_v32 = vmax.f32 %v1040_v24, 0.0  ;;  %v1044_v24 = vld [vmem:[%s5952_s12 + $0x52] sm:$0xff] }
  0xa1   : > { %v1397_v39 = vpack.c.bf16 %v1364_v31, %v1363_v30  ;;  %v1367_v31 = vmax.f32 %v1331_v21, 0.0 }
  0xa2   : > { %v1110_v42 = vpack.c.bf16 %v1077_v33, %v1076_v32  ;;  %v1368_v32 = vmax.f32 %v1332_v22, 0.0  ;;  %v1080_v33 = vmax.f32 %v1044_v24, 0.0 }
  0xa3   : > { %v554_v43 = vpop.f32.mrf.mxu2  ;;  %v710_v44 = vpop.f32.mrf.mxu3 }
  0xa4   : > { %v6096_v46 = vadd.f32 %v710_v44, %v554_v43  ;;  %v512_v47 = vpop.f32.mrf.mxu0  ;;  %v1680_v43 = vpack.c.bf16 %v1647_v36, %v1646_v35  ;;  %v1081_v35 = vmax.f32 %v1045_v25, 0.0  ;;  %v1650_v36 = vmax.f32 %v1614_v27, 0.0 }
  0xa6   : > { %v668_v51 = vpop.f32.mrf.mxu1  ;;  %5603 = vmatmul.msk.bf16.vlgmr.msrb.gmra.mxu0 %vm439_vm1, %v1395_v45 }
  0xa7   : > { %v6098_v52 = vadd.f32 %v668_v51, %v512_v47  ;;  %v1329_v51 = vld [vmem:[%s5952_s12 + $0x43] sm:$0xff] }
  0xa8   : > { %5567 = vmatmul.msk.bf16.vlgmr.msrb.gmra.mxu2 %vm439_vm1, %v825_v48  ;;  %5585 = vmatmul.msk.bf16.vlgmr.msrb.gmra.mxu3 %vm439_vm1, %v1108_v49 }
  0xa9   : > { %5621 = vmatmul.msk.bf16.vlgmr.msrb.gmra.mxu1 %vm439_vm1, %v1678_v50 }
  0xab   : > { %v557_v53 = vpop.f32.mrf.mxu2  ;;  %v713_v54 = vpop.f32.mrf.mxu3 }
  0xac   : > { %v6104_v55 = vadd.f32 %v713_v54, %v557_v53  ;;  %v514_v56 = vpop.f32.mrf.mxu0  ;;  %v1330_v53 = vld [vmem:[%s5952_s12 + $0x4b] sm:$0xff]  ;;  %v1042_v54 = vld [vmem:[%s5952_s12 + $0x42] sm:$0xff] }
  0xad   : > { %v1366_v62 = vmax.f32 %v1330_v53, 0.0  ;;  %v1078_v63 = vmax.f32 %v1042_v54, 0.0 }
  0xae   : > { %v670_v61 = vpop.f32.mrf.mxu1 }
  0xaf   : > { %v6112_v0 = vadd.f32 %v670_v61, %v514_v56  ;;  %v1043_v56 = vld [vmem:[%s5952_s12 + $0x4a] sm:$0xff]  ;;  %v1365_v61 = vmax.f32 %v1329_v51, 0.0 }
  0xb0   : > { %v1079_v1 = vmax.f32 %v1043_v56, 0.0 }
  0xb1   : > { %v1398_v6 = vpack.c.bf16 %v1366_v62, %v1365_v61  ;;  %v1047_v61 = vld [vmem:[%s5952_s12 + $0x6a] sm:$0xff] }
  0xb3   : > { %v559_v7 = vpop.f32.mrf.mxu2  ;;  %v715_v8 = vpop.f32.mrf.mxu3 }
  0xb4   : > { %v6114_v10 = vadd.f32 %v715_v8, %v559_v7  ;;  %v517_v11 = vpop.f32.mrf.mxu0 }
  0xb6   : > { %v673_v14 = vpop.f32.mrf.mxu1  ;;  %5604 = vmatmul.msk.bf16.gmra.mxu0 %vm439_vm1, %v1396_v9  ;;  %v1111_v9 = vpack.c.bf16 %v1079_v1, %v1078_v63  ;;  %v1616_v63 = vld [vmem:[%s5952_s12 + $0x64] sm:$0xff]  ;;  %v1617_v1 = vld [vmem:[%s5952_s12 + $0x6c] sm:$0xff] }
  0xb7   : > { %v6116_v15 = vadd.f32 %v673_v14, %v517_v11  ;;  %v1681_v11 = vpack.c.bf16 %v1649_v3, %v1648_v2 }
  0xb8   : > { %5568 = vmatmul.msk.bf16.gmra.mxu2 %vm439_vm1, %v1108_v49  ;;  %5586 = vmatmul.msk.bf16.gmra.mxu3 %vm439_vm1, %v1109_v12 }
  0xb9   : > { %5622 = vmatmul.msk.bf16.gmra.mxu1 %vm439_vm1, %v1679_v13 }
  0xbb   : > { %v562_v16 = vpop.f32.mrf.mxu2  ;;  %v718_v17 = vpop.f32.mrf.mxu3 }
  0xbc   : > { %v6122_v18 = vadd.f32 %v718_v17, %v562_v16  ;;  %v519_v19 = vpop.f32.mrf.mxu0 }
  0xbe   : > { %v675_v26 = vpop.f32.mrf.mxu1 }
  0xbf   : > { %v6130_v29 = vadd.f32 %v675_v26, %v519_v19 }
  0xc3   : > { %v564_v37 = vpop.f32.mrf.mxu2  ;;  %v720_v38 = vpop.f32.mrf.mxu3 }
  0xc4   : > { %v6132_v40 = vadd.f32 %v720_v38, %v564_v37  ;;  %v522_v41 = vpop.f32.mrf.mxu0  ;;  %v1651_v37 = vmax.f32 %v1615_v28, 0.0 }
  0xc6   : > { %v678_v44 = vpop.f32.mrf.mxu1  ;;  %5605 = vmatmul.msk.bf16.gmra.mxu0 %vm439_vm1, %v1397_v39 }
  0xc7   : > { %v6134_v45 = vadd.f32 %v678_v44, %v522_v41  ;;  %v1399_v41 = vpack.c.bf16 %v1368_v32, %v1367_v31  ;;  %v1112_v44 = vpack.c.bf16 %v1081_v35, %v1080_v33  ;;  %v1335_v32 = vld [vmem:[%s5952_s12 + $0x73] sm:$0xff]  ;;  %v1336_v33 = vld [vmem:[%s5952_s12 + $0x7b] sm:$0xff] }
  0xc8   : > { %5569 = vmatmul.msk.bf16.gmra.mxu2 %vm439_vm1, %v1109_v12  ;;  %5587 = vmatmul.msk.bf16.gmra.mxu3 %vm439_vm1, %v1110_v42  ;;  %v1048_v35 = vld [vmem:[%s5952_s12 + $0x72] sm:$0xff] }
  0xc9   : > { %5623 = vmatmul.msk.bf16.gmra.mxu1 %vm439_vm1, %v1680_v43 }
  0xcb   : > { %v567_v47 = vpop.f32.mrf.mxu2  ;;  %v723_v48 = vpop.f32.mrf.mxu3 }
  0xcc   : > { %v6140_v49 = vadd.f32 %v723_v48, %v567_v47  ;;  %v524_v50 = vpop.f32.mrf.mxu0  ;;  %v1682_v47 = vpack.c.bf16 %v1651_v37, %v1650_v36  ;;  %v1049_v36 = vld [vmem:[%s5952_s12 + $0x7a] sm:$0xff] }
  0xce   : > { %v680_v57 = vpop.f32.mrf.mxu1 }
  0xcf   : > { %v6148_v60 = vadd.f32 %v680_v57, %v524_v50  ;;  %v1333_v57 = vld [vmem:[%s5952_s12 + $0x63] sm:$0xff] }
  0xd0   : > { %v1369_v3 = vmax.f32 %v1333_v57, 0.0 }
  0xd3   : > { %v569_v4 = vpop.f32.mrf.mxu2  ;;  %v725_v5 = vpop.f32.mrf.mxu3 }
  0xd4   : > { %v6150_v7 = vadd.f32 %v725_v5, %v569_v4  ;;  %v527_v8 = vpop.f32.mrf.mxu0  ;;  %v1370_v4 = vmax.f32 %v1334_v58, 0.0  ;;  %v1082_v5 = vmax.f32 %v1046_v59, 0.0 }
  0xd6   : > { %v683_v12 = vpop.f32.mrf.mxu1  ;;  %5606 = vmatmul.msk.bf16.gmra.mxu0 %vm439_vm1, %v1398_v6  ;;  %v1083_v6 = vmax.f32 %v1047_v61, 0.0 }
  0xd7   : > { %v6152_v13 = vadd.f32 %v683_v12, %v527_v8  ;;  %v1652_v8 = vmax.f32 %v1616_v63, 0.0 }
  0xd8   : > { %5570 = vmatmul.msk.bf16.gmra.mxu2 %vm439_vm1, %v1110_v42  ;;  %5588 = vmatmul.msk.bf16.gmra.mxu3 %vm439_vm1, %v1111_v9  ;;  %v1113_v21 = vpack.c.bf16 %v1083_v6, %v1082_v5 }
  0xd9   : > { %5624 = vmatmul.msk.bf16.gmra.mxu1 %vm439_vm1, %v1681_v11 }
  0xdb   : > { %v572_v14 = vpop.f32.mrf.mxu2  ;;  %v728_v16 = vpop.f32.mrf.mxu3 }
  0xdc   : > { %v6158_v17 = vadd.f32 %v728_v16, %v572_v14  ;;  %v529_v19 = vpop.f32.mrf.mxu0  ;;  %v1400_v14 = vpack.c.bf16 %v1370_v4, %v1369_v3 }
  0xde   : > { %v685_v26 = vpop.f32.mrf.mxu1 }
  0xdf   : > { %v6166_v30 = vadd.f32 %v685_v26, %v529_v19 }
  0xe3   : > { %v574_v38 = vpop.f32.mrf.mxu2  ;;  %v730_v39 = vpop.f32.mrf.mxu3 }
  0xe4   : > { %v6168_v42 = vadd.f32 %v730_v39, %v574_v38  ;;  %v532_v43 = vpop.f32.mrf.mxu0  ;;  %v1618_v38 = vld [vmem:[%s5952_s12 + $0x74] sm:$0xff]  ;;  %v1619_v39 = vld [vmem:[%s5952_s12 + $0x7c] sm:$0xff] }
  0xe6   : > { %v688_v48 = vpop.f32.mrf.mxu1  ;;  %5607 = vmatmul.msk.bf16.gmra.mxu0 %vm439_vm1, %v1399_v41 }
  0xe7   : > { %v6170_v50 = vadd.f32 %v688_v48, %v532_v43  ;;  %v1371_v43 = vmax.f32 %v1335_v32, 0.0  ;;  %v1085_v48 = vmax.f32 %v1049_v36, 0.0 }
  0xe8   : > { %5571 = vmatmul.msk.bf16.gmra.mxu2 %vm439_vm1, %v1111_v9  ;;  %5589 = vmatmul.msk.bf16.gmra.mxu3 %vm439_vm1, %v1112_v44  ;;  %v1653_v9 = vmax.f32 %v1617_v1, 0.0 }
  0xe9   : > { %5625 = vmatmul.msk.bf16.gmra.mxu1 %vm439_vm1, %v1682_v47  ;;  %v1084_v47 = vmax.f32 %v1048_v35, 0.0 }
  0xea   : > { %v1683_v22 = vpack.c.bf16 %v1653_v9, %v1652_v8  ;;  %v1337_v9 = vld [vmem:[%s5952_s12 + $0x83] sm:$0xff] }
  0xeb   : > { %v577_v51 = vpop.f32.mrf.mxu2  ;;  %v733_v53 = vpop.f32.mrf.mxu3 }
  0xec   : > { %v6176_v54 = vadd.f32 %v733_v53, %v577_v51  ;;  %v534_v56 = vpop.f32.mrf.mxu0  ;;  %v1654_v51 = vmax.f32 %v1618_v38, 0.0  ;;  %v1655_v53 = vmax.f32 %v1619_v39, 0.0 }
  0xee   : > { %v690_v62 = vpop.f32.mrf.mxu1  ;;  %v1684_v63 = vpack.c.bf16 %v1655_v53, %v1654_v51  ;;  %v3263_v53 = vld [vmem:[%s7711_s3] sm:$0xc] }
  0xef   : > { %v6184_v2 = vadd.f32 %v690_v62, %v534_v56  ;;  %v1114_v62 = vpack.c.bf16 %v1085_v48, %v1084_v47 }
  0xf3   : > { %v579_v11 = vpop.f32.mrf.mxu2  ;;  %v735_v12 = vpop.f32.mrf.mxu3 }
  0xf4   : > { %v6186_v16 = vadd.f32 %v735_v12, %v579_v11  ;;  %v537_v19 = vpop.f32.mrf.mxu0  ;;  %v1338_v11 = vld [vmem:[%s5952_s12 + $0x8b] sm:$0xff]  ;;  %v1050_v12 = vld [vmem:[%s5952_s12 + $0x82] sm:$0xff] }
  0xf6   : > { %v693_v24 = vpop.f32.mrf.mxu1  ;;  %5608 = vmatmul.msk.bf16.gmra.mxu0 %vm439_vm1, %v1400_v14  ;;  %v1051_v14 = vld [vmem:[%s5952_s12 + $0x8a] sm:$0xff] }
  0xf7   : > { %v6188_v25 = vadd.f32 %v693_v24, %v537_v19  ;;  %v1621_v24 = vld [vmem:[%s5952_s12 + $0x8c] sm:$0xff]  ;;  %v1087_v32 = vmax.f32 %v1051_v14, 0.0 }
  0xf8   : > { %5572 = vmatmul.msk.bf16.gmra.mxu2 %vm439_vm1, %v1112_v44  ;;  %5590 = vmatmul.msk.bf16.gmra.mxu3 %vm439_vm1, %v1113_v21  ;;  %v1372_v44 = vmax.f32 %v1336_v33, 0.0  ;;  %v1657_v35 = vmax.f32 %v1621_v24, 0.0 }
  0xf9   : > { %5626 = vmatmul.msk.bf16.gmra.mxu1 %vm439_vm1, %v1683_v22  ;;  %v1620_v22 = vld [vmem:[%s5952_s12 + $0x84] sm:$0xff] }
  0xfa   : > { %v1401_v58 = vpack.c.bf16 %v1372_v44, %v1371_v43  ;;  %v1656_v33 = vmax.f32 %v1620_v22, 0.0 }
  0xfb   : > { %v582_v26 = vpop.f32.mrf.mxu2  ;;  %v738_v27 = vpop.f32.mrf.mxu3 }
  0xfc   : > { %v6194_v28 = vadd.f32 %v738_v27, %v582_v26  ;;  %v539_v31 = vpop.f32.mrf.mxu0  ;;  %v1373_v27 = vmax.f32 %v1337_v9, 0.0  ;;  %v1685_v47 = vpack.c.bf16 %v1657_v35, %v1656_v33 }
  0xfe   : > { %v695_v37 = vpop.f32.mrf.mxu1 }
  0xff   : > { %v6202_v41 = vadd.f32 %v695_v37, %v539_v31  ;;  %v1086_v31 = vmax.f32 %v1050_v12, 0.0  ;;  %v1623_v12 = vld [vmem:[%s5952_s12 + $0x9c] sm:$0xff] }
 0x101   : > { %v1115_v44 = vpack.c.bf16 %v1087_v32, %v1086_v31  ;;  %v1659_v32 = vmax.f32 %v1623_v12, 0.0  ;;  %v1625_v12 = vld [vmem:[%s5952_s12 + $0xac] sm:$0xff] }
 0x103   : > { %v584_v56 = vpop.f32.mrf.mxu2  ;;  %v740_v57 = vpop.f32.mrf.mxu3 }
 0x104   : > { %v6204_v59 = vadd.f32 %v740_v57, %v584_v56  ;;  %v542_v61 = vpop.f32.mrf.mxu0 }
 0x106   : > { %v698_v1 = vpop.f32.mrf.mxu1  ;;  %5609 = vmatmul.msk.bf16.gmra.mxu0 %vm439_vm1, %v1401_v58  ;;  %v3265_v58 = vunpack.c.l.b16 %v3263_v53 }
 0x107   : > { %v6206_v3 = vadd.f32 %v698_v1, %v542_v61  ;;  %v1339_v1 = vld [vmem:[%s5952_s12 + $0x93] sm:$0xff] }
 0x108   : > { %5573 = vmatmul.msk.bf16.gmra.mxu2 %vm439_vm1, %v1113_v21  ;;  %5591 = vmatmul.msk.bf16.gmra.mxu3 %vm439_vm1, %v1114_v62  ;;  %v1374_v21 = vmax.f32 %v1338_v11, 0.0  ;;  %v1622_v11 = vld [vmem:[%s5952_s12 + $0x94] sm:$0xff] }
 0x109   : > { %5627 = vmatmul.msk.bf16.gmra.mxu1 %vm439_vm1, %v1684_v63  ;;  %v1658_v31 = vmax.f32 %v1622_v11, 0.0  ;;  %v1624_v11 = vld [vmem:[%s5952_s12 + $0xa4] sm:$0xff] }
 0x10a   : > { %v1402_v38 = vpack.c.bf16 %v1374_v21, %v1373_v27 }
 0x10b   : > { %v587_v4 = vpop.f32.mrf.mxu2  ;;  %v743_v5 = vpop.f32.mrf.mxu3 }
 0x10c   : > { %v6212_v6 = vadd.f32 %v743_v5, %v587_v4  ;;  %v544_v8 = vpop.f32.mrf.mxu0  ;;  %v1340_v4 = vld [vmem:[%s5952_s12 + $0x9b] sm:$0xff]  ;;  %v1052_v5 = vld [vmem:[%s5952_s12 + $0x92] sm:$0xff] }
 0x10d   : > { %v1376_v22 = vmax.f32 %v1340_v4, 0.0  ;;  %v1088_v27 = vmax.f32 %v1052_v5, 0.0  ;;  %v1342_v4 = vld [vmem:[%s5952_s12 + $0xab] sm:$0xff]  ;;  %v1054_v5 = vld [vmem:[%s5952_s12 + $0xa2] sm:$0xff] }
 0x10e   : > { %v700_v19 = vpop.f32.mrf.mxu1 }
 0x10f   : > { %v6220_v26 = vadd.f32 %v700_v19, %v544_v8  ;;  %v1053_v8 = vld [vmem:[%s5952_s12 + $0x9a] sm:$0xff]  ;;  %v1375_v19 = vmax.f32 %v1339_v1, 0.0  ;;  %v1341_v1 = vld [vmem:[%s5952_s12 + $0xa3] sm:$0xff] }
 0x110   : > { %v1089_v21 = vmax.f32 %v1053_v8, 0.0  ;;  %v1055_v8 = vld [vmem:[%s5952_s12 + $0xaa] sm:$0xff] }
 0x113   : > { %v589_v36 = vpop.f32.mrf.mxu2  ;;  %v745_v37 = vpop.f32.mrf.mxu3 }
 0x114   : > { %v6222_v39 = vadd.f32 %v745_v37, %v589_v36  ;;  %v547_v43 = vpop.f32.mrf.mxu0  ;;  %v1403_v37 = vpack.c.bf16 %v1376_v22, %v1375_v19  ;;  %v1377_v19 = vmax.f32 %v1341_v1, 0.0  ;;  %v1378_v22 = vmax.f32 %v1342_v4, 0.0 }
 0x116   : > { %v703_v48 = vpop.f32.mrf.mxu1  ;;  %5610 = vmatmul.msk.bf16.gmra.mxu0 %vm439_vm1, %v1402_v38 }
 0x117   : > { %v6224_v51 = vadd.f32 %v703_v48, %v547_v43  ;;  %v1686_v48 = vpack.c.bf16 %v1659_v32, %v1658_v31  ;;  %v1661_v31 = vmax.f32 %v1625_v12, 0.0  ;;  %v1057_v12 = vld [vmem:[%s5952_s12 + $0xba] sm:$0xff] }
 0x118   : > { %5574 = vmatmul.msk.bf16.gmra.mxu2 %vm439_vm1, %v1114_v62  ;;  %5592 = vmatmul.msk.bf16.gmra.mxu3 %vm439_vm1, %v1115_v44  ;;  %v3266_v62 = vpack.c.b16 %v3265_v58, %v3265_v58 }
 0x119   : > { %5628 = vmatmul.msk.bf16.gmra.mxu1 %vm439_vm1, %v1685_v47  ;;  %v1116_v47 = vpack.c.bf16 %v1089_v21, %v1088_v27  ;;  %v1091_v27 = vmax.f32 %v1055_v8, 0.0  ;;  %v1660_v21 = vmax.f32 %v1624_v11, 0.0  ;;  %v1343_v8 = vld [vmem:[%s5952_s12 + $0xb3] sm:$0xff] }
 0x11a   : > { %v3267_v24 = vrot.slane %v3266_v62, 2  ;;  %v1056_v11 = vld [vmem:[%s5952_s12 + $0xb2] sm:$0xff] }
 0x11b   : > { %v592_v56 = vpop.f32.mrf.mxu2  ;;  %v748_v57 = vpop.f32.mrf.mxu3 }
 0x11c   : > { %v6233_v61 = vadd.f32 %v748_v57, %v592_v56  ;;  %v549_v63 = vpop.f32.mrf.mxu0  ;;  %v3323_v33 = vsel %vm494_vm0, %v3267_v24, 0  ;;  %v1090_v24 = vmax.f32 %v1054_v5, 0.0 }
 0x11d   : > { %3332 = vmatpush.bf16.msra.mxu1 %v3323_v33 }
 0x11e   : > { %v705_v9 = vpop.f32.mrf.mxu1 }
 0x11f   : > { %v6241_v14 = vadd.f32 %v705_v9, %v549_v63 }
 0x123   : > { %v594_v35 = vpop.f32.mrf.mxu2  ;;  %v750_v36 = vpop.f32.mrf.mxu3 }
 0x124   : > { %v6244_v38 = vadd.f32 %v750_v36, %v594_v35  ;;  %v1480_v43 = vpop.f32.mrf.mxu0  ;;  %v1404_v35 = vpack.c.bf16 %v1378_v22, %v1377_v19 }
 0x126   : > { %v1767_v53 = vpop.f32.mrf.mxu1  ;;  %5611 = vmatmul.msk.bf16.gmra.mxu0 %vm439_vm1, %v1403_v37 }
 0x128   : > { %5575 = vmatmul.msk.bf16.gmra.mxu2 %vm439_vm1, %v1115_v44  ;;  %5593 = vmatmul.msk.bf16.gmra.mxu3 %vm439_vm1, %v1116_v47 }
 0x129   : > { %5629 = vmatmul.msk.bf16.gmra.mxu1 %vm439_vm1, %v1686_v48  ;;  %v1117_v48 = vpack.c.bf16 %v1091_v27, %v1090_v24  ;;  %v1379_v24 = vmax.f32 %v1343_v8, 0.0 }
 0x12b   : > { %v910_v56 = vpop.f32.mrf.mxu2  ;;  %v1197_v57 = vpop.f32.mrf.mxu3 }
 0x12c   : > { %v1000_v58 = vadd.f32 %v910_v56, %v6078_v20  ;;  %v1482_v63 = vpop.f32.mrf.mxu0  ;;  %v1687_v56 = vpack.c.bf16 %v1661_v31, %v1660_v21  ;;  %v1092_v21 = vmax.f32 %v1056_v11, 0.0  ;;  %v1093_v31 = vmax.f32 %v1057_v12, 0.0  ;;  %v1345_v12 = vld [vmem:[%s5952_s12 + $0xc3] sm:$0xff] }
 0x12e   : > { %v1287_v62 = vadd.f32 %v1197_v57, %v1000_v58  ;;  %v1769_v9 = vpop.f32.mrf.mxu1 }
 0x130   : > { %v1570_v44 = vadd.f32 %v1480_v43, %v1287_v62  ;;  %v1344_v62 = vld [vmem:[%s5952_s12 + $0xbb] sm:$0xff] }
 0x131   : > { %v1380_v27 = vmax.f32 %v1344_v62, 0.0 }
 0x132   : > { %v6257_v32 = vadd.f32 %v1767_v53, %v1570_v44  ;;  %v1627_v44 = vld [vmem:[%s5952_s12 + $0xbc] sm:$0xff] }
 0x133   : > { %v912_v33 = vpop.f32.mrf.mxu2  ;;  %v1199_v20 = vpop.f32.mrf.mxu3 }
 0x134   : > { %v1001_v36 = vadd.f32 %v912_v33, %v6094_v34  ;;  %v1485_v37 = vpop.f32.mrf.mxu0  ;;  %v1663_v33 = vmax.f32 %v1627_v44, 0.0  ;;  %v1059_v44 = vld [vmem:[%s5952_s12 + $0xca] sm:$0xff] }
 0x136   : > { %v1288_v57 = vadd.f32 %v1199_v20, %v1001_v36  ;;  %v1772_v43 = vpop.f32.mrf.mxu1  ;;  %5612 = vmatmul.msk.bf16.gmra.mxu0 %vm439_vm1, %v1404_v35  ;;  %v1405_v36 = vpack.c.bf16 %v1380_v27, %v1379_v24 }
 0x138   : > { %5576 = vmatmul.msk.bf16.gmra.mxu2 %vm439_vm1, %v1116_v47  ;;  %5594 = vmatmul.msk.bf16.gmra.mxu3 %vm439_vm1, %v1117_v48  ;;  %v1571_v53 = vadd.f32 %v1482_v63, %v1288_v57  ;;  %v1626_v47 = vld [vmem:[%s5952_s12 + $0xb4] sm:$0xff] }
 0x139   : > { %5630 = vmatmul.msk.bf16.gmra.mxu1 %vm439_vm1, %v1687_v56 }
 0x13a   : > { %v6264_v34 = vadd.f32 %v1769_v9, %v1571_v53  ;;  %v1662_v9 = vmax.f32 %v1626_v47, 0.0  ;;  %v1118_v53 = vpack.c.bf16 %v1093_v31, %v1092_v21  ;;  %v1058_v47 = vld [vmem:[%s5952_s12 + $0xc2] sm:$0xff]  ;;  %v1381_v21 = vmax.f32 %v1345_v12, 0.0 }
 0x13b   : > { %v915_v58 = vpop.f32.mrf.mxu2  ;;  %v1202_v1 = vpop.f32.mrf.mxu3 }
 0x13c   : > { %v1002_v4 = vadd.f32 %v915_v58, %v6098_v52  ;;  %v1487_v5 = vpop.f32.mrf.mxu0  ;;  %v1688_v58 = vpack.c.bf16 %v1663_v33, %v1662_v9  ;;  %v1094_v9 = vmax.f32 %v1058_v47, 0.0  ;;  %v1095_v33 = vmax.f32 %v1059_v44, 0.0  ;;  %v1347_v44 = vld [vmem:[%s5952_s12 + $0xd3] sm:$0xff] }
 0x13e   : > { %v1289_v19 = vadd.f32 %v1202_v1, %v1002_v4  ;;  %v1774_v22 = vpop.f32.mrf.mxu1 }
 0x140   : > { %v1572_v63 = vadd.f32 %v1485_v37, %v1289_v19  ;;  %v1346_v19 = vld [vmem:[%s5952_s12 + $0xcb] sm:$0xff] }
 0x141   : > { %v1382_v31 = vmax.f32 %v1346_v19, 0.0 }
 0x142   : > { %v6273_v20 = vadd.f32 %v1772_v43, %v1572_v63  ;;  %v1629_v63 = vld [vmem:[%s5952_s12 + $0xcc] sm:$0xff] }
 0x143   : > { %v917_v35 = vpop.f32.mrf.mxu2  ;;  %v1204_v52 = vpop.f32.mrf.mxu3 }
 0x144   : > { %v1003_v56 = vadd.f32 %v917_v35, %v6112_v0  ;;  %v1490_v57 = vpop.f32.mrf.mxu0  ;;  %v1665_v35 = vmax.f32 %v1629_v63, 0.0  ;;  %v1061_v63 = vld [vmem:[%s5952_s12 + $0xda] sm:$0xff] }
 0x146   : > { %v1290_v1 = vadd.f32 %v1204_v52, %v1003_v56  ;;  %v1777_v37 = vpop.f32.mrf.mxu1  ;;  %5613 = vmatmul.msk.bf16.gmra.mxu0 %vm439_vm1, %v1405_v36  ;;  %v1406_v56 = vpack.c.bf16 %v1382_v31, %v1381_v21 }
 0x148   : > { %5577 = vmatmul.msk.bf16.gmra.mxu2 %vm439_vm1, %v1117_v48  ;;  %5595 = vmatmul.msk.bf16.gmra.mxu3 %vm439_vm1, %v1118_v53  ;;  %v1573_v43 = vadd.f32 %v1487_v5, %v1290_v1  ;;  %v1628_v48 = vld [vmem:[%s5952_s12 + $0xc4] sm:$0xff] }
 0x149   : > { %5631 = vmatmul.msk.bf16.gmra.mxu1 %vm439_vm1, %v1688_v58 }
 0x14a   : > { %v6280_v0 = vadd.f32 %v1774_v22, %v1573_v43  ;;  %v1664_v22 = vmax.f32 %v1628_v48, 0.0  ;;  %v1119_v43 = vpack.c.bf16 %v1095_v33, %v1094_v9  ;;  %v1060_v48 = vld [vmem:[%s5952_s12 + $0xd2] sm:$0xff]  ;;  %v1383_v9 = vmax.f32 %v1347_v44, 0.0  ;;  %v2822_v44 = vld [vmem:[%s7713_s5] sm:$0xff] }
 0x14b   : > { %v920_v4 = vpop.f32.mrf.mxu2  ;;  %v1207_v8 = vpop.f32.mrf.mxu3 }
 0x14c   : > { %v1004_v62 = vadd.f32 %v920_v4, %v6116_v15  ;;  %v1492_v11 = vpop.f32.mrf.mxu0  ;;  %v1689_v4 = vpack.c.bf16 %v1665_v35, %v1664_v22  ;;  %v1096_v22 = vmax.f32 %v1060_v48, 0.0  ;;  %v1097_v35 = vmax.f32 %v1061_v63, 0.0  ;;  %v1349_v63 = vld [vmem:[%s5952_s12 + $0xe3] sm:$0xff] }
 0x14e   : > { %v1291_v24 = vadd.f32 %v1207_v8, %v1004_v62  ;;  %v1779_v27 = vpop.f32.mrf.mxu1 }
 0x150   : > { %v1574_v5 = vadd.f32 %v1490_v57, %v1291_v24  ;;  %v1348_v24 = vld [vmem:[%s5952_s12 + $0xdb] sm:$0xff] }
 0x151   : > { %v1384_v33 = vmax.f32 %v1348_v24, 0.0 }
 0x152   : > { %v6289_v52 = vadd.f32 %v1777_v37, %v1574_v5  ;;  %v1631_v5 = vld [vmem:[%s5952_s12 + $0xdc] sm:$0xff] }
 0x153   : > { %v922_v36 = vpop.f32.mrf.mxu2  ;;  %v1209_v15 = vpop.f32.mrf.mxu3 }
 0x154   : > { %v1005_v58 = vadd.f32 %v922_v36, %v6130_v29  ;;  %v1495_v1 = vpop.f32.mrf.mxu0  ;;  %v1667_v36 = vmax.f32 %v1631_v5, 0.0 }
 0x156   : > { %v1292_v8 = vadd.f32 %v1209_v15, %v1005_v58  ;;  %v1782_v57 = vpop.f32.mrf.mxu1  ;;  %5614 = vmatmul.msk.bf16.gmra.mxu0 %vm439_vm1, %v1406_v56  ;;  %v1407_v58 = vpack.c.bf16 %v1384_v33, %v1383_v9  ;;  %v1632_v33 = vld [vmem:[%s5952_s12 + $0xe4] sm:$0xff] }
 0x158   : > { %5578 = vmatmul.msk.bf16.gmra.mxu2 %vm439_vm1, %v1118_v53  ;;  %5596 = vmatmul.msk.bf16.gmra.mxu3 %vm439_vm1, %v1119_v43  ;;  %v1575_v37 = vadd.f32 %v1492_v11, %v1292_v8  ;;  %v1630_v53 = vld [vmem:[%s5952_s12 + $0xd4] sm:$0xff] }
 0x159   : > { %5632 = vmatmul.msk.bf16.gmra.mxu1 %vm439_vm1, %v1689_v4 }
 0x15a   : > { %v6296_v29 = vadd.f32 %v1779_v27, %v1575_v37  ;;  %v1666_v27 = vmax.f32 %v1630_v53, 0.0  ;;  %v1120_v37 = vpack.c.bf16 %v1097_v35, %v1096_v22  ;;  %v1063_v53 = vld [vmem:[%s5952_s12 + $0xea] sm:$0xff]  ;;  %v1385_v22 = vmax.f32 %v1349_v63, 0.0 }
 0x15b   : > { %v925_v62 = vpop.f32.mrf.mxu2  ;;  %v1212_v12 = vpop.f32.mrf.mxu3  ;;  %v2824_v63 = vld [vmem:[%s7713_s5 + $0x10] sm:$0xff] }
 0x15c   : > { %v1006_v19 = vadd.f32 %v925_v62, %v6134_v45  ;;  %v1497_v47 = vpop.f32.mrf.mxu0  ;;  %v1690_v62 = vpack.c.bf16 %v1667_v36, %v1666_v27 }
 0x15e   : > { %v1293_v21 = vadd.f32 %v1212_v12, %v1006_v19  ;;  %v1784_v31 = vpop.f32.mrf.mxu1 }
 0x160   : > { %v1576_v11 = vadd.f32 %v1495_v1, %v1293_v21  ;;  %v1350_v21 = vld [vmem:[%s5952_s12 + $0xeb] sm:$0xff] }
 0x161   : > { %v1386_v35 = vmax.f32 %v1350_v21, 0.0  ;;  %v2828_v21 = vld [vmem:[%s7713_s5 + $0x30] sm:$0xff] }
 0x162   : > { %v6305_v15 = vadd.f32 %v1782_v57, %v1576_v11  ;;  %v1633_v11 = vld [vmem:[%s5952_s12 + $0xec] sm:$0xff] }
 0x163   : > { %v927_v56 = vpop.f32.mrf.mxu2  ;;  %v1214_v45 = vpop.f32.mrf.mxu3 }
 0x164   : > { %v1007_v4 = vadd.f32 %v927_v56, %v6148_v60  ;;  %v1500_v8 = vpop.f32.mrf.mxu0  ;;  %v5885_v60 = vmov 0   ;;  %v1099_v56 = vmax.f32 %v1063_v53, 0.0 }
 0x165   : > { %5871 = vset.pattern.permute.xlu0 %v5885_v60  ;;  %5872 = vset.pattern.permute.xlu1 %v5885_v60 }
 0x166   : > { %v1294_v12 = vadd.f32 %v1214_v45, %v1007_v4  ;;  %v1787_v19 = vpop.f32.mrf.mxu1  ;;  %5615 = vmatmul.msk.bf16.gmra.mxu0 %vm439_vm1, %v1407_v58  ;;  %2860 = vperm.xlu0 %5871, %v2822_v44   ;;  %v1668_v45 = vmax.f32 %v1632_v33, 0.0  ;;  %v1669_v58 = vmax.f32 %v1633_v11, 0.0  ;;  %v1352_v33 = vld [vmem:[%s5952_s12 + $0xfb] sm:$0xff] }
 0x167   : > { %5873 = vset.pattern.permute.xlu2 %v5885_v60  ;;  %2870 = vperm.xlu1 %5872, %v2824_v63   ;;  %v1065_v11 = vld [vmem:[%s5952_s12 + $0xfa] sm:$0xff] }
 0x168   : > { %5579 = vmatmul.msk.bf16.gmra.mxu2 %vm439_vm1, %v1119_v43  ;;  %5597 = vmatmul.msk.bf16.gmra.mxu3 %vm439_vm1, %v1120_v37  ;;  %v1577_v1 = vadd.f32 %v1497_v47, %v1294_v12 }
 0x169   : > { %5633 = vmatmul.msk.bf16.gmra.mxu1 %vm439_vm1, %v1690_v62 }
 0x16a   : > { %v6312_v57 = vadd.f32 %v1784_v31, %v1577_v1  ;;  %v1062_v31 = vld [vmem:[%s5952_s12 + $0xe2] sm:$0xff]  ;;  %v1408_v1 = vpack.c.bf16 %v1386_v35, %v1385_v22 }
 0x16b   : > { %v930_v43 = vpop.f32.mrf.mxu2  ;;  %v1217_v24 = vpop.f32.mrf.mxu3  ;;  %v1098_v36 = vmax.f32 %v1062_v31, 0.0 }
 0x16c   : > { %v1008_v47 = vadd.f32 %v930_v43, %v6152_v13  ;;  %v1502_v48 = vpop.f32.mrf.mxu0  ;;  %v2823_v13 = vld [vmem:[%s7713_s5 + $0x8] sm:$0xff] }
 0x16d   : > { %v1121_v43 = vpack.c.bf16 %v1099_v56, %v1098_v36  ;;  %v1635_v36 = vld [vmem:[%s5952_s12 + $0xfc] sm:$0xff] }
 0x16e   : > { %v1295_v5 = vadd.f32 %v1217_v24, %v1008_v47  ;;  %v1789_v9 = vpop.f32.mrf.mxu1  ;;  %2865 = vperm.xlu0 %5871, %v2823_v13   ;;  %v1691_v24 = vpack.c.bf16 %v1669_v58, %v1668_v45  ;;  %v1388_v45 = vmax.f32 %v1352_v33, 0.0  ;;  %v2829_v33 = vld [vmem:[%s7713_s5 + $0x38] sm:$0xff] }
 0x170   : > { %v1578_v27 = vadd.f32 %v1500_v8, %v1295_v5  ;;  %v1351_v5 = vld [vmem:[%s5952_s12 + $0xf3] sm:$0xff] }
 0x171   : > { %v1387_v56 = vmax.f32 %v1351_v5, 0.0 }
 0x172   : > { %v6324_v4 = vadd.f32 %v1787_v19, %v1578_v27  ;;  %v1634_v27 = vld [vmem:[%s5952_s12 + $0xf4] sm:$0xff] }
 0x173   : > { %v932_v62 = vpop.f32.mrf.mxu2  ;;  %v1219_v12 = vpop.f32.mrf.mxu3  ;;  %v1409_v63 = vpack.c.bf16 %v1388_v45, %v1387_v56  ;;  %v1067_v56 = vld [vmem:[%s5952_s12 + $0x10a] sm:$0xff] }
 0x174   : > { %v1009_v60 = vadd.f32 %v932_v62, %v6166_v30  ;;  %v1505_v44 = vpop.f32.mrf.mxu0  ;;  %v1101_v62 = vmax.f32 %v1065_v11, 0.0 }
 0x176   : > { %v1296_v8 = vadd.f32 %v1219_v12, %v1009_v60  ;;  %v1792_v47 = vpop.f32.mrf.mxu1  ;;  %5616 = vmatmul.msk.bf16.gmra.mxu0 %vm439_vm1, %v1408_v1  ;;  %2890 = vperm.xlu0 %5871, %v2828_v21   ;;  %v1670_v12 = vmax.f32 %v1634_v27, 0.0  ;;  %v1671_v1 = vmax.f32 %v1635_v36, 0.0  ;;  %v1353_v27 = vld [vmem:[%s5952_s12 + $0x103] sm:$0xff]  ;;  %v1354_v36 = vld [vmem:[%s5952_s12 + $0x10b] sm:$0xff] }
 0x178   : > { %5580 = vmatmul.msk.bf16.gmra.mxu2 %vm439_vm1, %v1120_v37  ;;  %5598 = vmatmul.msk.bf16.gmra.mxu3 %vm439_vm1, %v1121_v43  ;;  %v1579_v19 = vadd.f32 %v1502_v48, %v1296_v8 }
 0x179   : > { %5634 = vmatmul.msk.bf16.gmra.mxu1 %vm439_vm1, %v1691_v24  ;;  %v2831_v24 = vld [vmem:[%s7713_s5 + $0x48] sm:$0xff] }
 0x17a   : > { %v6334_v30 = vadd.f32 %v1789_v9, %v1579_v19  ;;  %v1064_v9 = vld [vmem:[%s5952_s12 + $0xf2] sm:$0xff] }
 0x17b   : > { %v935_v31 = vpop.f32.mrf.mxu2  ;;  %v1222_v37 = vpop.f32.mrf.mxu3  ;;  %v1100_v13 = vmax.f32 %v1064_v9, 0.0  ;;  %v2834_v9 = vld [vmem:[%s7713_s5 + $0x60] sm:$0xff] }
 0x17c   : > { %v1010_v48 = vadd.f32 %v935_v31, %v6170_v50  ;;  %v1507_v53 = vpop.f32.mrf.mxu0  ;;  %v2825_v50 = vld [vmem:[%s7713_s5 + $0x18] sm:$0xff] }
 0x17d   : > { %2875 = vperm.xlu1 %5872, %v2825_v50   ;;  %v1122_v31 = vpack.c.bf16 %v1101_v62, %v1100_v13  ;;  %v1636_v13 = vld [vmem:[%s5952_s12 + $0x104] sm:$0xff]  ;;  %v1637_v62 = vld [vmem:[%s5952_s12 + $0x10c] sm:$0xff] }
 0x17e   : > { %v1297_v22 = vadd.f32 %v1222_v37, %v1010_v48  ;;  %v1794_v35 = vpop.f32.mrf.mxu1  ;;  %2905 = vperm.xlu0 %5871, %v2831_v24   ;;  %v1692_v37 = vpack.c.bf16 %v1671_v1, %v1670_v12  ;;  %v1389_v12 = vmax.f32 %v1353_v27, 0.0  ;;  %v1390_v1 = vmax.f32 %v1354_v36, 0.0  ;;  %v2840_v36 = vld [vmem:[%s7713_s5 + $0x90] sm:$0xff] }
 0x180   : > { %v1580_v58 = vadd.f32 %v1505_v44, %v1297_v22 }
 0x182   : > { %v6349_v60 = vadd.f32 %v1792_v47, %v1580_v58 }
 0x183   : > { %v937_v8 = vpop.f32.mrf.mxu2  ;;  %v1224_v19 = vpop.f32.mrf.mxu3 }
 0x184   : > { %v1011_v44 = vadd.f32 %v937_v8, %v6184_v2  ;;  %v1510_v21 = vpop.f32.mrf.mxu0  ;;  %v1103_v8 = vmax.f32 %v1067_v56, 0.0 }
 0x185   : > { %2895 = vperm.xlu1 %5872, %v2829_v33   ;;  %v1410_v33 = vpack.c.bf16 %v1390_v1, %v1389_v12  ;;  %v1069_v12 = vld [vmem:[%s5952_s12 + $0x11a] sm:$0xff] }
 0x186   : > { %v1298_v47 = vadd.f32 %v1224_v19, %v1011_v44  ;;  %v1797_v48 = vpop.f32.mrf.mxu1  ;;  %5617 = vmatmul.msk.bf16.gmra.mxu0 %vm439_vm1, %v1409_v63  ;;  %2920 = vperm.xlu0 %5871, %v2834_v9   ;;  %v1672_v19 = vmax.f32 %v1636_v13, 0.0  ;;  %v1673_v63 = vmax.f32 %v1637_v62, 0.0  ;;  %v1356_v13 = vld [vmem:[%s5952_s12 + $0x11b] sm:$0xff]  ;;  %v1068_v62 = vld [vmem:[%s5952_s12 + $0x112] sm:$0xff] }
 0x188   : > { %5581 = vmatmul.msk.bf16.gmra.mxu2 %vm439_vm1, %v1121_v43  ;;  %5599 = vmatmul.msk.bf16.gmra.mxu3 %vm439_vm1, %v1122_v31  ;;  %v1581_v5 = vadd.f32 %v1507_v53, %v1298_v47 }
 0x189   : > { %5635 = vmatmul.msk.bf16.gmra.mxu1 %vm439_vm1, %v1692_v37  ;;  %v2837_v37 = vld [vmem:[%s7713_s5 + $0x78] sm:$0xff] }
 0x18a   : > { %v6362_v2 = vadd.f32 %v1794_v35, %v1581_v5  ;;  %v1066_v35 = vld [vmem:[%s5952_s12 + $0x102] sm:$0xff] }
 0x18b   : > { %v940_v11 = vpop.f32.mrf.mxu2  ;;  %v1227_v43 = vpop.f32.mrf.mxu3  ;;  %v1102_v24 = vmax.f32 %v1066_v35, 0.0 }
 0x18c   : > { %v1012_v53 = vadd.f32 %v940_v11, %v6188_v25  ;;  %v1512_v22 = vpop.f32.mrf.mxu0  ;;  %v2832_v25 = vld [vmem:[%s7713_s5 + $0x50] sm:$0xff] }
 0x18d   : > { %2910 = vperm.xlu1 %5872, %v2832_v25   ;;  %v1123_v11 = vpack.c.bf16 %v1103_v8, %v1102_v24  ;;  %v1638_v24 = vld [vmem:[%s5952_s12 + $0x114] sm:$0xff]  ;;  %v1639_v8 = vld [vmem:[%s5952_s12 + $0x11c] sm:$0xff] }
 0x18e   : > { %v1299_v45 = vadd.f32 %v1227_v43, %v1012_v53  ;;  %v6375_v58 = vpop.f32.mrf.mxu1  ;;  %2935 = vperm.xlu0 %5871, %v2837_v37   ;;  %v1693_v43 = vpack.c.bf16 %v1673_v63, %v1672_v19  ;;  %v1392_v63 = vmax.f32 %v1356_v13, 0.0  ;;  %v1104_v37 = vmax.f32 %v1068_v62, 0.0 }
 0x190   : > { %v1582_v50 = vadd.f32 %v1510_v21, %v1299_v45  ;;  %v1355_v45 = vld [vmem:[%s5952_s12 + $0x113] sm:$0xff] }
 0x191   : > { %v1391_v19 = vmax.f32 %v1355_v45, 0.0 }
 0x192   : > { %v6379_v44 = vadd.f32 %v1797_v48, %v1582_v50 }
 0x193   : > { %v942_v47 = vpop.f32.mrf.mxu2  ;;  %v1229_v5 = vpop.f32.mrf.mxu3 }
 0x194   : > { %v1013_v21 = vadd.f32 %v942_v47, %v6202_v41  ;;  %v1515_v9 = vpop.f32.mrf.mxu0  ;;  %v2835_v41 = vld [vmem:[%s7713_s5 + $0x68] sm:$0xff]  ;;  %v1105_v47 = vmax.f32 %v1069_v12, 0.0  ;;  %v2841_v12 = vld [vmem:[%s7713_s5 + $0x98] sm:$0xff] }
 0x195   : > { %2925 = vperm.xlu1 %5872, %v2835_v41  }
 0x196   : > { %v1300_v48 = vadd.f32 %v1229_v5, %v1013_v21  ;;  %v1802_v53 = vpop.f32.mrf.mxu1  ;;  %5618 = vmatmul.msk.bf16.gmra.mxu0 %vm439_vm1, %v1410_v33  ;;  %2950 = vperm.xlu0 %5871, %v2840_v36   ;;  %v1674_v5 = vmax.f32 %v1638_v24, 0.0  ;;  %v1675_v33 = vmax.f32 %v1639_v8, 0.0  ;;  %v1411_v36 = vpack.c.bf16 %v1392_v63, %v1391_v19  ;;  %v1357_v19 = vld [vmem:[%s5952_s12 + $0x123] sm:$0xff]  ;;  %v1358_v63 = vld [vmem:[%s5952_s12 + $0x12b] sm:$0xff] }
 0x198   : > { %5582 = vmatmul.msk.bf16.gmra.mxu2 %vm439_vm1, %v1122_v31  ;;  %5600 = vmatmul.msk.bf16.gmra.mxu3 %vm439_vm1, %v1123_v11  ;;  %v6391_v27 = vadd.f32 %v1512_v22, %v1300_v48  ;;  %v2843_v48 = vld [vmem:[%s7713_s5 + $0xa8] sm:$0xff] }
 0x199   : > { %5636 = vmatmul.msk.bf16.gmra.mxu1 %vm439_vm1, %v1693_v43  ;;  %v2838_v43 = vld [vmem:[%s7713_s5 + $0x80] sm:$0xff] }
 0x19b   : > { %v945_v35 = vpop.f32.mrf.mxu2  ;;  %v1232_v56 = vpop.f32.mrf.mxu3 }
 0x19c   : > { %v1014_v31 = vadd.f32 %v945_v35, %v6206_v3  ;;  %v1517_v22 = vpop.f32.mrf.mxu0  ;;  %v2826_v3 = vld [vmem:[%s7713_s5 + $0x20] sm:$0xff] }
 0x19d   : > { %2880 = vperm.xlu2 %5873, %v2826_v3   ;;  %2940 = vperm.xlu1 %5872, %v2838_v43   ;;  %v1641_v3 = vld [vmem:[%s5952_s12 + $0x12c] sm:$0xff]  ;;  %v1393_v43 = vmax.f32 %v1357_v19, 0.0 }
 0x19e   : > { %v1301_v1 = vadd.f32 %v1232_v56, %v1014_v31  ;;  %v6405_v50 = vpop.f32.mrf.mxu1  ;;  %v1124_v56 = vpack.c.bf16 %v1105_v47, %v1104_v37  ;;  %2965 = vperm.xlu0 %5871, %v2843_v48   ;;  %v1694_v31 = vpack.c.bf16 %v1675_v33, %v1674_v5  ;;  %v1071_v37 = vld [vmem:[%s5952_s12 + $0x12a] sm:$0xff]  ;;  %v1394_v48 = vmax.f32 %v1358_v63, 0.0 }
 0x19f   : > { %v1640_v33 = vld [vmem:[%s5952_s12 + $0x124] sm:$0xff] }
 0x1a0   : > { %v1584_v25 = vadd.f32 %v1515_v9, %v1301_v1 }
 0x1a2   : > { %v6409_v21 = vadd.f32 %v1802_v53, %v1584_v25  ;;  %v1070_v25 = vld [vmem:[%s5952_s12 + $0x122] sm:$0xff] }
 0x1a3   : > { %v947_v41 = vpop.f32.mrf.mxu2  ;;  %v1234_v9 = vpop.f32.mrf.mxu3 }
 0x1a4   : > { %v1015_v53 = vadd.f32 %v947_v41, %v6220_v26  ;;  %v1520_v35 = vpop.f32.mrf.mxu0  ;;  %v2827_v26 = vld [vmem:[%s7713_s5 + $0x28] sm:$0xff] }
 0x1a5   : > { %2885 = vperm.xlu2 %5873, %v2827_v26   ;;  %2955 = vperm.xlu1 %5872, %v2841_v12   ;;  %v2844_v26 = vld [vmem:[%s7713_s5 + $0xb0] sm:$0xff]  ;;  %v2849_v12 = vld [vmem:[%s7713_s5 + $0xd8] sm:$0xff] }
 0x1a6   : > { %v1302_v45 = vadd.f32 %v1234_v9, %v1015_v53  ;;  %v1807_v13 = vpop.f32.mrf.mxu1  ;;  %5619 = vmatmul.msk.bf16.gmra.mxu0 %vm439_vm1, %v1411_v36  ;;  %v1106_v9 = vmax.f32 %v1070_v25, 0.0  ;;  %v1107_v36 = vmax.f32 %v1071_v37, 0.0  ;;  %v1676_v53 = vmax.f32 %v1640_v33, 0.0 }
 0x1a8   : > { %5583 = vmatmul.msk.bf16.gmra.mxu2 %vm439_vm1, %v1123_v11  ;;  %5601 = vmatmul.msk.bf16.gmra.mxu3 %vm439_vm1, %v1124_v56  ;;  %v6424_v62 = vadd.f32 %v1517_v22, %v1302_v45  ;;  %v2846_v11 = vld [vmem:[%s7713_s5 + $0xc0] sm:$0xff] }
 0x1a9   : > { %5637 = vmatmul.msk.bf16.gmra.mxu1 %vm439_vm1, %v1694_v31  ;;  %2980 = vperm.xlu0 %5871, %v2846_v11   ;;  %v1677_v31 = vmax.f32 %v1641_v3, 0.0 }
 0x1ab   : > { %v950_v1 = vpop.f32.mrf.mxu2  ;;  %v1237_v24 = vpop.f32.mrf.mxu3  ;;  %v1695_v19 = vpack.c.bf16 %v1677_v31, %v1676_v53  ;;  %v2176_v53 = vld [vmem:[%s5952_s12 + $0x25] sm:$0xff]  ;;  %v2177_v31 = vld [vmem:[%s5952_s12 + $0x2d] sm:$0xff] }
 0x1ac   : > { %v1016_v22 = vadd.f32 %v950_v1, %v6224_v51  ;;  %v1522_v8 = vpop.f32.mrf.mxu0  ;;  %v2830_v51 = vld [vmem:[%s7713_s5 + $0x40] sm:$0xff]  ;;  %v1412_v1 = vpack.c.bf16 %v1394_v48, %v1393_v43 }
 0x1ad   : > { %2900 = vperm.xlu2 %5873, %v2830_v51   ;;  %2970 = vperm.xlu1 %5872, %v2844_v26   ;;  %v1893_v48 = vld [vmem:[%s5952_s12 + $0x24] sm:$0xff] }
 0x1ae   : > { %v1303_v47 = vadd.f32 %v1237_v24, %v1016_v22  ;;  %v6441_v5 = vpop.f32.mrf.mxu1  ;;  %v1125_v22 = vpack.c.bf16 %v1107_v36, %v1106_v9  ;;  %v2464_v9 = vld [vmem:[%s5952_s12 + $0x2e] sm:$0xff] }
 0x1af   : > { %v1894_v36 = vld [vmem:[%s5952_s12 + $0x2c] sm:$0xff] }
 0x1b0   : > { %v1586_v41 = vadd.f32 %v1520_v35, %v1303_v47  ;;  %v2847_v47 = vld [vmem:[%s7713_s5 + $0xc8] sm:$0xff] }
 0x1b1   : > { %2995 = vperm.xlu0 %5871, %v2849_v12   ;;  %v1929_v12 = vmax.f32 %v1893_v48, 0.0 }
 0x1b2   : > { %v6445_v45 = vadd.f32 %v1807_v13, %v1586_v41  ;;  %v2463_v41 = vld [vmem:[%s5952_s12 + $0x26] sm:$0xff] }
 0x1b3   : > { %v952_v11 = vpop.f32.mrf.mxu2  ;;  %v1239_v35 = vpop.f32.mrf.mxu3 }
 0x1b4   : > { %v1017_v13 = vadd.f32 %v952_v11, %v6241_v14  ;;  %v1525_v24 = vpop.f32.mrf.mxu0  ;;  %v2833_v14 = vld [vmem:[%s7713_s5 + $0x58] sm:$0xff]  ;;  %v2499_v11 = vmax.f32 %v2463_v41, 0.0 }
 0x1b5   : > { %2915 = vperm.xlu2 %5873, %v2833_v14   ;;  %2985 = vperm.xlu1 %5872, %v2847_v47   ;;  %v2850_v14 = vld [vmem:[%s7713_s5 + $0xe0] sm:$0xff]  ;;  %v2855_v47 = vld [vmem:[%s7713_s5 + $0x108] sm:$0xff] }
 0x1b6   : > { %v1304_v63 = vadd.f32 %v1239_v35, %v1017_v13  ;;  %v1812_v25 = vpop.f32.mrf.mxu1  ;;  %5620 = vmatmul.msk.bf16.gmra.mxu0 %vm439_vm1, %v1412_v1  ;;  %v2500_v35 = vmax.f32 %v2464_v9, 0.0  ;;  %v1930_v13 = vmax.f32 %v1894_v36, 0.0 }
 0x1b8   : > { %5584 = vmatmul.msk.bf16.gmra.mxu2 %vm439_vm1, %v1124_v56  ;;  %5602 = vmatmul.msk.bf16.gmra.mxu3 %vm439_vm1, %v1125_v22  ;;  %v6460_v37 = vadd.f32 %v1522_v8, %v1304_v63  ;;  %v2852_v56 = vld [vmem:[%s7713_s5 + $0xf0] sm:$0xff]  ;;  %v2212_v22 = vmax.f32 %v2176_v53, 0.0  ;;  %v2853_v53 = vld [vmem:[%s7713_s5 + $0xf8] sm:$0xff] }
 0x1b9   : > { %5638 = vmatmul.msk.bf16.gmra.mxu1 %vm439_vm1, %v1695_v19  ;;  %3010 = vperm.xlu0 %5871, %v2852_v56   ;;  %v2213_v19 = vmax.f32 %v2177_v31, 0.0 }
 0x1bb   : > { %v955_v33 = vpop.f32.mrf.mxu2  ;;  %v1242_v3 = vpop.f32.mrf.mxu3  ;;  %v2248_v48 = vpack.c.bf16 %v2213_v19, %v2212_v22  ;;  %v2178_v22 = vld [vmem:[%s5952_s12 + $0x35] sm:$0xff]  ;;  %v2179_v19 = vld [vmem:[%s5952_s12 + $0x3d] sm:$0xff] }
 0x1bc   : > { %v1018_v8 = vadd.f32 %v955_v33, %v6084_v23  ;;  %v1527_v43 = vpop.f32.mrf.mxu0  ;;  %v2836_v23 = vld [vmem:[%s7713_s5 + $0x70] sm:$0xff] }
 0x1bd   : > { %2930 = vperm.xlu2 %5873, %v2836_v23   ;;  %3000 = vperm.xlu1 %5872, %v2850_v14  }
 0x1be   : > { %v1305_v51 = vadd.f32 %v1242_v3, %v1018_v8  ;;  %v6479_v26 = vpop.f32.mrf.mxu1  ;;  %v1965_v8 = vpack.c.bf16 %v1930_v13, %v1929_v12  ;;  %v2466_v13 = vld [vmem:[%s5952_s12 + $0x3e] sm:$0xff] }
 0x1c0   : > { %v1588_v1 = vadd.f32 %v1525_v24, %v1305_v51  ;;  %v2535_v24 = vpack.c.bf16 %v2500_v35, %v2499_v11  ;;  %v1895_v35 = vld [vmem:[%s5952_s12 + $0x34] sm:$0xff] }
 0x1c1   : > { %3025 = vperm.xlu0 %5871, %v2855_v47   ;;  %v1931_v47 = vmax.f32 %v1895_v35, 0.0 }
 0x1c2   : > { %v6481_v63 = vadd.f32 %v1812_v25, %v1588_v1  ;;  %v2465_v1 = vld [vmem:[%s5952_s12 + $0x36] sm:$0xff] }
 0x1c3   : > { %v957_v56 = vpop.f32.mrf.mxu2  ;;  %v1244_v33 = vpop.f32.mrf.mxu3 }
 0x1c4   : > { %v1019_v25 = vadd.f32 %v957_v56, %v6096_v46  ;;  %v1530_v3 = vpop.f32.mrf.mxu0  ;;  %v2839_v46 = vld [vmem:[%s7713_s5 + $0x88] sm:$0xff]  ;;  %v2501_v56 = vmax.f32 %v2465_v1, 0.0 }
 0x1c5   : > { %2945 = vperm.xlu2 %5873, %v2839_v46   ;;  %3015 = vperm.xlu1 %5872, %v2853_v53   ;;  %v2856_v46 = vld [vmem:[%s7713_s5 + $0x110] sm:$0xff] }
 0x1c6   : > { %v1306_v41 = vadd.f32 %v1244_v33, %v1019_v25  ;;  %v1817_v9 = vpop.f32.mrf.mxu1  ;;  %5675 = vmatmul.msk.bf16.vlgmr.msra.gmra.mxu0 %vm439_vm1, %v2535_v24  ;;  %v2502_v33 = vmax.f32 %v2466_v13, 0.0 }
 0x1c8   : > { %5639 = vmatmul.msk.bf16.vlgmr.msra.gmra.mxu2 %vm439_vm1, %v1965_v8  ;;  %5657 = vmatmul.msk.bf16.vlgmr.msra.gmra.mxu3 %vm439_vm1, %v2248_v48  ;;  %v6496_v36 = vadd.f32 %v1527_v43, %v1306_v41  ;;  %v1896_v43 = vld [vmem:[%s5952_s12 + $0x3c] sm:$0xff]  ;;  %v2214_v8 = vmax.f32 %v2178_v22, 0.0  ;;  %v2215_v48 = vmax.f32 %v2179_v19, 0.0 }
 0x1c9   : > { %v1932_v25 = vmax.f32 %v1896_v43, 0.0 }
 0x1ca   : > { %v2249_v35 = vpack.c.bf16 %v2215_v48, %v2214_v8  ;;  %v2180_v8 = vld [vmem:[%s5952_s12 + $0x45] sm:$0xff]  ;;  %v2181_v48 = vld [vmem:[%s5952_s12 + $0x4d] sm:$0xff] }
 0x1cb   : > { %v960_v31 = vpop.f32.mrf.mxu2  ;;  %v1247_v51 = vpop.f32.mrf.mxu3 }
 0x1cc   : > { %v1020_v12 = vadd.f32 %v960_v31, %v6104_v55  ;;  %v1532_v11 = vpop.f32.mrf.mxu0  ;;  %v2842_v55 = vld [vmem:[%s7713_s5 + $0xa0] sm:$0xff] }
 0x1cd   : > { %2960 = vperm.xlu2 %5873, %v2842_v55   ;;  %3030 = vperm.xlu1 %5872, %v2856_v46  }
 0x1ce   : > { %v1307_v23 = vadd.f32 %v1247_v51, %v1020_v12  ;;  %v6511_v14 = vpop.f32.mrf.mxu1  ;;  %v2536_v51 = vpack.c.bf16 %v2502_v33, %v2501_v56  ;;  %v1897_v56 = vld [vmem:[%s5952_s12 + $0x44] sm:$0xff] }
 0x1cf   : > { %7715 = vst [vmem:[#allocation3_spill] sm:$0xff] %v6511_v14  ;;  %v2467_v33 = vld [vmem:[%s5952_s12 + $0x46] sm:$0xff] }
 0x1d0   : > { %v1590_v24 = vadd.f32 %v1530_v3, %v1307_v23 }
 0x1d2   : > { %v6513_v41 = vadd.f32 %v1817_v9, %v1590_v24  ;;  %v1966_v9 = vpack.c.bf16 %v1932_v25, %v1931_v47  ;;  %v2468_v24 = vld [vmem:[%s5952_s12 + $0x4e] sm:$0xff] }
 0x1d3   : > { %v962_v53 = vpop.f32.mrf.mxu2  ;;  %v1249_v31 = vpop.f32.mrf.mxu3  ;;  %v1898_v25 = vld [vmem:[%s5952_s12 + $0x4c] sm:$0xff] }
 0x1d4   : > { %v1021_v3 = vadd.f32 %v962_v53, %v6114_v10  ;;  %v1535_v12 = vpop.f32.mrf.mxu0  ;;  %v2845_v10 = vld [vmem:[%s7713_s5 + $0xb8] sm:$0xff]  ;;  %v2503_v53 = vmax.f32 %v2467_v33, 0.0 }
 0x1d5   : > { %2975 = vperm.xlu2 %5873, %v2845_v10  }
 0x1d6   : > { %v1308_v1 = vadd.f32 %v1249_v31, %v1021_v3  ;;  %v1822_v13 = vpop.f32.mrf.mxu1  ;;  %5676 = vmatmul.msk.bf16.gmra.mxu0 %vm439_vm1, %v2536_v51  ;;  %v2504_v31 = vmax.f32 %v2468_v24, 0.0  ;;  %v1934_v3 = vmax.f32 %v1898_v25, 0.0 }
 0x1d8   : > { %5640 = vmatmul.msk.bf16.gmra.mxu2 %vm439_vm1, %v1966_v9  ;;  %5658 = vmatmul.msk.bf16.gmra.mxu3 %vm439_vm1, %v2249_v35  ;;  %v6525_v43 = vadd.f32 %v1532_v11, %v1308_v1  ;;  %v1933_v11 = vmax.f32 %v1897_v56, 0.0  ;;  %v2216_v9 = vmax.f32 %v2180_v8, 0.0  ;;  %v2217_v35 = vmax.f32 %v2181_v48, 0.0 }
 0x1d9   : > { %v2537_v14 = vpack.c.bf16 %v2504_v31, %v2503_v53  ;;  %v2469_v53 = vld [vmem:[%s5952_s12 + $0x56] sm:$0xff]  ;;  %v2470_v31 = vld [vmem:[%s5952_s12 + $0x5e] sm:$0xff] }
 0x1da   : > { %v1967_v56 = vpack.c.bf16 %v1934_v3, %v1933_v11  ;;  %v1899_v11 = vld [vmem:[%s5952_s12 + $0x54] sm:$0xff]  ;;  %v2183_v3 = vld [vmem:[%s5952_s12 + $0x5d] sm:$0xff] }
 0x1db   : > { %v965_v22 = vpop.f32.mrf.mxu2  ;;  %v1252_v19 = vpop.f32.mrf.mxu3 }
 0x1dc   : > { %v1022_v23 = vadd.f32 %v965_v22, %v6122_v18  ;;  %v1537_v47 = vpop.f32.mrf.mxu0  ;;  %v2848_v18 = vld [vmem:[%s7713_s5 + $0xd0] sm:$0xff] }
 0x1dd   : > { %2990 = vperm.xlu2 %5873, %v2848_v18   ;;  %v2505_v18 = vmax.f32 %v2469_v53, 0.0 }
 0x1de   : > { %v1309_v55 = vadd.f32 %v1252_v19, %v1022_v23  ;;  %v6537_v46 = vpop.f32.mrf.mxu1 }
 0x1df   : > { %7716 = vst [vmem:[#allocation4_spill] sm:$0xff] %v6537_v46 }
 0x1e0   : > { %v1592_v51 = vadd.f32 %v1535_v12, %v1309_v55  ;;  %v2250_v12 = vpack.c.bf16 %v2217_v35, %v2216_v9 }
 0x1e2   : > { %v6539_v1 = vadd.f32 %v1822_v13, %v1592_v51  ;;  %v2182_v51 = vld [vmem:[%s5952_s12 + $0x55] sm:$0xff] }
 0x1e3   : > { %v967_v10 = vpop.f32.mrf.mxu2  ;;  %v1254_v22 = vpop.f32.mrf.mxu3 }
 0x1e4   : > { %v1023_v19 = vadd.f32 %v967_v10, %v6132_v40  ;;  %v1540_v23 = vpop.f32.mrf.mxu0  ;;  %v2851_v40 = vld [vmem:[%s7713_s5 + $0xe8] sm:$0xff]  ;;  %v2506_v10 = vmax.f32 %v2470_v31, 0.0 }
 0x1e5   : > { %3005 = vperm.xlu2 %5873, %v2851_v40  }
 0x1e6   : > { %v1310_v33 = vadd.f32 %v1254_v22, %v1023_v19  ;;  %v1827_v13 = vpop.f32.mrf.mxu1  ;;  %5677 = vmatmul.msk.bf16.gmra.mxu0 %vm439_vm1, %v2537_v14  ;;  %v1900_v14 = vld [vmem:[%s5952_s12 + $0x5c] sm:$0xff]  ;;  %v2538_v46 = vpack.c.bf16 %v2506_v10, %v2505_v18  ;;  %v2471_v18 = vld [vmem:[%s5952_s12 + $0x66] sm:$0xff]  ;;  %v2472_v10 = vld [vmem:[%s5952_s12 + $0x6e] sm:$0xff] }
 0x1e7   : > { %v1936_v19 = vmax.f32 %v1900_v14, 0.0 }
 0x1e8   : > { %5641 = vmatmul.msk.bf16.gmra.mxu2 %vm439_vm1, %v1967_v56  ;;  %5659 = vmatmul.msk.bf16.gmra.mxu3 %vm439_vm1, %v2250_v12  ;;  %v6548_v24 = vadd.f32 %v1537_v47, %v1310_v33  ;;  %v1935_v47 = vmax.f32 %v1899_v11, 0.0  ;;  %v2218_v56 = vmax.f32 %v2182_v51, 0.0  ;;  %v2219_v12 = vmax.f32 %v2183_v3, 0.0 }
 0x1ea   : > { %v1968_v11 = vpack.c.bf16 %v1936_v19, %v1935_v47  ;;  %v1901_v47 = vld [vmem:[%s5952_s12 + $0x64] sm:$0xff]  ;;  %v2185_v19 = vld [vmem:[%s5952_s12 + $0x6d] sm:$0xff] }
 0x1eb   : > { %v970_v25 = vpop.f32.mrf.mxu2  ;;  %v1257_v8 = vpop.f32.mrf.mxu3 }
 0x1ec   : > { %v1024_v48 = vadd.f32 %v970_v25, %v6140_v49  ;;  %v1542_v55 = vpop.f32.mrf.mxu0  ;;  %v2854_v49 = vld [vmem:[%s7713_s5 + $0x100] sm:$0xff] }
 0x1ed   : > { %3020 = vperm.xlu2 %5873, %v2854_v49   ;;  %v2507_v49 = vmax.f32 %v2471_v18, 0.0 }
 0x1ee   : > { %v1311_v9 = vadd.f32 %v1257_v8, %v1024_v48  ;;  %v6560_v35 = vpop.f32.mrf.mxu1 }
 0x1ef   : > { %7717 = vst [vmem:[#allocation5_spill] sm:$0xff] %v6560_v35 }
 0x1f0   : > { %v1594_v22 = vadd.f32 %v1540_v23, %v1311_v9  ;;  %v2251_v23 = vpack.c.bf16 %v2219_v12, %v2218_v56 }
 0x1f2   : > { %v6562_v33 = vadd.f32 %v1827_v13, %v1594_v22  ;;  %v2184_v22 = vld [vmem:[%s5952_s12 + $0x65] sm:$0xff] }
 0x1f3   : > { %v972_v40 = vpop.f32.mrf.mxu2  ;;  %v1259_v25 = vpop.f32.mrf.mxu3 }
 0x1f4   : > { %v1025_v8 = vadd.f32 %v972_v40, %v6150_v7  ;;  %v1545_v48 = vpop.f32.mrf.mxu0  ;;  %v2857_v7 = vld [vmem:[%s7713_s5 + $0x118] sm:$0xff]  ;;  %v2508_v40 = vmax.f32 %v2472_v10, 0.0 }
 0x1f5   : > { %3035 = vperm.xlu2 %5873, %v2857_v7  }
 0x1f6   : > { %v1312_v53 = vadd.f32 %v1259_v25, %v1025_v8  ;;  %v1832_v13 = vpop.f32.mrf.mxu1  ;;  %5678 = vmatmul.msk.bf16.gmra.mxu0 %vm439_vm1, %v2538_v46  ;;  %v1902_v46 = vld [vmem:[%s5952_s12 + $0x6c] sm:$0xff] }
 0x1f7   : > { %v1938_v8 = vmax.f32 %v1902_v46, 0.0 }
 0x1f8   : > { %5642 = vmatmul.msk.bf16.gmra.mxu2 %vm439_vm1, %v1968_v11  ;;  %5660 = vmatmul.msk.bf16.gmra.mxu3 %vm439_vm1, %v2251_v23  ;;  %v6571_v31 = vadd.f32 %v1542_v55, %v1312_v53  ;;  %v1937_v55 = vmax.f32 %v1901_v47, 0.0  ;;  %v2220_v11 = vmax.f32 %v2184_v22, 0.0  ;;  %v2221_v23 = vmax.f32 %v2185_v19, 0.0  ;;  %v1903_v19 = vld [vmem:[%s5952_s12 + $0x74] sm:$0xff] }
 0x1fa   : > { %v2252_v47 = vpack.c.bf16 %v2221_v23, %v2220_v11  ;;  %v1939_v11 = vmax.f32 %v1903_v19, 0.0 }
 0x1fb   : > { %v975_v14 = vpop.f32.mrf.mxu2  ;;  %v1262_v51 = vpop.f32.mrf.mxu3 }
 0x1fc   : > { %v1026_v3 = vadd.f32 %v975_v14, %v6158_v17  ;;  %v1547_v9 = vpop.f32.mrf.mxu0  ;;  %v2539_v14 = vpack.c.bf16 %v2508_v40, %v2507_v49  ;;  %v1904_v49 = vld [vmem:[%s5952_s12 + $0x7c] sm:$0xff] }
 0x1fd   : > { %v2186_v40 = vld [vmem:[%s5952_s12 + $0x75] sm:$0xff] }
 0x1fe   : > { %v1313_v56 = vadd.f32 %v1262_v51, %v1026_v3  ;;  %v6583_v12 = vpop.f32.mrf.mxu1  ;;  %v1969_v3 = vpack.c.bf16 %v1938_v8, %v1937_v55  ;;  %v2474_v55 = vld [vmem:[%s5952_s12 + $0x7e] sm:$0xff] }
 0x1ff   : > { %7718 = vst [vmem:[#allocation6_spill] sm:$0xff] %v6583_v12 }
 0x200   : > { %v1596_v25 = vadd.f32 %v1545_v48, %v1313_v56  ;;  %v2473_v56 = vld [vmem:[%s5952_s12 + $0x76] sm:$0xff] }
 0x201   : > { %v2509_v23 = vmax.f32 %v2473_v56, 0.0 }
 0x202   : > { %v6585_v53 = vadd.f32 %v1832_v13, %v1596_v25 }
 0x203   : > { %v977_v17 = vpop.f32.mrf.mxu2  ;;  %v1264_v7 = vpop.f32.mrf.mxu3 }
 0x204   : > { %v1027_v35 = vadd.f32 %v977_v17, %v6168_v42  ;;  %v1550_v51 = vpop.f32.mrf.mxu0  ;;  %v2510_v17 = vmax.f32 %v2474_v55, 0.0 }
 0x206   : > { %v1314_v48 = vadd.f32 %v1264_v7, %v1027_v35  ;;  %v1837_v18 = vpop.f32.mrf.mxu1  ;;  %5679 = vmatmul.msk.bf16.gmra.mxu0 %vm439_vm1, %v2539_v14  ;;  %v2187_v35 = vld [vmem:[%s5952_s12 + $0x7d] sm:$0xff]  ;;  %v2222_v14 = vmax.f32 %v2186_v40, 0.0 }
 0x208   : > { %5643 = vmatmul.msk.bf16.gmra.mxu2 %vm439_vm1, %v1969_v3  ;;  %5661 = vmatmul.msk.bf16.gmra.mxu3 %vm439_vm1, %v2252_v47  ;;  %v6591_v13 = vadd.f32 %v1547_v9, %v1314_v48  ;;  %v1940_v9 = vmax.f32 %v1904_v49, 0.0  ;;  %v2223_v3 = vmax.f32 %v2187_v35, 0.0  ;;  %v1905_v35 = vld [vmem:[%s5952_s12 + $0x84] sm:$0xff] }
 0x20a   : > { %7719 = vst [vmem:[#allocation7_spill] sm:$0xff] %v6591_v13  ;;  %v2253_v19 = vpack.c.bf16 %v2223_v3, %v2222_v14 }
 0x20b   : > { %v980_v10 = vpop.f32.mrf.mxu2  ;;  %v1267_v46 = vpop.f32.mrf.mxu3 }
 0x20c   : > { %v1028_v42 = vadd.f32 %v980_v10, %v6176_v54  ;;  %v1552_v22 = vpop.f32.mrf.mxu0  ;;  %v2540_v10 = vpack.c.bf16 %v2510_v17, %v2509_v23  ;;  %v1906_v23 = vld [vmem:[%s5952_s12 + $0x8c] sm:$0xff] }
 0x20d   : > { %v2188_v17 = vld [vmem:[%s5952_s12 + $0x85] sm:$0xff] }
 0x20e   : > { %v1315_v25 = vadd.f32 %v1267_v46, %v1028_v42  ;;  %v6600_v8 = vpop.f32.mrf.mxu1  ;;  %v1970_v42 = vpack.c.bf16 %v1940_v9, %v1939_v11  ;;  %v2476_v11 = vld [vmem:[%s5952_s12 + $0x8e] sm:$0xff]  ;;  %v1941_v9 = vmax.f32 %v1905_v35, 0.0  ;;  %v2477_v35 = vld [vmem:[%s5952_s12 + $0x96] sm:$0xff] }
 0x20f   : > { %7720 = vst [vmem:[#allocation8_spill] sm:$0xff] %v6600_v8  ;;  %v2512_v3 = vmax.f32 %v2476_v11, 0.0  ;;  %v1908_v11 = vld [vmem:[%s5952_s12 + $0x9c] sm:$0xff] }
 0x210   : > { %v1598_v7 = vadd.f32 %v1550_v51, %v1315_v25  ;;  %v2475_v25 = vld [vmem:[%s5952_s12 + $0x86] sm:$0xff] }
 0x211   : > { %v2511_v14 = vmax.f32 %v2475_v25, 0.0  ;;  %v2478_v25 = vld [vmem:[%s5952_s12 + $0x9e] sm:$0xff] }
 0x212   : > { %v6602_v47 = vadd.f32 %v1837_v18, %v1598_v7 }
 0x213   : > { %v982_v54 = vpop.f32.mrf.mxu2  ;;  %v1269_v48 = vpop.f32.mrf.mxu3 }
 0x214   : > { %7721 = vst [vmem:[#allocation9_spill] sm:$0xff] %v6602_v47  ;;  %v1029_v12 = vadd.f32 %v982_v54, %v6186_v16  ;;  %v1555_v46 = vpop.f32.mrf.mxu0 }
 0x216   : > { %v1316_v51 = vadd.f32 %v1269_v48, %v1029_v12  ;;  %v1842_v56 = vpop.f32.mrf.mxu1  ;;  %5680 = vmatmul.msk.bf16.gmra.mxu0 %vm439_vm1, %v2540_v10  ;;  %v2189_v12 = vld [vmem:[%s5952_s12 + $0x8d] sm:$0xff]  ;;  %v1942_v48 = vmax.f32 %v1906_v23, 0.0  ;;  %v2224_v10 = vmax.f32 %v2188_v17, 0.0  ;;  %v2190_v23 = vld [vmem:[%s5952_s12 + $0x95] sm:$0xff]  ;;  %v2191_v17 = vld [vmem:[%s5952_s12 + $0x9d] sm:$0xff] }
 0x218   : > { %5644 = vmatmul.msk.bf16.gmra.mxu2 %vm439_vm1, %v1970_v42  ;;  %5662 = vmatmul.msk.bf16.gmra.mxu3 %vm439_vm1, %v2253_v19  ;;  %v6608_v18 = vadd.f32 %v1552_v22, %v1316_v51  ;;  %v2225_v22 = vmax.f32 %v2189_v12, 0.0  ;;  %v1971_v47 = vpack.c.bf16 %v1942_v48, %v1941_v9  ;;  %v2513_v9 = vmax.f32 %v2477_v35, 0.0 }
 0x219   : > { %v2227_v48 = vmax.f32 %v2191_v17, 0.0 }
 0x21a   : > { %7722 = vst [vmem:[#allocation10_spill] sm:$0xff] %v6608_v18  ;;  %v2254_v13 = vpack.c.bf16 %v2225_v22, %v2224_v10 }
 0x21b   : > { %v985_v55 = vpop.f32.mrf.mxu2  ;;  %v1272_v49 = vpop.f32.mrf.mxu3 }
 0x21c   : > { %v1030_v16 = vadd.f32 %v985_v55, %v6194_v28  ;;  %v1557_v40 = vpop.f32.mrf.mxu0  ;;  %v2541_v55 = vpack.c.bf16 %v2512_v3, %v2511_v14  ;;  %v1944_v3 = vmax.f32 %v1908_v11, 0.0  ;;  %v3634_v11 = vld [vmem:[%s7711_s3 + $0x4] sm:$0x3] }
 0x21e   : > { %v1317_v7 = vadd.f32 %v1272_v49, %v1030_v16  ;;  %v6617_v42 = vpop.f32.mrf.mxu1 }
 0x220   : > { %v1600_v54 = vadd.f32 %v1555_v46, %v1317_v7 }
 0x222   : > { %v6619_v19 = vadd.f32 %v1842_v56, %v1600_v54  ;;  %v5886_v56 = vmov 0.0   ;;  %v2226_v54 = vmax.f32 %v2190_v23, 0.0  ;;  %v3690_v23 = vsel %vm494_vm0, %v3634_v11, 0 }
 0x223   : > { %v987_v28 = vpop.f32.mrf.mxu2  ;;  %v1274_v51 = vpop.f32.mrf.mxu3  ;;  %3076 = vst.msk [vmem:[#allocation2 + $0x10] sm:$0xff] %vm439_vm1, %v5886_v56  ;;  %3699 = vmatpush.bf16.msrb.mxu3 %v3690_v23 }
 0x224   : > { %v1031_v8 = vadd.f32 %v987_v28, %v6204_v59  ;;  %v1560_v18 = vpop.f32.mrf.mxu0  ;;  %3077 = vst.msk [vmem:[#allocation2 + $0x18] sm:$0xff] %vm439_vm1, %v5886_v56 }
 0x225   : > { %3074 = vst.msk [vmem:[#allocation2] sm:$0xff] %vm439_vm1, %v5886_v56 }
 0x226   : > { %v1318_v49 = vadd.f32 %v1274_v51, %v1031_v8  ;;  %5681 = vmatmul.msk.bf16.gmra.mxu0 %vm439_vm1, %v2541_v55  ;;  %v1847_v59 = vpop.f32.mrf.mxu1  ;;  %3075 = vst.msk [vmem:[#allocation2 + $0x8] sm:$0xff] %vm439_vm1, %v5886_v56 }
 0x227   : > { %3078 = vst.msk [vmem:[#allocation2 + $0x20] sm:$0xff] %vm439_vm1, %v5886_v56 }
 0x228   : > { %5645 = vmatmul.msk.bf16.gmra.mxu2 %vm439_vm1, %v1971_v47  ;;  %5663 = vmatmul.msk.bf16.gmra.mxu3 %vm439_vm1, %v2254_v13  ;;  %v6625_v46 = vadd.f32 %v1557_v40, %v1318_v49  ;;  %v1907_v40 = vld [vmem:[%s5952_s12 + $0x94] sm:$0xff]  ;;  %3079 = vst.msk [vmem:[#allocation2 + $0x28] sm:$0xff] %vm439_vm1, %v5886_v56 }
 0x229   : > { %3080 = vst.msk [vmem:[#allocation2 + $0x30] sm:$0xff] %vm439_vm1, %v5886_v56  ;;  %v1943_v7 = vmax.f32 %v1907_v40, 0.0  ;;  %v2255_v40 = vpack.c.bf16 %v2227_v48, %v2226_v54  ;;  %v2479_v54 = vld [vmem:[%s5952_s12 + $0xa6] sm:$0xff]  ;;  %v2480_v48 = vld [vmem:[%s5952_s12 + $0xae] sm:$0xff] }
 0x22a   : > { %3081 = vst.msk [vmem:[#allocation2 + $0x38] sm:$0xff] %vm439_vm1, %v5886_v56 }
 0x22b   : > { %v990_v8 = vpop.f32.mrf.mxu2  ;;  %v1277_v47 = vpop.f32.mrf.mxu3  ;;  %3082 = vst.msk [vmem:[#allocation2 + $0x40] sm:$0xff] %vm439_vm1, %v5886_v56 }
 0x22c   : > { %v1032_v13 = vadd.f32 %v990_v8, %v6212_v6  ;;  %v1562_v16 = vpop.f32.mrf.mxu0  ;;  %v2514_v6 = vmax.f32 %v2478_v25, 0.0  ;;  %3083 = vst.msk [vmem:[#allocation2 + $0x48] sm:$0xff] %vm439_vm1, %v5886_v56  ;;  %v3208_v25 = vld [vmem:[%s7711_s3] sm:$0x3] }
 0x22d   : > { %3084 = vst.msk [vmem:[#allocation2 + $0x50] sm:$0xff] %vm439_vm1, %v5886_v56  ;;  %v3209_v22 = vld [vmem:[#allocation2 + $0x1] sm:$0xff]  ;;  %v3210_v28 = vld [vmem:[#allocation2 + $0x9] sm:$0xff] }
 0x22e   : > { %v1319_v12 = vadd.f32 %v1277_v47, %v1032_v13  ;;  %v2542_v49 = vpack.c.bf16 %v2514_v6, %v2513_v9  ;;  %3085 = vst.msk [vmem:[#allocation2 + $0x58] sm:$0xff] %vm439_vm1, %v5886_v56  ;;  %v1972_v13 = vpack.c.bf16 %v1944_v3, %v1943_v7  ;;  %v1909_v7 = vld [vmem:[%s5952_s12 + $0xa4] sm:$0xff]  ;;  %v1910_v9 = vld [vmem:[%s5952_s12 + $0xac] sm:$0xff] }
 0x22f   : > { %3086 = vst.msk [vmem:[#allocation2 + $0x60] sm:$0xff] %vm439_vm1, %v5886_v56  ;;  %v2192_v3 = vld [vmem:[%s5952_s12 + $0xa5] sm:$0xff] }
 0x230   : > { %v1602_v14 = vadd.f32 %v1560_v18, %v1319_v12  ;;  %v3245_v18 = vpack.c.bf16 %v3210_v28, %v3209_v22  ;;  %3087 = vst.msk [vmem:[#allocation2 + $0x68] sm:$0xff] %vm439_vm1, %v5886_v56  ;;  %v2193_v22 = vld [vmem:[%s5952_s12 + $0xad] sm:$0xff] }
 0x231   : > { %3088 = vst.msk [vmem:[#allocation2 + $0x70] sm:$0xff] %vm439_vm1, %v5886_v56 }
 0x232   : > { %v6654_v10 = vadd.f32 %v1847_v59, %v1602_v14  ;;  %v6663_v59 = vpop.f32.mrf.mxu1  ;;  %5693 = vmatmul.msk.bf16.vlgmr.msra.gmra.mxu1 %vm439_vm1, %v3245_v18  ;;  %3089 = vst.msk [vmem:[#allocation2 + $0x78] sm:$0xff] %vm439_vm1, %v5886_v56  ;;  %v2228_v18 = vmax.f32 %v2192_v3, 0.0 }
 0x233   : > { %v992_v51 = vpop.f32.mrf.mxu2  ;;  %v1279_v55 = vpop.f32.mrf.mxu3  ;;  %3090 = vst.msk [vmem:[#allocation2 + $0x80] sm:$0xff] %vm439_vm1, %v5886_v56 }
 0x234   : > { %v1033_v8 = vadd.f32 %v992_v51, %v6222_v39  ;;  %v1565_v47 = vpop.f32.mrf.mxu0  ;;  %3091 = vst.msk [vmem:[#allocation2 + $0x88] sm:$0xff] %vm439_vm1, %v5886_v56  ;;  %v1945_v51 = vmax.f32 %v1909_v7, 0.0 }
 0x235   : > { %3092 = vst.msk [vmem:[#allocation2 + $0x90] sm:$0xff] %vm439_vm1, %v5886_v56 }
 0x236   : > { %v1320_v35 = vadd.f32 %v1279_v55, %v1033_v8  ;;  %5682 = vmatmul.msk.bf16.gmra.mxu0 %vm439_vm1, %v2542_v49  ;;  %3093 = vst.msk [vmem:[#allocation2 + $0x98] sm:$0xff] %vm439_vm1, %v5886_v56  ;;  %v1946_v49 = vmax.f32 %v1910_v9, 0.0  ;;  %v2516_v8 = vmax.f32 %v2480_v48, 0.0 }
 0x237   : > { %3094 = vst.msk [vmem:[#allocation2 + $0xa0] sm:$0xff] %vm439_vm1, %v5886_v56 }
 0x238   : > { %5646 = vmatmul.msk.bf16.gmra.mxu2 %vm439_vm1, %v1972_v13  ;;  %5664 = vmatmul.msk.bf16.gmra.mxu3 %vm439_vm1, %v2255_v40  ;;  %v6675_v39 = vadd.f32 %v1562_v16, %v1320_v35  ;;  %v3479_v16 = vsel %vm494_vm0, %v3208_v25, 0  ;;  %3095 = vst.msk [vmem:[#allocation2 + $0xa8] sm:$0xff] %vm439_vm1, %v5886_v56  ;;  %v2229_v40 = vmax.f32 %v2193_v22, 0.0  ;;  %v3881_v35 = vld [vmem:[%s7711_s3 + $0x4] sm:$0xc]  ;;  %v1973_v3 = vpack.c.bf16 %v1946_v49, %v1945_v51 }
 0x239   : > { %3488 = vmatpush.bf16.msrb.mxu2 %v3479_v16  ;;  %3096 = vst.msk [vmem:[#allocation2 + $0xb0] sm:$0xff] %vm439_vm1, %v5886_v56  ;;  %v4132_v25 = vld [vmem:[%s7711_s3 + $0x8] sm:$0x3]  ;;  %v3883_v11 = vunpack.c.l.b16 %v3881_v35  ;;  %v2195_v35 = vld [vmem:[%s5952_s12 + $0xbd] sm:$0xff] }
 0x23a   : > { %v1852_v55 = vpop.f32.mrf.mxu1  ;;  %3097 = vst.msk [vmem:[#allocation2 + $0xb8] sm:$0xff] %vm439_vm1, %v5886_v56  ;;  %v4188_v16 = vsel %vm494_vm0, %v4132_v25, 0 }
 0x23b   : > { %v995_v17 = vpop.f32.mrf.mxu2  ;;  %v1282_v12 = vpop.f32.mrf.mxu3  ;;  %3098 = vst.msk [vmem:[#allocation2 + $0xc0] sm:$0xff] %vm439_vm1, %v5886_v56  ;;  %4197 = vmatpush.bf16.msrb.mxu1 %v4188_v16  ;;  %v3884_v7 = vpack.c.b16 %v3883_v11, %v3883_v11  ;;  %v6762_v11 = vld [vmem:[%s7710_s2] ss:$0 sm:$0xff] }
 0x23c   : > { %v1034_v6 = vadd.f32 %v995_v17, %v6233_v61  ;;  %v1567_v14 = vpop.f32.mrf.mxu0  ;;  %v2515_v61 = vmax.f32 %v2479_v54, 0.0  ;;  %3099 = vst.msk [vmem:[#allocation2 + $0xc8] sm:$0xff] %vm439_vm1, %v5886_v56  ;;  %v2256_v54 = vpack.c.bf16 %v2229_v40, %v2228_v18  ;;  %v1911_v18 = vld [vmem:[%s5952_s12 + $0xb4] sm:$0xff] }
 0x23d   : > { %3100 = vst.msk [vmem:[#allocation2 + $0xd0] sm:$0xff] %vm439_vm1, %v5886_v56  ;;  %v3885_v48 = vrot.slane %v3884_v7, 2  ;;  %v2194_v40 = vld [vmem:[%s5952_s12 + $0xb5] sm:$0xff] }
 0x23e   : > { %v1321_v28 = vadd.f32 %v1282_v12, %v1034_v6  ;;  %v2543_v12 = vpack.c.bf16 %v2516_v8, %v2515_v61  ;;  %3101 = vst.msk [vmem:[#allocation2 + $0xd8] sm:$0xff] %vm439_vm1, %v5886_v56  ;;  %v2481_v61 = vld [vmem:[%s5952_s12 + $0xb6] sm:$0xff]  ;;  %v2482_v8 = vld [vmem:[%s5952_s12 + $0xbe] sm:$0xff]  ;;  %v2230_v7 = vmax.f32 %v2194_v40, 0.0 }
 0x23f   : > { %3102 = vst.msk [vmem:[#allocation2 + $0xe0] sm:$0xff] %vm439_vm1, %v5886_v56  ;;  %v2517_v16 = vmax.f32 %v2481_v61, 0.0 }
 0x240   : > { %v1604_v13 = vadd.f32 %v1565_v47, %v1321_v28  ;;  %3103 = vst.msk [vmem:[#allocation2 + $0xe8] sm:$0xff] %vm439_vm1, %v5886_v56 }
 0x241   : > { %3104 = vst.msk [vmem:[#allocation2 + $0xf0] sm:$0xff] %vm439_vm1, %v5886_v56 }
 0x242   : > { %v6719_v23 = vadd.f32 %v1852_v55, %v1604_v13  ;;  %3105 = vst.msk [vmem:[#allocation2 + $0xf8] sm:$0xff] %vm439_vm1, %v5886_v56  ;;  %v1912_v13 = vld [vmem:[%s5952_s12 + $0xbc] sm:$0xff] }
 0x243   : > { %v997_v47 = vpop.f32.mrf.mxu2  ;;  %v1284_v17 = vpop.f32.mrf.mxu3  ;;  %3106 = vst.msk [vmem:[#allocation2 + $0x100] sm:$0xff] %vm439_vm1, %v5886_v56 }
 0x244   : > { %v1035_v9 = vadd.f32 %v997_v47, %v6244_v38  ;;  %v2620_v6 = vpop.f32.mrf.mxu0  ;;  %v3941_v38 = vsel %vm494_vm0, %v3885_v48, 0  ;;  %3107 = vst.msk [vmem:[#allocation2 + $0x108] sm:$0xff] %vm439_vm1, %v5886_v56  ;;  %v2518_v47 = vmax.f32 %v2482_v8, 0.0 }
 0x245   : > { %3950 = vmatpush.bf16.msrb.mxu0 %v3941_v38  ;;  %3108 = vst.msk [vmem:[#allocation2 + $0x110] sm:$0xff] %vm439_vm1, %v5886_v56 }
 0x246   : > { %v1322_v22 = vadd.f32 %v1284_v17, %v1035_v9  ;;  %5683 = vmatmul.msk.bf16.gmra.mxu0 %vm439_vm1, %v2543_v12  ;;  %3109 = vst.msk [vmem:[#allocation2 + $0x118] sm:$0xff] %vm439_vm1, %v5886_v56  ;;  %v1948_v12 = vmax.f32 %v1912_v13, 0.0  ;;  %v2231_v9 = vmax.f32 %v2195_v35, 0.0  ;;  %v2544_v38 = vpack.c.bf16 %v2518_v47, %v2517_v16  ;;  %v1913_v16 = vld [vmem:[%s5952_s12 + $0xc4] sm:$0xff] }
 0x247   : > { %3110 = vst.msk [vmem:[#allocation2 + $0x120] sm:$0xff] %vm439_vm1, %v5886_v56  ;;  %v2483_v47 = vld [vmem:[%s5952_s12 + $0xc6] sm:$0xff] }
 0x248   : > { %5647 = vmatmul.msk.bf16.gmra.mxu2 %vm439_vm1, %v1973_v3  ;;  %5665 = vmatmul.msk.bf16.gmra.mxu3 %vm439_vm1, %v2256_v54  ;;  %v6738_v28 = vadd.f32 %v1567_v14, %v1322_v22  ;;  %3111 = vst.msk [vmem:[#allocation2 + $0x128] sm:$0xff] %vm439_vm1, %v5886_v56  ;;  %v2861_v3 = vpop.permute.xlu0 %2860 }
 0x249   : > { %3112 = vst.msk [vmem:[#allocation2 + $0x130] sm:$0xff] %vm439_vm1, %v5886_v56 }
 0x24a   : > { %7723 = vst [vmem:[#allocation11_spill] sm:$0xff] %v6738_v28 }
 0x24b   : > { %v2050_v51 = vpop.f32.mrf.mxu2  ;;  %v2337_v55 = vpop.f32.mrf.mxu3  ;;  %3113 = vst.msk [vmem:[#allocation2 + $0x138] sm:$0xff] %vm439_vm1, %v5886_v56 }
 0x24c   : > { %v2140_v14 = vadd.f32 %v2050_v51, %v6257_v32  ;;  %v2622_v49 = vpop.f32.mrf.mxu0  ;;  %v1947_v32 = vmax.f32 %v1911_v18, 0.0  ;;  %3114 = vst.msk [vmem:[#allocation2 + $0x140] sm:$0xff] %vm439_vm1, %v5886_v56 }
 0x24e   : > { %v2427_v25 = vadd.f32 %v2337_v55, %v2140_v14  ;;  %v1974_v18 = vpack.c.bf16 %v1948_v12, %v1947_v32 }
 0x250   : > { %v2710_v17 = vadd.f32 %v2620_v6, %v2427_v25  ;;  %v2257_v6 = vpack.c.bf16 %v2231_v9, %v2230_v7  ;;  %v2866_v12 = vpop.permute.xlu0 %2865  ;;  %v1914_v7 = vld [vmem:[%s5952_s12 + $0xcc] sm:$0xff] }
 0x251   : > { %v2196_v9 = vld [vmem:[%s5952_s12 + $0xc5] sm:$0xff] }
 0x252   : > { %v2750_v54 = vadd.f32 %v6762_v11, %v2710_v17  ;;  %v2484_v17 = vld [vmem:[%s5952_s12 + $0xce] sm:$0xff] }
 0x253   : > { %v2052_v48 = vpop.f32.mrf.mxu2  ;;  %v2339_v22 = vpop.f32.mrf.mxu3 }
 0x254   : > { %v2786_v51 = vmax.f32 %v2750_v54, 0.0  ;;  %v2141_v55 = vadd.f32 %v2052_v48, %v6264_v34  ;;  %v2625_v14 = vpop.f32.mrf.mxu0  ;;  %v1949_v48 = vmax.f32 %v1913_v16, 0.0 }
 0x256   : > { %v3038_v61 = vmul.f32 %v2861_v3, %v2786_v51  ;;  %v2428_v56 = vadd.f32 %v2339_v22, %v2141_v55  ;;  %5684 = vmatmul.msk.bf16.gmra.mxu0 %vm439_vm1, %v2544_v38  ;;  %v2197_v3 = vld [vmem:[%s5952_s12 + $0xcd] sm:$0xff]  ;;  %v2519_v22 = vmax.f32 %v2483_v47, 0.0  ;;  %v2520_v38 = vmax.f32 %v2484_v17, 0.0 }
 0x257   : > { %v1950_v55 = vmax.f32 %v1914_v7, 0.0 }
 0x258   : > { %3118 = vst.msk [vmem:[#allocation2 + $0x13] sm:$0xff] %vm439_vm1, %v3038_v61  ;;  %v2711_v8 = vadd.f32 %v2622_v49, %v2428_v56  ;;  %5648 = vmatmul.msk.bf16.gmra.mxu2 %vm439_vm1, %v1974_v18  ;;  %5666 = vmatmul.msk.bf16.gmra.mxu3 %vm439_vm1, %v2257_v6  ;;  %v2232_v18 = vmax.f32 %v2196_v9, 0.0  ;;  %v2233_v6 = vmax.f32 %v2197_v3, 0.0 }
 0x25a   : > { %v2751_v34 = vadd.f32 %v6762_v11, %v2711_v8 }
 0x25b   : > { %v2055_v13 = vpop.f32.mrf.mxu2  ;;  %v2342_v40 = vpop.f32.mrf.mxu3 }
 0x25c   : > { %v2787_v35 = vmax.f32 %v2751_v34, 0.0  ;;  %v2142_v25 = vadd.f32 %v2055_v13, %v6273_v20  ;;  %v2627_v32 = vpop.f32.mrf.mxu0  ;;  %v2871_v20 = vpop.permute.xlu1 %2870  ;;  %v2545_v34 = vpack.c.bf16 %v2520_v38, %v2519_v22  ;;  %v2485_v22 = vld [vmem:[%s5952_s12 + $0xd6] sm:$0xff] }
 0x25e   : > { %v3039_v49 = vmul.f32 %v2866_v12, %v2787_v35  ;;  %v2429_v54 = vadd.f32 %v2342_v40, %v2142_v25  ;;  %v1975_v40 = vpack.c.bf16 %v1950_v55, %v1949_v48  ;;  %v2258_v25 = vpack.c.bf16 %v2233_v6, %v2232_v18  ;;  %v1915_v48 = vld [vmem:[%s5952_s12 + $0xd4] sm:$0xff]  ;;  %v2199_v18 = vld [vmem:[%s5952_s12 + $0xdd] sm:$0xff] }
 0x25f   : > { %v2198_v55 = vld [vmem:[%s5952_s12 + $0xd5] sm:$0xff] }
 0x260   : > { %3119 = vst.msk [vmem:[#allocation2 + $0x1b] sm:$0xff] %vm439_vm1, %v3039_v49  ;;  %v2712_v51 = vadd.f32 %v2625_v14, %v2429_v54  ;;  %v3211_v14 = vld [vmem:[#allocation2 + $0x11] sm:$0xff] }
 0x262   : > { %v2752_v61 = vadd.f32 %v6762_v11, %v2712_v51  ;;  %v1916_v51 = vld [vmem:[%s5952_s12 + $0xdc] sm:$0xff] }
 0x263   : > { %v2057_v56 = vpop.f32.mrf.mxu2  ;;  %v2344_v8 = vpop.f32.mrf.mxu3 }
 0x264   : > { %v2788_v13 = vmax.f32 %v2752_v61, 0.0  ;;  %v2143_v28 = vadd.f32 %v2057_v56, %v6280_v0  ;;  %v2630_v35 = vpop.f32.mrf.mxu0  ;;  %v2876_v38 = vpop.permute.xlu1 %2875  ;;  %v1951_v61 = vmax.f32 %v1915_v48, 0.0  ;;  %v2521_v56 = vmax.f32 %v2485_v22, 0.0 }
 0x266   : > { %v3040_v16 = vmul.f32 %v2871_v20, %v2788_v13  ;;  %v2430_v47 = vadd.f32 %v2344_v8, %v2143_v28  ;;  %5685 = vmatmul.msk.bf16.gmra.mxu0 %vm439_vm1, %v2545_v34  ;;  %v1952_v13 = vmax.f32 %v1916_v51, 0.0 }
 0x267   : > { %v3212_v17 = vld [vmem:[#allocation2 + $0x19] sm:$0xff] }
 0x268   : > { %3120 = vst.msk [vmem:[#allocation2 + $0x23] sm:$0xff] %vm439_vm1, %v3040_v16  ;;  %v2713_v12 = vadd.f32 %v2627_v32, %v2430_v47  ;;  %5649 = vmatmul.msk.bf16.gmra.mxu2 %vm439_vm1, %v1975_v40  ;;  %5667 = vmatmul.msk.bf16.gmra.mxu3 %vm439_vm1, %v2258_v25  ;;  %v3246_v0 = vpack.c.bf16 %v3212_v17, %v3211_v14  ;;  %v2486_v32 = vld [vmem:[%s5952_s12 + $0xde] sm:$0xff]  ;;  %v2234_v40 = vmax.f32 %v2198_v55, 0.0  ;;  %v2235_v25 = vmax.f32 %v2199_v18, 0.0 }
 0x269   : > { %v2522_v8 = vmax.f32 %v2486_v32, 0.0 }
 0x26a   : > { %v2753_v28 = vadd.f32 %v6762_v11, %v2713_v12  ;;  %5694 = vmatmul.msk.bf16.gmra.mxu1 %vm439_vm1, %v3246_v0 }
 0x26b   : > { %v2060_v7 = vpop.f32.mrf.mxu2  ;;  %v2347_v9 = vpop.f32.mrf.mxu3  ;;  %v2546_v17 = vpack.c.bf16 %v2522_v8, %v2521_v56  ;;  %v1918_v8 = vld [vmem:[%s5952_s12 + $0xec] sm:$0xff] }
 0x26c   : > { %v2789_v3 = vmax.f32 %v2753_v28, 0.0  ;;  %v2144_v49 = vadd.f32 %v2060_v7, %v6289_v52  ;;  %v2632_v54 = vpop.f32.mrf.mxu0  ;;  %v2881_v52 = vpop.permute.xlu2 %2880  ;;  %v1976_v7 = vpack.c.bf16 %v1952_v13, %v1951_v61  ;;  %v2487_v61 = vld [vmem:[%s5952_s12 + $0xe6] sm:$0xff] }
 0x26d   : > { %v2201_v13 = vld [vmem:[%s5952_s12 + $0xed] sm:$0xff] }
 0x26e   : > { %v3041_v6 = vmul.f32 %v2876_v38, %v2789_v3  ;;  %v2431_v20 = vadd.f32 %v2347_v9, %v2144_v49  ;;  %v2259_v9 = vpack.c.bf16 %v2235_v25, %v2234_v40 }
 0x270   : > { %3121 = vst.msk [vmem:[#allocation2 + $0x2b] sm:$0xff] %vm439_vm1, %v3041_v6  ;;  %v2714_v34 = vadd.f32 %v2630_v35, %v2431_v20  ;;  %v3213_v35 = vld [vmem:[#allocation2 + $0x21] sm:$0xff] }
 0x271   : > { %v1917_v20 = vld [vmem:[%s5952_s12 + $0xe4] sm:$0xff] }
 0x272   : > { %v2754_v16 = vadd.f32 %v6762_v11, %v2714_v34  ;;  %v2200_v34 = vld [vmem:[%s5952_s12 + $0xe5] sm:$0xff] }
 0x273   : > { %v2062_v47 = vpop.f32.mrf.mxu2  ;;  %v2349_v14 = vpop.f32.mrf.mxu3 }
 0x274   : > { %v2790_v12 = vmax.f32 %v2754_v16, 0.0  ;;  %v2145_v0 = vadd.f32 %v2062_v47, %v6296_v29  ;;  %v2635_v28 = vpop.f32.mrf.mxu0  ;;  %v2886_v56 = vpop.permute.xlu2 %2885  ;;  %v2523_v16 = vmax.f32 %v2487_v61, 0.0 }
 0x276   : > { %v3042_v3 = vmul.f32 %v2881_v52, %v2790_v12  ;;  %v2432_v49 = vadd.f32 %v2349_v14, %v2145_v0  ;;  %5686 = vmatmul.msk.bf16.gmra.mxu0 %vm439_vm1, %v2546_v17  ;;  %v1953_v52 = vmax.f32 %v1917_v20, 0.0  ;;  %v1954_v17 = vmax.f32 %v1918_v8, 0.0 }
 0x277   : > { %v3214_v48 = vld [vmem:[#allocation2 + $0x29] sm:$0xff]  ;;  %v2236_v12 = vmax.f32 %v2200_v34, 0.0  ;;  %v2237_v0 = vmax.f32 %v2201_v13, 0.0  ;;  %v1919_v13 = vld [vmem:[%s5952_s12 + $0xf4] sm:$0xff] }
 0x278   : > { %3122 = vst.msk [vmem:[#allocation2 + $0x33] sm:$0xff] %vm439_vm1, %v3042_v3  ;;  %v2715_v22 = vadd.f32 %v2632_v54, %v2432_v49  ;;  %5650 = vmatmul.msk.bf16.gmra.mxu2 %vm439_vm1, %v1976_v7  ;;  %5668 = vmatmul.msk.bf16.gmra.mxu3 %vm439_vm1, %v2259_v9  ;;  %v3247_v29 = vpack.c.bf16 %v3214_v48, %v3213_v35  ;;  %v2488_v54 = vld [vmem:[%s5952_s12 + $0xee] sm:$0xff] }
 0x279   : > { %v2524_v47 = vmax.f32 %v2488_v54, 0.0 }
 0x27a   : > { %v2755_v32 = vadd.f32 %v6762_v11, %v2715_v22  ;;  %5695 = vmatmul.msk.bf16.gmra.mxu1 %vm439_vm1, %v3247_v29  ;;  %v1977_v22 = vpack.c.bf16 %v1954_v17, %v1953_v52  ;;  %v2260_v29 = vpack.c.bf16 %v2237_v0, %v2236_v12  ;;  %v1920_v52 = vld [vmem:[%s5952_s12 + $0xfc] sm:$0xff]  ;;  %v1955_v12 = vmax.f32 %v1919_v13, 0.0 }
 0x27b   : > { %v2065_v38 = vpop.f32.mrf.mxu2  ;;  %v2352_v51 = vpop.f32.mrf.mxu3  ;;  %v2547_v3 = vpack.c.bf16 %v2524_v47, %v2523_v16  ;;  %v2202_v16 = vld [vmem:[%s5952_s12 + $0xf5] sm:$0xff]  ;;  %v2203_v47 = vld [vmem:[%s5952_s12 + $0xfd] sm:$0xff] }
 0x27c   : > { %v2791_v55 = vmax.f32 %v2755_v32, 0.0  ;;  %v2146_v18 = vadd.f32 %v2065_v38, %v6305_v15  ;;  %v2637_v6 = vpop.f32.mrf.mxu0  ;;  %v2891_v32 = vpop.permute.xlu0 %2890 }
 0x27e   : > { %v3043_v40 = vmul.f32 %v2886_v56, %v2791_v55  ;;  %v2433_v25 = vadd.f32 %v2352_v51, %v2146_v18 }
 0x280   : > { %3123 = vst.msk [vmem:[#allocation2 + $0x3b] sm:$0xff] %vm439_vm1, %v3043_v40  ;;  %v2716_v14 = vadd.f32 %v2635_v28, %v2433_v25  ;;  %v3215_v28 = vld [vmem:[#allocation2 + $0x31] sm:$0xff]  ;;  %v2896_v25 = vpop.permute.xlu1 %2895 }
 0x281   : > { %v2489_v40 = vld [vmem:[%s5952_s12 + $0xf6] sm:$0xff] }
 0x282   : > { %v2756_v15 = vadd.f32 %v6762_v11, %v2716_v14  ;;  %v2525_v0 = vmax.f32 %v2489_v40, 0.0 }
 0x283   : > { %v2067_v7 = vpop.f32.mrf.mxu2  ;;  %v2354_v9 = vpop.f32.mrf.mxu3 }
 0x284   : > { %v2792_v49 = vmax.f32 %v2756_v15, 0.0  ;;  %v2147_v35 = vadd.f32 %v2067_v7, %v6312_v57  ;;  %v2640_v48 = vpop.f32.mrf.mxu0 }
 0x286   : > { %v3044_v38 = vmul.f32 %v2891_v32, %v2792_v49  ;;  %v2434_v51 = vadd.f32 %v2354_v9, %v2147_v35  ;;  %5687 = vmatmul.msk.bf16.gmra.mxu0 %vm439_vm1, %v2547_v3  ;;  %v1956_v9 = vmax.f32 %v1920_v52, 0.0  ;;  %v2238_v3 = vmax.f32 %v2202_v16, 0.0  ;;  %v1921_v52 = vld [vmem:[%s5952_s12 + $0x104] sm:$0xff] }
 0x287   : > { %v3216_v55 = vld [vmem:[#allocation2 + $0x39] sm:$0xff]  ;;  %v2239_v49 = vmax.f32 %v2203_v47, 0.0  ;;  %v2491_v16 = vld [vmem:[%s5952_s12 + $0x106] sm:$0xff]  ;;  %v2906_v47 = vpop.permute.xlu0 %2905 }
 0x288   : > { %3124 = vst.msk [vmem:[#allocation2 + $0x43] sm:$0xff] %vm439_vm1, %v3044_v38  ;;  %v2717_v18 = vadd.f32 %v2637_v6, %v2434_v51  ;;  %5651 = vmatmul.msk.bf16.gmra.mxu2 %vm439_vm1, %v1977_v22  ;;  %5669 = vmatmul.msk.bf16.gmra.mxu3 %vm439_vm1, %v2260_v29  ;;  %v3248_v57 = vpack.c.bf16 %v3216_v55, %v3215_v28  ;;  %v2490_v6 = vld [vmem:[%s5952_s12 + $0xfe] sm:$0xff] }
 0x289   : > { %v2526_v15 = vmax.f32 %v2490_v6, 0.0  ;;  %v1978_v28 = vpack.c.bf16 %v1956_v9, %v1955_v12  ;;  %v2261_v55 = vpack.c.bf16 %v2239_v49, %v2238_v3  ;;  %v2205_v12 = vld [vmem:[%s5952_s12 + $0x10d] sm:$0xff]  ;;  %v2527_v9 = vmax.f32 %v2491_v16, 0.0 }
 0x28a   : > { %v2757_v20 = vadd.f32 %v6762_v11, %v2717_v18  ;;  %5696 = vmatmul.msk.bf16.gmra.mxu1 %vm439_vm1, %v3248_v57  ;;  %v2901_v18 = vpop.permute.xlu2 %2900 }
 0x28b   : > { %v2070_v61 = vpop.f32.mrf.mxu2  ;;  %v2357_v54 = vpop.f32.mrf.mxu3  ;;  %v2548_v29 = vpack.c.bf16 %v2526_v15, %v2525_v0 }
 0x28c   : > { %v2793_v56 = vmax.f32 %v2757_v20, 0.0  ;;  %v2148_v8 = vadd.f32 %v2070_v61, %v6324_v4  ;;  %v2642_v34 = vpop.f32.mrf.mxu0 }
 0x28e   : > { %v3045_v14 = vmul.f32 %v2896_v25, %v2793_v56  ;;  %v2435_v17 = vadd.f32 %v2357_v54, %v2148_v8 }
 0x290   : > { %3125 = vst.msk [vmem:[#allocation2 + $0x4b] sm:$0xff] %vm439_vm1, %v3045_v14  ;;  %v2718_v7 = vadd.f32 %v2640_v48, %v2435_v17  ;;  %v3217_v48 = vld [vmem:[#allocation2 + $0x41] sm:$0xff]  ;;  %v1922_v14 = vld [vmem:[%s5952_s12 + $0x10c] sm:$0xff] }
 0x291   : > { %v2204_v17 = vld [vmem:[%s5952_s12 + $0x105] sm:$0xff] }
 0x292   : > { %v2758_v4 = vadd.f32 %v6762_v11, %v2718_v7  ;;  %v1957_v7 = vmax.f32 %v1921_v52, 0.0 }
 0x293   : > { %v2072_v35 = vpop.f32.mrf.mxu2  ;;  %v2359_v22 = vpop.f32.mrf.mxu3 }
 0x294   : > { %v2794_v32 = vmax.f32 %v2758_v4, 0.0  ;;  %v2149_v38 = vadd.f32 %v2072_v35, %v6334_v30  ;;  %v2645_v51 = vpop.f32.mrf.mxu0  ;;  %v1958_v4 = vmax.f32 %v1922_v14, 0.0  ;;  %v2240_v35 = vmax.f32 %v2204_v17, 0.0  ;;  %v2916_v14 = vpop.permute.xlu2 %2915  ;;  %v1924_v17 = vld [vmem:[%s5952_s12 + $0x11c] sm:$0xff] }
 0x296   : > { %v3046_v57 = vmul.f32 %v2901_v18, %v2794_v32  ;;  %v2436_v20 = vadd.f32 %v2359_v22, %v2149_v38  ;;  %5688 = vmatmul.msk.bf16.gmra.mxu0 %vm439_vm1, %v2548_v29  ;;  %v2241_v22 = vmax.f32 %v2205_v12, 0.0  ;;  %v2206_v12 = vld [vmem:[%s5952_s12 + $0x115] sm:$0xff] }
 0x297   : > { %v3218_v61 = vld [vmem:[#allocation2 + $0x49] sm:$0xff] }
 0x298   : > { %3126 = vst.msk [vmem:[#allocation2 + $0x53] sm:$0xff] %vm439_vm1, %v3046_v57  ;;  %v2719_v54 = vadd.f32 %v2642_v34, %v2436_v20  ;;  %5652 = vmatmul.msk.bf16.gmra.mxu2 %vm439_vm1, %v1978_v28  ;;  %5670 = vmatmul.msk.bf16.gmra.mxu3 %vm439_vm1, %v2261_v55  ;;  %v3249_v30 = vpack.c.bf16 %v3218_v61, %v3217_v48  ;;  %v2492_v34 = vld [vmem:[%s5952_s12 + $0x10e] sm:$0xff]  ;;  %v2911_v48 = vpop.permute.xlu1 %2910 }
 0x299   : > { %v2528_v3 = vmax.f32 %v2492_v34, 0.0  ;;  %v1979_v57 = vpack.c.bf16 %v1958_v4, %v1957_v7  ;;  %v2262_v20 = vpack.c.bf16 %v2241_v22, %v2240_v35  ;;  %v1923_v34 = vld [vmem:[%s5952_s12 + $0x114] sm:$0xff]  ;;  %v1960_v35 = vmax.f32 %v1924_v17, 0.0  ;;  %v2208_v17 = vld [vmem:[%s5952_s12 + $0x125] sm:$0xff] }
 0x29a   : > { %v2759_v56 = vadd.f32 %v6762_v11, %v2719_v54  ;;  %5697 = vmatmul.msk.bf16.gmra.mxu1 %vm439_vm1, %v3249_v30  ;;  %v2242_v22 = vmax.f32 %v2206_v12, 0.0  ;;  %v2209_v12 = vld [vmem:[%s5952_s12 + $0x12d] sm:$0xff] }
 0x29b   : > { %v2075_v8 = vpop.f32.mrf.mxu2  ;;  %v2362_v13 = vpop.f32.mrf.mxu3  ;;  %v2549_v38 = vpack.c.bf16 %v2528_v3, %v2527_v9  ;;  %v1959_v9 = vmax.f32 %v1923_v34, 0.0  ;;  %v1925_v34 = vld [vmem:[%s5952_s12 + $0x124] sm:$0xff] }
 0x29c   : > { %v2795_v40 = vmax.f32 %v2759_v56, 0.0  ;;  %v2150_v6 = vadd.f32 %v2075_v8, %v6349_v60  ;;  %v2647_v25 = vpop.f32.mrf.mxu0 }
 0x29e   : > { %v3047_v0 = vmul.f32 %v2906_v47, %v2795_v40  ;;  %v2437_v15 = vadd.f32 %v2362_v13, %v2150_v6  ;;  %v2493_v47 = vld [vmem:[%s5952_s12 + $0x116] sm:$0xff] }
 0x29f   : > { %v2529_v3 = vmax.f32 %v2493_v47, 0.0  ;;  %v2495_v47 = vld [vmem:[%s5952_s12 + $0x126] sm:$0xff] }
 0x2a0   : > { %3127 = vst.msk [vmem:[#allocation2 + $0x5b] sm:$0xff] %vm439_vm1, %v3047_v0  ;;  %v2720_v49 = vadd.f32 %v2645_v51, %v2437_v15  ;;  %v3219_v51 = vld [vmem:[#allocation2 + $0x51] sm:$0xff]  ;;  %v2207_v0 = vld [vmem:[%s5952_s12 + $0x11d] sm:$0xff] }
 0x2a2   : > { %v2760_v60 = vadd.f32 %v6762_v11, %v2720_v49 }
 0x2a3   : > { %v2077_v29 = vpop.f32.mrf.mxu2  ;;  %v2364_v32 = vpop.f32.mrf.mxu3 }
 0x2a4   : > { %v2796_v28 = vmax.f32 %v2760_v60, 0.0  ;;  %v2151_v55 = vadd.f32 %v2077_v29, %v6362_v2  ;;  %v2650_v18 = vpop.f32.mrf.mxu0  ;;  %v2243_v60 = vmax.f32 %v2207_v0, 0.0 }
 0x2a6   : > { %v3048_v61 = vmul.f32 %v2911_v48, %v2796_v28  ;;  %v2438_v54 = vadd.f32 %v2364_v32, %v2151_v55  ;;  %5689 = vmatmul.msk.bf16.gmra.mxu0 %vm439_vm1, %v2549_v38  ;;  %v1980_v48 = vpack.c.bf16 %v1960_v35, %v1959_v9  ;;  %v2531_v9 = vmax.f32 %v2495_v47, 0.0  ;;  %v1928_v47 = vld [vmem:[%s5952_s12 + $0x13c] sm:$0xff] }
 0x2a7   : > { %v3220_v30 = vld [vmem:[#allocation2 + $0x59] sm:$0xff]  ;;  %v2244_v35 = vmax.f32 %v2208_v17, 0.0 }
 0x2a8   : > { %3128 = vst.msk [vmem:[#allocation2 + $0x63] sm:$0xff] %vm439_vm1, %v3048_v61  ;;  %v2721_v56 = vadd.f32 %v2647_v25, %v2438_v54  ;;  %5653 = vmatmul.msk.bf16.gmra.mxu2 %vm439_vm1, %v1979_v57  ;;  %5671 = vmatmul.msk.bf16.gmra.mxu3 %vm439_vm1, %v2262_v20  ;;  %v3250_v2 = vpack.c.bf16 %v3220_v30, %v3219_v51  ;;  %v2494_v25 = vld [vmem:[%s5952_s12 + $0x11e] sm:$0xff]  ;;  %v2921_v54 = vpop.permute.xlu0 %2920 }
 0x2a9   : > { %v2530_v49 = vmax.f32 %v2494_v25, 0.0  ;;  %v2263_v61 = vpack.c.bf16 %v2243_v60, %v2242_v22  ;;  %v2926_v25 = vpop.permute.xlu1 %2925  ;;  %v2245_v22 = vmax.f32 %v2209_v12, 0.0 }
 0x2aa   : > { %v2761_v8 = vadd.f32 %v6762_v11, %v2721_v56  ;;  %5698 = vmatmul.msk.bf16.gmra.mxu1 %vm439_vm1, %v3250_v2 }
 0x2ab   : > { %v2080_v13 = vpop.f32.mrf.mxu2  ;;  %v2367_v40 = vpop.f32.mrf.mxu3  ;;  %v2550_v28 = vpack.c.bf16 %v2530_v49, %v2529_v3 }
 0x2ac   : > { %v2797_v6 = vmax.f32 %v2761_v8, 0.0  ;;  %v2152_v52 = vadd.f32 %v2080_v13, %v6379_v44  ;;  %v2652_v16 = vpop.f32.mrf.mxu0  ;;  %v1870_v44 = vadd.f32 %v6375_v58, %v6391_v27 }
 0x2ae   : > { %v3049_v15 = vmul.f32 %v2916_v14, %v2797_v6  ;;  %v2439_v7 = vadd.f32 %v2367_v40, %v2152_v52  ;;  %v1926_v14 = vld [vmem:[%s5952_s12 + $0x12c] sm:$0xff] }
 0x2b0   : > { %3129 = vst.msk [vmem:[#allocation2 + $0x6b] sm:$0xff] %vm439_vm1, %v3049_v15  ;;  %v2722_v4 = vadd.f32 %v2650_v18, %v2439_v7  ;;  %v3221_v18 = vld [vmem:[#allocation2 + $0x61] sm:$0xff]  ;;  %v1961_v7 = vmax.f32 %v1925_v34, 0.0  ;;  %v6895_v34 = vpop.f32.mrf.mxu1 }
 0x2b2   : > { %v2762_v29 = vadd.f32 %v6762_v11, %v2722_v4  ;;  %v1962_v4 = vmax.f32 %v1926_v14, 0.0 }
 0x2b3   : > { %v2082_v32 = vpop.f32.mrf.mxu2  ;;  %v2369_v38 = vpop.f32.mrf.mxu3 }
 0x2b4   : > { %v2798_v55 = vmax.f32 %v2762_v29, 0.0  ;;  %v2153_v57 = vadd.f32 %v2082_v32, %v1870_v44  ;;  %v2655_v20 = vpop.f32.mrf.mxu0 }
 0x2b6   : > { %v3050_v51 = vmul.f32 %v2921_v54, %v2798_v55  ;;  %v2440_v30 = vadd.f32 %v2369_v38, %v2153_v57  ;;  %5690 = vmatmul.msk.bf16.gmra.mxu0 %vm439_vm1, %v2550_v28  ;;  %v1981_v57 = vpack.c.bf16 %v1962_v4, %v1961_v7 }
 0x2b7   : > { %v3222_v58 = vld [vmem:[#allocation2 + $0x69] sm:$0xff] }
 0x2b8   : > { %3130 = vst.msk [vmem:[#allocation2 + $0x73] sm:$0xff] %vm439_vm1, %v3050_v51  ;;  %v2723_v27 = vadd.f32 %v2652_v16, %v2440_v30  ;;  %5654 = vmatmul.msk.bf16.gmra.mxu2 %vm439_vm1, %v1980_v48  ;;  %5672 = vmatmul.msk.bf16.gmra.mxu3 %vm439_vm1, %v2263_v61  ;;  %v3251_v56 = vpack.c.bf16 %v3222_v58, %v3221_v18  ;;  %v2496_v16 = vld [vmem:[%s5952_s12 + $0x12e] sm:$0xff]  ;;  %v2931_v61 = vpop.permute.xlu2 %2930 }
 0x2b9   : > { %v2532_v3 = vmax.f32 %v2496_v16, 0.0  ;;  %v2264_v48 = vpack.c.bf16 %v2245_v22, %v2244_v35  ;;  %v2210_v16 = vld [vmem:[%s5952_s12 + $0x135] sm:$0xff] }
 0x2ba   : > { %v2763_v2 = vadd.f32 %v6762_v11, %v2723_v27  ;;  %5699 = vmatmul.msk.bf16.gmra.mxu1 %vm439_vm1, %v3251_v56 }
 0x2bb   : > { %v2085_v8 = vpop.f32.mrf.mxu2  ;;  %v2372_v13 = vpop.f32.mrf.mxu3  ;;  %v2551_v32 = vpack.c.bf16 %v2532_v3, %v2531_v9  ;;  %v1964_v9 = vmax.f32 %v1928_v47, 0.0  ;;  %v1876_v47 = vadd.f32 %v6479_v26, %v6496_v36 }
 0x2bc   : > { %v2799_v40 = vmax.f32 %v2763_v2, 0.0  ;;  %v2154_v6 = vadd.f32 %v2085_v8, %v6409_v21  ;;  %v2657_v52 = vpop.f32.mrf.mxu0  ;;  %v1872_v21 = vadd.f32 %v6405_v50, %v6424_v62 }
 0x2be   : > { %v3051_v0 = vmul.f32 %v2926_v25, %v2799_v40  ;;  %v2441_v15 = vadd.f32 %v2372_v13, %v2154_v6  ;;  %v1927_v13 = vld [vmem:[%s5952_s12 + $0x134] sm:$0xff]  ;;  %v2498_v6 = vld [vmem:[%s5952_s12 + $0x13e] sm:$0xff] }
 0x2bf   : > { %v2497_v40 = vld [vmem:[%s5952_s12 + $0x136] sm:$0xff]  ;;  %v1963_v12 = vmax.f32 %v1927_v13, 0.0  ;;  %v3154_v13 = vld [vmem:[#allocation2] sm:$0xff] }
 0x2c0   : > { %3131 = vst.msk [vmem:[#allocation2 + $0x7b] sm:$0xff] %vm439_vm1, %v3051_v0  ;;  %v2724_v49 = vadd.f32 %v2655_v20, %v2441_v15  ;;  %v3223_v20 = vld [vmem:[#allocation2 + $0x71] sm:$0xff]  ;;  %v2211_v25 = vld [vmem:[%s5952_s12 + $0x13d] sm:$0xff]  ;;  %v2533_v0 = vmax.f32 %v2497_v40, 0.0  ;;  %v2534_v15 = vmax.f32 %v2498_v6, 0.0  ;;  %v3155_v40 = vld [vmem:[#allocation2 + $0x8] sm:$0xff] }
 0x2c1   : > { %v2247_v3 = vmax.f32 %v2211_v25, 0.0  ;;  %v3580_v6 = vld [vmem:[#allocation2 + $0x2] sm:$0xff]  ;;  %v3828_v25 = vld [vmem:[#allocation2 + $0x1a] sm:$0xff] }
 0x2c2   : > { %v2764_v60 = vadd.f32 %v6762_v11, %v2724_v49  ;;  %v1874_v49 = vadd.f32 %v6441_v5, %v6460_v37 }
 0x2c3   : > { %v2087_v44 = vpop.f32.mrf.mxu2  ;;  %v2374_v29 = vpop.f32.mrf.mxu3 }
 0x2c4   : > { %v2800_v38 = vmax.f32 %v2764_v60, 0.0  ;;  %v2155_v28 = vadd.f32 %v2087_v44, %v1872_v21  ;;  %v2660_v55 = vpop.f32.mrf.mxu0  ;;  %v2552_v21 = vpack.c.bf16 %v2534_v15, %v2533_v0  ;;  %v3190_v15 = vpack.c.bf16 %v3155_v40, %v3154_v13  ;;  %v3156_v13 = vld [vmem:[#allocation2 + $0x10] sm:$0xff] }
 0x2c6   : > { %v3052_v54 = vmul.f32 %v2931_v61, %v2800_v38  ;;  %v2442_v51 = vadd.f32 %v2374_v29, %v2155_v28  ;;  %5691 = vmatmul.msk.bf16.gmra.mxu0 %vm439_vm1, %v2551_v32  ;;  %v1982_v32 = vpack.c.bf16 %v1964_v9, %v1963_v12  ;;  %v2941_v28 = vpop.permute.xlu1 %2940  ;;  %v3827_v9 = vld [vmem:[#allocation2 + $0x12] sm:$0xff] }
 0x2c7   : > { %v3224_v50 = vld [vmem:[#allocation2 + $0x79] sm:$0xff] }
 0x2c8   : > { %3132 = vst.msk [vmem:[#allocation2 + $0x83] sm:$0xff] %vm439_vm1, %v3052_v54  ;;  %v2725_v62 = vadd.f32 %v2657_v52, %v2442_v51  ;;  %5655 = vmatmul.msk.bf16.gmra.mxu2 %vm439_vm1, %v1981_v57  ;;  %5673 = vmatmul.msk.bf16.gmra.mxu3 %vm439_vm1, %v2264_v48  ;;  %v3252_v30 = vpack.c.bf16 %v3224_v50, %v3223_v20  ;;  %v2936_v52 = vpop.permute.xlu0 %2935  ;;  %v6904_v57 = vpop.f32.mrf.mxu1 }
 0x2ca   : > { %v2765_v18 = vadd.f32 %v6762_v11, %v2725_v62  ;;  %5700 = vmatmul.msk.bf16.gmra.mxu1 %vm439_vm1, %v3252_v30 }
 0x2cb   : > { %v2090_v58 = vpop.f32.mrf.mxu2  ;;  %v2377_v27 = vpop.f32.mrf.mxu3 }
 0x2cc   : > { %v2801_v56 = vmax.f32 %v2765_v18, 0.0  ;;  %v2156_v2 = vadd.f32 %v2090_v58, %v6445_v45  ;;  %v2662_v8 = vpop.f32.mrf.mxu0  ;;  %v2246_v45 = vmax.f32 %v2210_v16, 0.0  ;;  %v2946_v58 = vpop.permute.xlu2 %2945 }
 0x2ce   : > { %v3053_v14 = vmul.f32 %v2936_v52, %v2801_v56  ;;  %v2443_v17 = vadd.f32 %v2377_v27, %v2156_v2  ;;  %v2265_v38 = vpack.c.bf16 %v2247_v3, %v2246_v45  ;;  %v3581_v52 = vld [vmem:[#allocation2 + $0xa] sm:$0xff]  ;;  %v3863_v3 = vpack.c.bf16 %v3828_v25, %v3827_v9 }
 0x2cf   : > { %v3225_v61 = vld [vmem:[#allocation2 + $0x81] sm:$0xff] }
 0x2d0   : > { %3133 = vst.msk [vmem:[#allocation2 + $0x8b] sm:$0xff] %vm439_vm1, %v3053_v14  ;;  %v2726_v7 = vadd.f32 %v2660_v55, %v2443_v17  ;;  %v6913_v2 = vpop.f32.mrf.mxu1  ;;  %v2951_v45 = vpop.permute.xlu0 %2950 }
 0x2d2   : > { %v2766_v4 = vadd.f32 %v6762_v11, %v2726_v7  ;;  %v3616_v7 = vpack.c.bf16 %v3581_v52, %v3580_v6 }
 0x2d3   : > { %v2092_v35 = vpop.f32.mrf.mxu2  ;;  %v2379_v22 = vpop.f32.mrf.mxu3 }
 0x2d4   : > { %v2802_v60 = vmax.f32 %v2766_v4, 0.0  ;;  %v2157_v44 = vadd.f32 %v2092_v35, %v1874_v49  ;;  %v2665_v29 = vpop.f32.mrf.mxu0 }
 0x2d6   : > { %v3054_v55 = vmul.f32 %v2941_v28, %v2802_v60  ;;  %v2444_v48 = vadd.f32 %v2379_v22, %v2157_v44  ;;  %5692 = vmatmul.msk.bf16.gmra.mxu0 %vm439_vm1, %v2552_v21 }
 0x2d7   : > { %v3226_v54 = vld [vmem:[#allocation2 + $0x89] sm:$0xff] }
 0x2d8   : > { %3134 = vst.msk [vmem:[#allocation2 + $0x93] sm:$0xff] %vm439_vm1, %v3054_v55  ;;  %v2727_v5 = vadd.f32 %v2662_v8, %v2444_v48  ;;  %5656 = vmatmul.msk.bf16.gmra.mxu2 %vm439_vm1, %v1982_v32  ;;  %5674 = vmatmul.msk.bf16.gmra.mxu3 %vm439_vm1, %v2265_v38  ;;  %v3253_v37 = vpack.c.bf16 %v3226_v54, %v3225_v61  ;;  %v2956_v55 = vpop.permute.xlu1 %2955 }
 0x2da   : > { %v2767_v51 = vadd.f32 %v6762_v11, %v2727_v5  ;;  %5701 = vmatmul.msk.bf16.gmra.mxu1 %vm439_vm1, %v3253_v37  ;;  %v7724_v37 = vld [vmem:[#allocation3_spill] sm:$0xff] }
 0x2db   : > { %v2095_v20 = vpop.f32.mrf.mxu2  ;;  %v2382_v50 = vpop.f32.mrf.mxu3 }
 0x2dc   : > { %v2803_v62 = vmax.f32 %v2767_v51, 0.0  ;;  %v2158_v30 = vadd.f32 %v2095_v20, %v6481_v63  ;;  %v2667_v18 = vpop.f32.mrf.mxu0  ;;  %v1878_v51 = vadd.f32 %v7724_v37, %v6525_v43 }
 0x2de   : > { %v3055_v27 = vmul.f32 %v2946_v58, %v2803_v62  ;;  %v2445_v56 = vadd.f32 %v2382_v50, %v2158_v30  ;;  %v3830_v50 = vld [vmem:[#allocation2 + $0x2a] sm:$0xff] }
 0x2df   : > { %v3227_v26 = vld [vmem:[#allocation2 + $0x91] sm:$0xff] }
 0x2e0   : > { %3135 = vst.msk [vmem:[#allocation2 + $0x9b] sm:$0xff] %vm439_vm1, %v3055_v27  ;;  %v2728_v8 = vadd.f32 %v2665_v29, %v2445_v56  ;;  %v3829_v56 = vld [vmem:[#allocation2 + $0x22] sm:$0xff] }
 0x2e1   : > { %v3864_v40 = vpack.c.bf16 %v3830_v50, %v3829_v56 }
 0x2e2   : > { %v2768_v16 = vadd.f32 %v6762_v11, %v2728_v8  ;;  %v2961_v8 = vpop.permute.xlu2 %2960 }
 0x2e3   : > { %v2097_v63 = vpop.f32.mrf.mxu2  ;;  %v2384_v14 = vpop.f32.mrf.mxu3 }
 0x2e4   : > { %v2804_v17 = vmax.f32 %v2768_v16, 0.0  ;;  %v2159_v12 = vadd.f32 %v2097_v63, %v1876_v47  ;;  %v2670_v0 = vpop.f32.mrf.mxu0 }
 0x2e6   : > { %v3056_v49 = vmul.f32 %v2951_v45, %v2804_v17  ;;  %v2446_v4 = vadd.f32 %v2384_v14, %v2159_v12  ;;  %5747 = vmatmul.msk.bf16.vlgmr.msrb.gmra.mxu0 %vm439_vm1, %v3863_v3  ;;  %v2966_v45 = vpop.permute.xlu0 %2965 }
 0x2e7   : > { %v6919_v35 = vpop.f32.mrf.mxu1  ;;  %v3228_v36 = vld [vmem:[#allocation2 + $0x99] sm:$0xff] }
 0x2e8   : > { %3136 = vst.msk [vmem:[#allocation2 + $0xa3] sm:$0xff] %vm439_vm1, %v3056_v49  ;;  %v2729_v22 = vadd.f32 %v2667_v18, %v2446_v4  ;;  %5711 = vmatmul.msk.bf16.vlgmr.msrb.gmra.mxu2 %vm439_vm1, %v3190_v15  ;;  %5729 = vmatmul.msk.bf16.vlgmr.msrb.gmra.mxu3 %vm439_vm1, %v3616_v7  ;;  %v3254_v21 = vpack.c.bf16 %v3228_v36, %v3227_v26  ;;  %v3157_v18 = vld [vmem:[#allocation2 + $0x18] sm:$0xff] }
 0x2e9   : > { %v3191_v47 = vpack.c.bf16 %v3157_v18, %v3156_v13 }
 0x2ea   : > { %v2769_v60 = vadd.f32 %v6762_v11, %v2729_v22  ;;  %5702 = vmatmul.msk.bf16.gmra.mxu1 %vm439_vm1, %v3254_v21 }
 0x2eb   : > { %v2100_v44 = vpop.f32.mrf.mxu2  ;;  %v2387_v29 = vpop.f32.mrf.mxu3 }
 0x2ec   : > { %v2805_v32 = vmax.f32 %v2769_v60, 0.0  ;;  %v2160_v38 = vadd.f32 %v2100_v44, %v6513_v41  ;;  %v2672_v28 = vpop.f32.mrf.mxu0  ;;  %v3832_v60 = vld [vmem:[#allocation2 + $0x3a] sm:$0xff] }
 0x2ee   : > { %v3057_v48 = vmul.f32 %v2956_v55, %v2805_v32  ;;  %v2447_v61 = vadd.f32 %v2387_v29, %v2160_v38  ;;  %v3159_v32 = vld [vmem:[#allocation2 + $0x28] sm:$0xff]  ;;  %v3831_v55 = vld [vmem:[#allocation2 + $0x32] sm:$0xff] }
 0x2ef   : > { %v6928_v54 = vpop.f32.mrf.mxu1  ;;  %v3229_v43 = vld [vmem:[#allocation2 + $0xa1] sm:$0xff] }
 0x2f0   : > { %3137 = vst.msk [vmem:[#allocation2 + $0xab] sm:$0xff] %vm439_vm1, %v3057_v48  ;;  %v2730_v5 = vadd.f32 %v2670_v0, %v2447_v61  ;;  %v2971_v48 = vpop.permute.xlu1 %2970  ;;  %v3158_v61 = vld [vmem:[#allocation2 + $0x20] sm:$0xff] }
 0x2f2   : > { %v2770_v20 = vadd.f32 %v6762_v11, %v2730_v5  ;;  %v3865_v5 = vpack.c.bf16 %v3832_v60, %v3831_v55 }
 0x2f3   : > { %v2102_v62 = vpop.f32.mrf.mxu2  ;;  %v2389_v30 = vpop.f32.mrf.mxu3 }
 0x2f4   : > { %v2806_v58 = vmax.f32 %v2770_v20, 0.0  ;;  %v2161_v41 = vadd.f32 %v2102_v62, %v1878_v51  ;;  %v2675_v27 = vpop.f32.mrf.mxu0  ;;  %v3192_v20 = vpack.c.bf16 %v3159_v32, %v3158_v61 }
 0x2f6   : > { %v3058_v6 = vmul.f32 %v2961_v8, %v2806_v58  ;;  %v2448_v52 = vadd.f32 %v2389_v30, %v2161_v41  ;;  %5748 = vmatmul.msk.bf16.gmra.mxu0 %vm439_vm1, %v3864_v40 }
 0x2f7   : > { %v6934_v16 = vpop.f32.mrf.mxu1  ;;  %v3230_v25 = vld [vmem:[#allocation2 + $0xa9] sm:$0xff] }
 0x2f8   : > { %3138 = vst.msk [vmem:[#allocation2 + $0xb3] sm:$0xff] %vm439_vm1, %v3058_v6  ;;  %v2731_v63 = vadd.f32 %v2672_v28, %v2448_v52  ;;  %5712 = vmatmul.msk.bf16.gmra.mxu2 %vm439_vm1, %v3191_v47  ;;  %5730 = vmatmul.msk.bf16.gmra.mxu3 %vm439_vm1, %v3863_v3  ;;  %v3255_v14 = vpack.c.bf16 %v3230_v25, %v3229_v43  ;;  %v7725_v3 = vld [vmem:[#allocation4_spill] sm:$0xff]  ;;  %v2976_v6 = vpop.permute.xlu2 %2975 }
 0x2f9   : > { %v1880_v22 = vadd.f32 %v7725_v3, %v6548_v24 }
 0x2fa   : > { %v2771_v17 = vadd.f32 %v6762_v11, %v2731_v63  ;;  %5703 = vmatmul.msk.bf16.gmra.mxu1 %vm439_vm1, %v3255_v14 }
 0x2fb   : > { %v2105_v12 = vpop.f32.mrf.mxu2  ;;  %v2392_v0 = vpop.f32.mrf.mxu3 }
 0x2fc   : > { %v2807_v15 = vmax.f32 %v2771_v17, 0.0  ;;  %v2162_v7 = vadd.f32 %v2105_v12, %v6539_v1  ;;  %v2677_v9 = vpop.f32.mrf.mxu0 }
 0x2fe   : > { %v3059_v49 = vmul.f32 %v2966_v45, %v2807_v15  ;;  %v2449_v4 = vadd.f32 %v2392_v0, %v2162_v7  ;;  %v3161_v0 = vld [vmem:[#allocation2 + $0x38] sm:$0xff]  ;;  %v3833_v45 = vld [vmem:[#allocation2 + $0x42] sm:$0xff] }
 0x2ff   : > { %v6943_v26 = vpop.f32.mrf.mxu1  ;;  %v3231_v24 = vld [vmem:[#allocation2 + $0xb1] sm:$0xff] }
 0x300   : > { %3139 = vst.msk [vmem:[#allocation2 + $0xbb] sm:$0xff] %vm439_vm1, %v3059_v49  ;;  %v2732_v36 = vadd.f32 %v2675_v27, %v2449_v4  ;;  %v2981_v49 = vpop.permute.xlu0 %2980  ;;  %v3160_v4 = vld [vmem:[#allocation2 + $0x30] sm:$0xff] }
 0x302   : > { %v2772_v21 = vadd.f32 %v6762_v11, %v2732_v36 }
 0x303   : > { %v2107_v44 = vpop.f32.mrf.mxu2  ;;  %v2394_v29 = vpop.f32.mrf.mxu3 }
 0x304   : > { %v2808_v38 = vmax.f32 %v2772_v21, 0.0  ;;  %v2163_v1 = vadd.f32 %v2107_v44, %v1880_v22  ;;  %v2680_v28 = vpop.f32.mrf.mxu0  ;;  %v3193_v22 = vpack.c.bf16 %v3161_v0, %v3160_v4 }
 0x306   : > { %v3060_v37 = vmul.f32 %v2971_v48, %v2808_v38  ;;  %v2450_v51 = vadd.f32 %v2394_v29, %v2163_v1  ;;  %5749 = vmatmul.msk.bf16.gmra.mxu0 %vm439_vm1, %v3865_v5 }
 0x307   : > { %v6949_v50 = vpop.f32.mrf.mxu1  ;;  %v3232_v62 = vld [vmem:[#allocation2 + $0xb9] sm:$0xff] }
 0x308   : > { %3140 = vst.msk [vmem:[#allocation2 + $0xc3] sm:$0xff] %vm439_vm1, %v3060_v37  ;;  %v2733_v30 = vadd.f32 %v2677_v9, %v2450_v51  ;;  %5713 = vmatmul.msk.bf16.gmra.mxu2 %vm439_vm1, %v3192_v20  ;;  %5731 = vmatmul.msk.bf16.gmra.mxu3 %vm439_vm1, %v3864_v40  ;;  %v3256_v18 = vpack.c.bf16 %v3232_v62, %v3231_v24  ;;  %v7726_v40 = vld [vmem:[#allocation5_spill] sm:$0xff]  ;;  %v2986_v37 = vpop.permute.xlu1 %2985 }
 0x309   : > { %v1882_v63 = vadd.f32 %v7726_v40, %v6571_v31 }
 0x30a   : > { %v2773_v58 = vadd.f32 %v6762_v11, %v2733_v30  ;;  %5704 = vmatmul.msk.bf16.gmra.mxu1 %vm439_vm1, %v3256_v18  ;;  %v6966_v11 = vld [vmem:[%s7710_s2] ss:$0 sm:$0xff]  ;;  %v7728_v30 = vld [vmem:[#allocation6_spill] sm:$0xff] }
 0x30b   : > { %v2110_v41 = vpop.f32.mrf.mxu2  ;;  %v2397_v27 = vpop.f32.mrf.mxu3 }
 0x30c   : > { %v2809_v56 = vmax.f32 %v2773_v58, 0.0  ;;  %v2164_v8 = vadd.f32 %v2110_v41, %v6562_v33  ;;  %v2682_v13 = vpop.f32.mrf.mxu0  ;;  %v3834_v33 = vld [vmem:[#allocation2 + $0x4a] sm:$0xff]  ;;  %v3836_v41 = vld [vmem:[#allocation2 + $0x5a] sm:$0xff] }
 0x30d   : > { %v3866_v36 = vpack.c.bf16 %v3834_v33, %v3833_v45 }
 0x30e   : > { %v3061_v52 = vmul.f32 %v2976_v6, %v2809_v56  ;;  %v2451_v47 = vadd.f32 %v2397_v27, %v2164_v8  ;;  %v3163_v8 = vld [vmem:[#allocation2 + $0x48] sm:$0xff] }
 0x30f   : > { %v6958_v43 = vpop.f32.mrf.mxu1  ;;  %v3233_v60 = vld [vmem:[#allocation2 + $0xc1] sm:$0xff] }
 0x310   : > { %3141 = vst.msk [vmem:[#allocation2 + $0xcb] sm:$0xff] %vm439_vm1, %v3061_v52  ;;  %v2734_v25 = vadd.f32 %v2680_v28, %v2451_v47  ;;  %v3835_v52 = vld [vmem:[#allocation2 + $0x52] sm:$0xff]  ;;  %v2991_v47 = vpop.permute.xlu2 %2990 }
 0x311   : > { %v3867_v40 = vpack.c.bf16 %v3836_v41, %v3835_v52 }
 0x312   : > { %v2774_v14 = vadd.f32 %v6966_v11, %v2734_v25  ;;  %v3162_v25 = vld [vmem:[#allocation2 + $0x40] sm:$0xff] }
 0x313   : > { %v2112_v17 = vpop.f32.mrf.mxu2  ;;  %v2399_v12 = vpop.f32.mrf.mxu3  ;;  %v3194_v33 = vpack.c.bf16 %v3163_v8, %v3162_v25 }
 0x314   : > { %v2810_v15 = vmax.f32 %v2774_v14, 0.0  ;;  %v2165_v7 = vadd.f32 %v2112_v17, %v1882_v63  ;;  %v2685_v9 = vpop.f32.mrf.mxu0 }
 0x316   : > { %v3062_v3 = vmul.f32 %v2981_v49, %v2810_v15  ;;  %v2452_v31 = vadd.f32 %v2399_v12, %v2165_v7  ;;  %5750 = vmatmul.msk.bf16.gmra.mxu0 %vm439_vm1, %v3866_v36 }
 0x317   : > { %v6969_v21 = vpop.f32.mrf.mxu1  ;;  %v3234_v44 = vld [vmem:[#allocation2 + $0xc9] sm:$0xff] }
 0x318   : > { %3142 = vst.msk [vmem:[#allocation2 + $0xd3] sm:$0xff] %vm439_vm1, %v3062_v3  ;;  %v2735_v29 = vadd.f32 %v2682_v13, %v2452_v31  ;;  %5714 = vmatmul.msk.bf16.gmra.mxu2 %vm439_vm1, %v3193_v22  ;;  %5732 = vmatmul.msk.bf16.gmra.mxu3 %vm439_vm1, %v3865_v5  ;;  %v3257_v32 = vpack.c.bf16 %v3234_v44, %v3233_v60  ;;  %v7727_v5 = vld [vmem:[#allocation7_spill] sm:$0xff]  ;;  %v7729_v3 = vld [vmem:[#allocation9_spill] sm:$0xff]  ;;  %v2996_v60 = vpop.permute.xlu0 %2995 }
 0x319   : > { %v1884_v18 = vadd.f32 %v7728_v30, %v7727_v5  ;;  %v3837_v30 = vld [vmem:[#allocation2 + $0x62] sm:$0xff] }
 0x31a   : > { %v2775_v38 = vadd.f32 %v6966_v11, %v2735_v29  ;;  %5705 = vmatmul.msk.bf16.gmra.mxu1 %vm439_vm1, %v3257_v32 }
 0x31b   : > { %v2115_v1 = vpop.f32.mrf.mxu2  ;;  %v2402_v28 = vpop.f32.mrf.mxu3 }
 0x31c   : > { %v2811_v55 = vmax.f32 %v2775_v38, 0.0  ;;  %v2166_v48 = vadd.f32 %v2115_v1, %v6585_v53  ;;  %v2687_v61 = vpop.f32.mrf.mxu0  ;;  %v7731_v1 = vld [vmem:[#allocation8_spill] sm:$0xff] }
 0x31e   : > { %v3063_v51 = vmul.f32 %v2986_v37, %v2811_v55  ;;  %v2453_v20 = vadd.f32 %v2402_v28, %v2166_v48  ;;  %v3838_v48 = vld [vmem:[#allocation2 + $0x6a] sm:$0xff] }
 0x31f   : > { %v6978_v24 = vpop.f32.mrf.mxu1  ;;  %v3235_v12 = vld [vmem:[#allocation2 + $0xd1] sm:$0xff]  ;;  %v3868_v41 = vpack.c.bf16 %v3838_v48, %v3837_v30 }
 0x320   : > { %3143 = vst.msk [vmem:[#allocation2 + $0xdb] sm:$0xff] %vm439_vm1, %v3063_v51  ;;  %v2736_v62 = vadd.f32 %v2685_v9, %v2453_v20  ;;  %v3165_v51 = vld [vmem:[#allocation2 + $0x58] sm:$0xff] }
 0x322   : > { %v2776_v58 = vadd.f32 %v6966_v11, %v2736_v62 }
 0x323   : > { %v2117_v27 = vpop.f32.mrf.mxu2  ;;  %v2404_v56 = vpop.f32.mrf.mxu3 }
 0x324   : > { %v2812_v13 = vmax.f32 %v2776_v58, 0.0  ;;  %v2167_v53 = vadd.f32 %v2117_v27, %v1884_v18  ;;  %v2690_v6 = vpop.f32.mrf.mxu0  ;;  %v3001_v18 = vpop.permute.xlu1 %3000  ;;  %v3164_v58 = vld [vmem:[#allocation2 + $0x50] sm:$0xff] }
 0x325   : > { %v3195_v8 = vpack.c.bf16 %v3165_v51, %v3164_v58 }
 0x326   : > { %v3064_v63 = vmul.f32 %v2991_v47, %v2812_v13  ;;  %v2454_v14 = vadd.f32 %v2404_v56, %v2167_v53  ;;  %5751 = vmatmul.msk.bf16.gmra.mxu0 %vm439_vm1, %v3867_v40 }
 0x327   : > { %v6984_v17 = vpop.f32.mrf.mxu1  ;;  %v3236_v0 = vld [vmem:[#allocation2 + $0xd9] sm:$0xff] }
 0x328   : > { %3144 = vst.msk [vmem:[#allocation2 + $0xe3] sm:$0xff] %vm439_vm1, %v3064_v63  ;;  %v2737_v15 = vadd.f32 %v2687_v61, %v2454_v14  ;;  %5715 = vmatmul.msk.bf16.gmra.mxu2 %vm439_vm1, %v3194_v33  ;;  %5733 = vmatmul.msk.bf16.gmra.mxu3 %vm439_vm1, %v3866_v36  ;;  %v3258_v7 = vpack.c.bf16 %v3236_v0, %v3235_v12  ;;  %v7730_v36 = vld [vmem:[#allocation10_spill] sm:$0xff] }
 0x329   : > { %v1886_v28 = vadd.f32 %v7731_v1, %v7730_v36  ;;  %v3011_v36 = vpop.permute.xlu0 %3010  ;;  %v3166_v1 = vld [vmem:[#allocation2 + $0x60] sm:$0xff] }
 0x32a   : > { %v2777_v9 = vadd.f32 %v6966_v11, %v2737_v15  ;;  %5706 = vmatmul.msk.bf16.gmra.mxu1 %vm439_vm1, %v3258_v7  ;;  %v3006_v15 = vpop.permute.xlu2 %3005 }
 0x32b   : > { %v2120_v45 = vpop.f32.mrf.mxu2  ;;  %v2407_v49 = vpop.f32.mrf.mxu3 }
 0x32c   : > { %v2813_v4 = vmax.f32 %v2777_v9, 0.0  ;;  %v2168_v31 = vadd.f32 %v2120_v45, %v7729_v3  ;;  %v2692_v22 = vpop.f32.mrf.mxu0  ;;  %v3840_v3 = vld [vmem:[#allocation2 + $0x7a] sm:$0xff] }
 0x32e   : > { %v3065_v44 = vmul.f32 %v2996_v60, %v2813_v4  ;;  %v2455_v29 = vadd.f32 %v2407_v49, %v2168_v31  ;;  %v3167_v60 = vld [vmem:[#allocation2 + $0x68] sm:$0xff] }
 0x32f   : > { %v6993_v32 = vpop.f32.mrf.mxu1  ;;  %v3237_v53 = vld [vmem:[#allocation2 + $0xe1] sm:$0xff] }
 0x330   : > { %3145 = vst.msk [vmem:[#allocation2 + $0xeb] sm:$0xff] %vm439_vm1, %v3065_v44  ;;  %v2738_v38 = vadd.f32 %v2690_v6, %v2455_v29 }
 0x332   : > { %v2778_v55 = vadd.f32 %v6966_v11, %v2738_v38  ;;  %v3839_v38 = vld [vmem:[#allocation2 + $0x72] sm:$0xff] }
 0x333   : > { %v2122_v61 = vpop.f32.mrf.mxu2  ;;  %v2409_v37 = vpop.f32.mrf.mxu3 }
 0x334   : > { %v2814_v20 = vmax.f32 %v2778_v55, 0.0  ;;  %v2169_v62 = vadd.f32 %v2122_v61, %v1886_v28  ;;  %v2695_v5 = vpop.f32.mrf.mxu0  ;;  %v3869_v28 = vpack.c.bf16 %v3840_v3, %v3839_v38  ;;  %v3196_v61 = vpack.c.bf16 %v3167_v60, %v3166_v1  ;;  %v3021_v3 = vpop.permute.xlu2 %3020 }
 0x336   : > { %v3066_v27 = vmul.f32 %v3001_v18, %v2814_v20  ;;  %v2456_v56 = vadd.f32 %v2409_v37, %v2169_v62  ;;  %5752 = vmatmul.msk.bf16.gmra.mxu0 %vm439_vm1, %v3868_v41 }
 0x337   : > { %v6999_v13 = vpop.f32.mrf.mxu1  ;;  %v3238_v6 = vld [vmem:[#allocation2 + $0xe9] sm:$0xff] }
 0x338   : > { %3146 = vst.msk [vmem:[#allocation2 + $0xf3] sm:$0xff] %vm439_vm1, %v3066_v27  ;;  %v2739_v52 = vadd.f32 %v2692_v22, %v2456_v56  ;;  %5716 = vmatmul.msk.bf16.gmra.mxu2 %vm439_vm1, %v3195_v8  ;;  %5734 = vmatmul.msk.bf16.gmra.mxu3 %vm439_vm1, %v3867_v40  ;;  %v3259_v47 = vpack.c.bf16 %v3238_v6, %v3237_v53  ;;  %v3016_v56 = vpop.permute.xlu1 %3015 }
 0x339   : > { %v1888_v40 = vadd.f32 %v6617_v42, %v6625_v46 }
 0x33a   : > { %v2779_v25 = vadd.f32 %v6966_v11, %v2739_v52  ;;  %5707 = vmatmul.msk.bf16.gmra.mxu1 %vm439_vm1, %v3259_v47  ;;  %v4630_v47 = vld [vmem:[%s7711_s3 + $0xc] sm:$0x3] }
 0x33b   : > { %v2125_v63 = vpop.f32.mrf.mxu2  ;;  %v2412_v14 = vpop.f32.mrf.mxu3 }
 0x33c   : > { %v2815_v33 = vmax.f32 %v2779_v25, 0.0  ;;  %v2170_v12 = vadd.f32 %v2125_v63, %v6619_v19  ;;  %v2697_v0 = vpop.f32.mrf.mxu0  ;;  %v1890_v63 = vadd.f32 %v6663_v59, %v6675_v39 }
 0x33e   : > { %v3067_v7 = vmul.f32 %v3006_v15, %v2815_v33  ;;  %v2457_v9 = vadd.f32 %v2412_v14, %v2170_v12  ;;  %v3842_v33 = vld [vmem:[#allocation2 + $0x8a] sm:$0xff]  ;;  %v3169_v15 = vld [vmem:[#allocation2 + $0x78] sm:$0xff] }
 0x33f   : > { %v7008_v45 = vpop.f32.mrf.mxu1  ;;  %v3239_v42 = vld [vmem:[#allocation2 + $0xf1] sm:$0xff] }
 0x340   : > { %3147 = vst.msk [vmem:[#allocation2 + $0xfb] sm:$0xff] %vm439_vm1, %v3067_v7  ;;  %v2740_v49 = vadd.f32 %v2695_v5, %v2457_v9 }
 0x342   : > { %v2780_v4 = vadd.f32 %v6966_v11, %v2740_v49 }
 0x343   : > { %v2127_v31 = vpop.f32.mrf.mxu2  ;;  %v2414_v22 = vpop.f32.mrf.mxu3 }
 0x344   : > { %v2816_v44 = vmax.f32 %v2780_v4, 0.0  ;;  %v2171_v19 = vadd.f32 %v2127_v31, %v1888_v40  ;;  %v2700_v29 = vpop.f32.mrf.mxu0  ;;  %v3841_v4 = vld [vmem:[#allocation2 + $0x82] sm:$0xff]  ;;  %v3168_v31 = vld [vmem:[#allocation2 + $0x70] sm:$0xff] }
 0x346   : > { %v3068_v55 = vmul.f32 %v3011_v36, %v2816_v44  ;;  %v2458_v48 = vadd.f32 %v2414_v22, %v2171_v19  ;;  %5753 = vmatmul.msk.bf16.gmra.mxu0 %vm439_vm1, %v3869_v28  ;;  %v3870_v22 = vpack.c.bf16 %v3842_v33, %v3841_v4  ;;  %v3171_v33 = vld [vmem:[#allocation2 + $0x88] sm:$0xff] }
 0x347   : > { %v7014_v37 = vpop.f32.mrf.mxu1  ;;  %v3240_v46 = vld [vmem:[#allocation2 + $0xf9] sm:$0xff] }
 0x348   : > { %3148 = vst.msk [vmem:[#allocation2 + $0x103] sm:$0xff] %vm439_vm1, %v3068_v55  ;;  %v2741_v51 = vadd.f32 %v2697_v0, %v2458_v48  ;;  %5717 = vmatmul.msk.bf16.gmra.mxu2 %vm439_vm1, %v3196_v61  ;;  %5735 = vmatmul.msk.bf16.gmra.mxu3 %vm439_vm1, %v3868_v41  ;;  %v3260_v20 = vpack.c.bf16 %v3240_v46, %v3239_v42  ;;  %v4379_v41 = vld [vmem:[%s7711_s3 + $0x8] sm:$0xc]  ;;  %v4877_v48 = vld [vmem:[%s7711_s3 + $0xc] sm:$0xc] }
 0x349   : > { %v4381_v25 = vunpack.c.l.b16 %v4379_v41  ;;  %v4879_v61 = vunpack.c.l.b16 %v4877_v48  ;;  %v5128_v46 = vld [vmem:[%s7711_s3 + $0x10] sm:$0x3] }
 0x34a   : > { %v2781_v62 = vadd.f32 %v6966_v11, %v2741_v51  ;;  %5708 = vmatmul.msk.bf16.gmra.mxu1 %vm439_vm1, %v3260_v20 }
 0x34b   : > { %v2130_v5 = vpop.f32.mrf.mxu2  ;;  %v2417_v30 = vpop.f32.mrf.mxu3  ;;  %v4382_v7 = vpack.c.b16 %v4381_v25, %v4381_v25 }
 0x34c   : > { %v2817_v18 = vmax.f32 %v2781_v62, 0.0  ;;  %v2172_v58 = vadd.f32 %v2130_v5, %v6654_v10  ;;  %v2702_v27 = vpop.f32.mrf.mxu0  ;;  %v4686_v10 = vsel %vm494_vm0, %v4630_v47, 0  ;;  %v4880_v62 = vpack.c.b16 %v4879_v61, %v4879_v61  ;;  %v7732_v47 = vld [vmem:[#allocation11_spill] sm:$0xff]  ;;  %v3036_v61 = vpop.permute.xlu2 %3035 }
 0x34d   : > { %4695 = vmatpush.bf16.msra.mxu3 %v4686_v10  ;;  %v4383_v60 = vrot.slane %v4382_v7, 2  ;;  %v1892_v25 = vadd.f32 %v6895_v34, %v7732_v47  ;;  %v3843_v7 = vld [vmem:[#allocation2 + $0x92] sm:$0xff] }
 0x34e   : > { %v3069_v8 = vmul.f32 %v3016_v56, %v2817_v18  ;;  %v2459_v53 = vadd.f32 %v2417_v30, %v2172_v58  ;;  %v3026_v58 = vpop.permute.xlu0 %3025 }
 0x34f   : > { %v7023_v6 = vpop.f32.mrf.mxu1  ;;  %v3241_v39 = vld [vmem:[#allocation2 + $0x101] sm:$0xff]  ;;  %v4439_v36 = vsel %vm494_vm0, %v4383_v60, 0 }
 0x350   : > { %3149 = vst.msk [vmem:[#allocation2 + $0x10b] sm:$0xff] %vm439_vm1, %v3069_v8  ;;  %v2742_v52 = vadd.f32 %v2700_v29, %v2459_v53  ;;  %v3197_v29 = vpack.c.bf16 %v3169_v15, %v3168_v31  ;;  %4448 = vmatpush.bf16.msra.mxu2 %v4439_v36 }
 0x352   : > { %v2782_v14 = vadd.f32 %v6966_v11, %v2742_v52 }
 0x353   : > { %v2132_v12 = vpop.f32.mrf.mxu2  ;;  %v2419_v0 = vpop.f32.mrf.mxu3 }
 0x354   : > { %v2818_v9 = vmax.f32 %v2782_v14, 0.0  ;;  %v2173_v49 = vadd.f32 %v2132_v12, %v1890_v63  ;;  %v2705_v40 = vpop.f32.mrf.mxu0 }
 0x356   : > { %v3070_v44 = vmul.f32 %v3021_v3, %v2818_v9  ;;  %v2460_v19 = vadd.f32 %v2419_v0, %v2173_v49  ;;  %5754 = vmatmul.msk.bf16.gmra.mxu0 %vm439_vm1, %v3870_v22  ;;  %v3031_v9 = vpop.permute.xlu1 %3030  ;;  %v3170_v49 = vld [vmem:[#allocation2 + $0x80] sm:$0xff] }
 0x357   : > { %v7036_v59 = vpop.f32.mrf.mxu1  ;;  %v3242_v38 = vld [vmem:[#allocation2 + $0x109] sm:$0xff] }
 0x358   : > { %3150 = vst.msk [vmem:[#allocation2 + $0x113] sm:$0xff] %vm439_vm1, %v3070_v44  ;;  %v2743_v1 = vadd.f32 %v2702_v27, %v2460_v19  ;;  %5718 = vmatmul.msk.bf16.gmra.mxu2 %vm439_vm1, %v3197_v29  ;;  %5736 = vmatmul.msk.bf16.gmra.mxu3 %vm439_vm1, %v3869_v28  ;;  %v3261_v55 = vpack.c.bf16 %v3242_v38, %v3241_v39  ;;  %v5184_v28 = vsel %vm494_vm0, %v5128_v46, 0  ;;  %v4881_v27 = vrot.slane %v4880_v62, 2 }
 0x359   : > { %5193 = vmatpush.bf16.msra.mxu1 %v5184_v28  ;;  %v3173_v28 = vld [vmem:[#allocation2 + $0x98] sm:$0xff] }
 0x35a   : > { %v2783_v42 = vadd.f32 %v6966_v11, %v2743_v1  ;;  %5709 = vmatmul.msk.bf16.gmra.mxu1 %vm439_vm1, %v3261_v55  ;;  %v4937_v52 = vsel %vm494_vm0, %v4881_v27, 0  ;;  %v4079_v27 = vld [vmem:[#allocation2 + $0x1b] sm:$0xff] }
 0x35b   : > { %v2135_v51 = vpop.f32.mrf.mxu2  ;;  %v2422_v20 = vpop.f32.mrf.mxu3  ;;  %4946 = vmatpush.bf16.msra.mxu0 %v4937_v52 }
 0x35c   : > { %v2819_v5 = vmax.f32 %v2783_v42, 0.0  ;;  %v2174_v30 = vadd.f32 %v2135_v51, %v6719_v23  ;;  %v2707_v18 = vpop.f32.mrf.mxu0  ;;  %v3844_v23 = vld [vmem:[#allocation2 + $0x9a] sm:$0xff] }
 0x35d   : > { %v3871_v4 = vpack.c.bf16 %v3844_v23, %v3843_v7 }
 0x35e   : > { %v3071_v56 = vmul.f32 %v3026_v58, %v2819_v5  ;;  %v2461_v8 = vadd.f32 %v2422_v20, %v2174_v30  ;;  %v3172_v58 = vld [vmem:[#allocation2 + $0x90] sm:$0xff] }
 0x35f   : > { %v7053_v53 = vpop.f32.mrf.mxu1  ;;  %v3243_v34 = vld [vmem:[#allocation2 + $0x111] sm:$0xff] }
 0x360   : > { %3151 = vst.msk [vmem:[#allocation2 + $0x11b] sm:$0xff] %vm439_vm1, %v3071_v56  ;;  %v2744_v41 = vadd.f32 %v2705_v40, %v2461_v8  ;;  %v3198_v40 = vpack.c.bf16 %v3171_v33, %v3170_v49  ;;  %v3199_v8 = vpack.c.bf16 %v3173_v28, %v3172_v58 }
 0x362   : > { %v2784_v10 = vadd.f32 %v6966_v11, %v2744_v41  ;;  %v4078_v41 = vld [vmem:[#allocation2 + $0x13] sm:$0xff] }
 0x363   : > { %v2137_v63 = vpop.f32.mrf.mxu2  ;;  %v2424_v14 = vpop.f32.mrf.mxu3  ;;  %v4114_v47 = vpack.c.bf16 %v4079_v27, %v4078_v41 }
 0x364   : > { %v2820_v12 = vmax.f32 %v2784_v10, 0.0  ;;  %v2175_v0 = vadd.f32 %v2137_v63, %v1892_v25  ;;  %v3952_v15 = vpop.f32.mrf.mxu0 }
 0x366   : > { %v3072_v3 = vmul.f32 %v3031_v9, %v2820_v12  ;;  %v2462_v31 = vadd.f32 %v2424_v14, %v2175_v0  ;;  %5755 = vmatmul.msk.bf16.gmra.mxu0 %vm439_vm1, %v3871_v4  ;;  %v3848_v0 = vld [vmem:[#allocation2 + $0xba] sm:$0xff]  ;;  %v3175_v9 = vld [vmem:[#allocation2 + $0xa8] sm:$0xff] }
 0x367   : > { %v7060_v60 = vpop.f32.mrf.mxu1  ;;  %v3244_v44 = vld [vmem:[#allocation2 + $0x119] sm:$0xff] }
 0x368   : > { %3152 = vst.msk [vmem:[#allocation2 + $0x123] sm:$0xff] %vm439_vm1, %v3072_v3  ;;  %v2745_v19 = vadd.f32 %v2707_v18, %v2462_v31  ;;  %5719 = vmatmul.msk.bf16.gmra.mxu2 %vm439_vm1, %v3198_v40  ;;  %5737 = vmatmul.msk.bf16.gmra.mxu3 %vm439_vm1, %v3870_v22  ;;  %v3262_v29 = vpack.c.bf16 %v3244_v44, %v3243_v34  ;;  %v3846_v22 = vld [vmem:[#allocation2 + $0xaa] sm:$0xff]  ;;  %v3845_v18 = vld [vmem:[#allocation2 + $0xa2] sm:$0xff]  ;;  %v3847_v3 = vld [vmem:[#allocation2 + $0xb2] sm:$0xff] }
 0x369   : > { %v3174_v31 = vld [vmem:[#allocation2 + $0xa0] sm:$0xff]  ;;  %v3873_v40 = vpack.c.bf16 %v3848_v0, %v3847_v3  ;;  %v4081_v34 = vld [vmem:[#allocation2 + $0x2b] sm:$0xff] }
 0x36a   : > { %v2785_v39 = vadd.f32 %v6966_v11, %v2745_v19  ;;  %5710 = vmatmul.msk.bf16.gmra.mxu1 %vm439_vm1, %v3262_v29  ;;  %v3200_v19 = vpack.c.bf16 %v3175_v9, %v3174_v31  ;;  %v4080_v29 = vld [vmem:[#allocation2 + $0x23] sm:$0xff]  ;;  %v3851_v31 = vld [vmem:[#allocation2 + $0xd2] sm:$0xff] }
 0x36b   : > { %v3490_v38 = vpop.f32.mrf.mxu2  ;;  %v3701_v36 = vpop.f32.mrf.mxu3 }
 0x36c   : > { %v2821_v1 = vmax.f32 %v2785_v39, 0.0  ;;  %v3491_v55 = vadd.f32 %v3490_v38, %v6904_v57  ;;  %v3954_v48 = vpop.f32.mrf.mxu0  ;;  %v3872_v57 = vpack.c.bf16 %v3846_v22, %v3845_v18  ;;  %v4115_v39 = vpack.c.bf16 %v4081_v34, %v4080_v29  ;;  %v3176_v18 = vld [vmem:[#allocation2 + $0xb0] sm:$0xff] }
 0x36e   : > { %v3073_v42 = vmul.f32 %v3036_v61, %v2821_v1  ;;  %v3791_v46 = vadd.f32 %v3701_v36, %v3491_v55 }
 0x36f   : > { %v7069_v51 = vpop.f32.mrf.mxu1 }
 0x370   : > { %3153 = vst.msk [vmem:[#allocation2 + $0x12b] sm:$0xff] %vm439_vm1, %v3073_v42  ;;  %v7072_v20 = vadd.f32 %v3952_v15, %v3791_v46  ;;  %v3850_v46 = vld [vmem:[#allocation2 + $0xca] sm:$0xff] }
 0x373   : > { %v3492_v62 = vpop.f32.mrf.mxu2  ;;  %v3703_v11 = vpop.f32.mrf.mxu3 }
 0x374   : > { %v3493_v5 = vadd.f32 %v3492_v62, %v6913_v2  ;;  %v3957_v30 = vpop.f32.mrf.mxu0 }
 0x376   : > { %v3792_v56 = vadd.f32 %v3703_v11, %v3493_v5  ;;  %5756 = vmatmul.msk.bf16.gmra.mxu0 %vm439_vm1, %v3872_v57  ;;  %v3177_v11 = vld [vmem:[#allocation2 + $0xb8] sm:$0xff] }
 0x377   : > { %v7075_v52 = vpop.f32.mrf.mxu1 }
 0x378   : > { %5720 = vmatmul.msk.bf16.gmra.mxu2 %vm439_vm1, %v3199_v8  ;;  %5738 = vmatmul.msk.bf16.gmra.mxu3 %vm439_vm1, %v3871_v4  ;;  %v7080_v25 = vadd.f32 %v3954_v48, %v3792_v56  ;;  %v3201_v56 = vpack.c.bf16 %v3177_v11, %v3176_v18  ;;  %v4082_v8 = vld [vmem:[#allocation2 + $0x33] sm:$0xff]  ;;  %v3854_v11 = vld [vmem:[#allocation2 + $0xea] sm:$0xff] }
 0x37a   : > { %5765 = vmatmul.msk.bf16.vlgmr.msrb.gmra.mxu1 %vm439_vm1, %v4114_v47 }
 0x37b   : > { %v3495_v2 = vpop.f32.mrf.mxu2  ;;  %v3706_v10 = vpop.f32.mrf.mxu3 }
 0x37c   : > { %v3496_v23 = vadd.f32 %v3495_v2, %v6919_v35  ;;  %v3959_v63 = vpop.f32.mrf.mxu0 }
 0x37e   : > { %v3793_v14 = vadd.f32 %v3706_v10, %v3496_v23 }
 0x37f   : > { %v7084_v33 = vpop.f32.mrf.mxu1 }
 0x380   : > { %v7086_v12 = vadd.f32 %v3957_v30, %v3793_v14  ;;  %v3849_v30 = vld [vmem:[#allocation2 + $0xc2] sm:$0xff] }
 0x381   : > { %v3874_v58 = vpack.c.bf16 %v3850_v46, %v3849_v30  ;;  %v3181_v30 = vld [vmem:[#allocation2 + $0xd8] sm:$0xff] }
 0x383   : > { %v3497_v15 = vpop.f32.mrf.mxu2  ;;  %v3708_v7 = vpop.f32.mrf.mxu3 }
 0x384   : > { %v3498_v49 = vadd.f32 %v3497_v15, %v6928_v54  ;;  %v3962_v4 = vpop.f32.mrf.mxu0  ;;  %v3852_v15 = vld [vmem:[#allocation2 + $0xda] sm:$0xff] }
 0x385   : > { %v3875_v34 = vpack.c.bf16 %v3852_v15, %v3851_v31 }
 0x386   : > { %v3794_v44 = vadd.f32 %v3708_v7, %v3498_v49  ;;  %5757 = vmatmul.msk.bf16.gmra.mxu0 %vm439_vm1, %v3873_v40  ;;  %v3179_v49 = vld [vmem:[#allocation2 + $0xc8] sm:$0xff] }
 0x387   : > { %v7089_v35 = vpop.f32.mrf.mxu1 }
 0x388   : > { %5721 = vmatmul.msk.bf16.gmra.mxu2 %vm439_vm1, %v3200_v19  ;;  %5739 = vmatmul.msk.bf16.gmra.mxu3 %vm439_vm1, %v3872_v57  ;;  %v7094_v38 = vadd.f32 %v3959_v63, %v3794_v44  ;;  %v4083_v57 = vld [vmem:[#allocation2 + $0x3b] sm:$0xff]  ;;  %v4085_v44 = vld [vmem:[#allocation2 + $0x4b] sm:$0xff] }
 0x389   : > { %v4116_v41 = vpack.c.bf16 %v4083_v57, %v4082_v8  ;;  %v3853_v57 = vld [vmem:[#allocation2 + $0xe2] sm:$0xff] }
 0x38a   : > { %5766 = vmatmul.msk.bf16.gmra.mxu1 %vm439_vm1, %v4115_v39  ;;  %v4084_v39 = vld [vmem:[#allocation2 + $0x43] sm:$0xff]  ;;  %v4087_v8 = vld [vmem:[#allocation2 + $0x5b] sm:$0xff] }
 0x38b   : > { %v3500_v54 = vpop.f32.mrf.mxu2  ;;  %v3711_v36 = vpop.f32.mrf.mxu3 }
 0x38c   : > { %v3501_v1 = vadd.f32 %v3500_v54, %v6934_v16  ;;  %v3964_v55 = vpop.f32.mrf.mxu0  ;;  %v4117_v54 = vpack.c.bf16 %v4085_v44, %v4084_v39  ;;  %v3183_v44 = vld [vmem:[#allocation2 + $0xe8] sm:$0xff]  ;;  %v3182_v39 = vld [vmem:[#allocation2 + $0xe0] sm:$0xff] }
 0x38e   : > { %v3795_v48 = vadd.f32 %v3711_v36, %v3501_v1 }
 0x38f   : > { %v7098_v61 = vpop.f32.mrf.mxu1 }
 0x390   : > { %v7100_v42 = vadd.f32 %v3962_v4, %v3795_v48 }
 0x393   : > { %v3502_v22 = vpop.f32.mrf.mxu2  ;;  %v3713_v62 = vpop.f32.mrf.mxu3 }
 0x394   : > { %v3503_v28 = vadd.f32 %v3502_v22, %v6943_v26  ;;  %v3967_v5 = vpop.f32.mrf.mxu0 }
 0x396   : > { %v3796_v27 = vadd.f32 %v3713_v62, %v3503_v28  ;;  %5758 = vmatmul.msk.bf16.gmra.mxu0 %vm439_vm1, %v3874_v58 }
 0x397   : > { %v7103_v16 = vpop.f32.mrf.mxu1 }
 0x398   : > { %5722 = vmatmul.msk.bf16.gmra.mxu2 %vm439_vm1, %v3201_v56  ;;  %5740 = vmatmul.msk.bf16.gmra.mxu3 %vm439_vm1, %v3873_v40  ;;  %v7108_v47 = vadd.f32 %v3964_v55, %v3796_v27  ;;  %v3178_v40 = vld [vmem:[#allocation2 + $0xc0] sm:$0xff]  ;;  %v3180_v27 = vld [vmem:[#allocation2 + $0xd0] sm:$0xff]  ;;  %v3876_v56 = vpack.c.bf16 %v3854_v11, %v3853_v57 }
 0x399   : > { %v3202_v29 = vpack.c.bf16 %v3179_v49, %v3178_v40 }
 0x39a   : > { %5767 = vmatmul.msk.bf16.gmra.mxu1 %vm439_vm1, %v4116_v41 }
 0x39b   : > { %v3505_v26 = vpop.f32.mrf.mxu2  ;;  %v3716_v2 = vpop.f32.mrf.mxu3 }
 0x39c   : > { %v3506_v10 = vadd.f32 %v3505_v26, %v6949_v50  ;;  %v3969_v23 = vpop.f32.mrf.mxu0  ;;  %v3203_v26 = vpack.c.bf16 %v3181_v30, %v3180_v27  ;;  %v3858_v27 = vld [vmem:[#allocation2 + $0x10a] sm:$0xff] }
 0x39e   : > { %v3797_v63 = vadd.f32 %v3716_v2, %v3506_v10  ;;  %v4086_v2 = vld [vmem:[#allocation2 + $0x53] sm:$0xff] }
 0x39f   : > { %v7112_v14 = vpop.f32.mrf.mxu1  ;;  %v4118_v10 = vpack.c.bf16 %v4087_v8, %v4086_v2 }
 0x3a0   : > { %v7114_v0 = vadd.f32 %v3967_v5, %v3797_v63 }
 0x3a3   : > { %v3507_v7 = vpop.f32.mrf.mxu2  ;;  %v3718_v9 = vpop.f32.mrf.mxu3 }
 0x3a4   : > { %v3508_v4 = vadd.f32 %v3507_v7, %v6958_v43  ;;  %v3972_v3 = vpop.f32.mrf.mxu0 }
 0x3a6   : > { %v3798_v19 = vadd.f32 %v3718_v9, %v3508_v4  ;;  %5759 = vmatmul.msk.bf16.gmra.mxu0 %vm439_vm1, %v3875_v34 }
 0x3a7   : > { %v7117_v50 = vpop.f32.mrf.mxu1 }
 0x3a8   : > { %5723 = vmatmul.msk.bf16.gmra.mxu2 %vm439_vm1, %v3202_v29  ;;  %5741 = vmatmul.msk.bf16.gmra.mxu3 %vm439_vm1, %v3874_v58  ;;  %v7122_v36 = vadd.f32 %v3969_v23, %v3798_v19  ;;  %v3855_v29 = vld [vmem:[#allocation2 + $0xf2] sm:$0xff] }
 0x3aa   : > { %5768 = vmatmul.msk.bf16.gmra.mxu1 %vm439_vm1, %v4117_v54 }
 0x3ab   : > { %v3510_v43 = vpop.f32.mrf.mxu2  ;;  %v3721_v1 = vpop.f32.mrf.mxu3 }
 0x3ac   : > { %v3511_v55 = vadd.f32 %v3510_v43, %v6969_v21  ;;  %v3974_v48 = vpop.f32.mrf.mxu0  ;;  %v4089_v43 = vld [vmem:[#allocation2 + $0x6b] sm:$0xff] }
 0x3ae   : > { %v3799_v46 = vadd.f32 %v3721_v1, %v3511_v55  ;;  %v3204_v55 = vpack.c.bf16 %v3183_v44, %v3182_v39 }
 0x3af   : > { %v7126_v22 = vpop.f32.mrf.mxu1 }
 0x3b0   : > { %v7128_v62 = vadd.f32 %v3972_v3, %v3799_v46  ;;  %v3856_v3 = vld [vmem:[#allocation2 + $0xfa] sm:$0xff] }
 0x3b1   : > { %v3877_v54 = vpack.c.bf16 %v3856_v3, %v3855_v29  ;;  %v4090_v3 = vld [vmem:[#allocation2 + $0x73] sm:$0xff] }
 0x3b3   : > { %v3512_v28 = vpop.f32.mrf.mxu2  ;;  %v3723_v5 = vpop.f32.mrf.mxu3 }
 0x3b4   : > { %v3513_v18 = vadd.f32 %v3512_v28, %v6978_v24  ;;  %v3977_v58 = vpop.f32.mrf.mxu0 }
 0x3b6   : > { %v3800_v41 = vadd.f32 %v3723_v5, %v3513_v18  ;;  %5760 = vmatmul.msk.bf16.gmra.mxu0 %vm439_vm1, %v3876_v56 }
 0x3b7   : > { %v7131_v21 = vpop.f32.mrf.mxu1 }
 0x3b8   : > { %5724 = vmatmul.msk.bf16.gmra.mxu2 %vm439_vm1, %v3203_v26  ;;  %5742 = vmatmul.msk.bf16.gmra.mxu3 %vm439_vm1, %v3875_v34  ;;  %v7136_v23 = vadd.f32 %v3974_v48, %v3800_v41  ;;  %v4088_v48 = vld [vmem:[#allocation2 + $0x63] sm:$0xff]  ;;  %v3185_v26 = vld [vmem:[#allocation2 + $0xf8] sm:$0xff] }
 0x3b9   : > { %v4119_v46 = vpack.c.bf16 %v4089_v43, %v4088_v48 }
 0x3ba   : > { %5769 = vmatmul.msk.bf16.gmra.mxu1 %vm439_vm1, %v4118_v10  ;;  %v3857_v10 = vld [vmem:[#allocation2 + $0x102] sm:$0xff] }
 0x3bb   : > { %v3515_v24 = vpop.f32.mrf.mxu2  ;;  %v3726_v63 = vpop.f32.mrf.mxu3 }
 0x3bc   : > { %v3516_v15 = vadd.f32 %v3515_v24, %v6984_v17  ;;  %v3979_v7 = vpop.f32.mrf.mxu0  ;;  %v3184_v24 = vld [vmem:[#allocation2 + $0xf0] sm:$0xff] }
 0x3be   : > { %v3801_v9 = vadd.f32 %v3726_v63, %v3516_v15  ;;  %v3878_v63 = vpack.c.bf16 %v3858_v27, %v3857_v10  ;;  %v4091_v15 = vld [vmem:[#allocation2 + $0x7b] sm:$0xff] }
 0x3bf   : > { %v7140_v49 = vpop.f32.mrf.mxu1 }
 0x3c0   : > { %v7142_v4 = vadd.f32 %v3977_v58, %v3801_v9  ;;  %v3205_v9 = vpack.c.bf16 %v3185_v26, %v3184_v24 }
 0x3c3   : > { %v3517_v31 = vpop.f32.mrf.mxu2  ;;  %v3728_v40 = vpop.f32.mrf.mxu3 }
 0x3c4   : > { %v3518_v34 = vadd.f32 %v3517_v31, %v6993_v32  ;;  %v3982_v19 = vpop.f32.mrf.mxu0  ;;  %v4120_v31 = vpack.c.bf16 %v4091_v15, %v4090_v3  ;;  %v3862_v3 = vld [vmem:[#allocation2 + $0x12a] sm:$0xff] }
 0x3c6   : > { %v3802_v1 = vadd.f32 %v3728_v40, %v3518_v34  ;;  %5761 = vmatmul.msk.bf16.gmra.mxu0 %vm439_vm1, %v3877_v54 }
 0x3c7   : > { %v7145_v17 = vpop.f32.mrf.mxu1 }
 0x3c8   : > { %5725 = vmatmul.msk.bf16.gmra.mxu2 %vm439_vm1, %v3204_v55  ;;  %5743 = vmatmul.msk.bf16.gmra.mxu3 %vm439_vm1, %v3876_v56  ;;  %v7150_v11 = vadd.f32 %v3979_v7, %v3802_v1  ;;  %v3860_v1 = vld [vmem:[#allocation2 + $0x11a] sm:$0xff] }
 0x3ca   : > { %5770 = vmatmul.msk.bf16.gmra.mxu1 %vm439_vm1, %v4119_v46  ;;  %v3187_v46 = vld [vmem:[#allocation2 + $0x108] sm:$0xff] }
 0x3cb   : > { %v3520_v32 = vpop.f32.mrf.mxu2  ;;  %v3731_v28 = vpop.f32.mrf.mxu3 }
 0x3cc   : > { %v3521_v5 = vadd.f32 %v3520_v32, %v6999_v13  ;;  %v3984_v30 = vpop.f32.mrf.mxu0 }
 0x3ce   : > { %v3803_v18 = vadd.f32 %v3731_v28, %v3521_v5  ;;  %v3859_v28 = vld [vmem:[#allocation2 + $0x112] sm:$0xff]  ;;  %v3186_v5 = vld [vmem:[#allocation2 + $0x100] sm:$0xff] }
 0x3cf   : > { %v7154_v58 = vpop.f32.mrf.mxu1 }
 0x3d0   : > { %v7156_v57 = vadd.f32 %v3982_v19, %v3803_v18  ;;  %v4093_v18 = vld [vmem:[#allocation2 + $0x8b] sm:$0xff] }
 0x3d3   : > { %v3522_v8 = vpop.f32.mrf.mxu2  ;;  %v3733_v41 = vpop.f32.mrf.mxu3 }
 0x3d4   : > { %v3523_v56 = vadd.f32 %v3522_v8, %v7008_v45  ;;  %v3987_v2 = vpop.f32.mrf.mxu0  ;;  %v3206_v8 = vpack.c.bf16 %v3187_v46, %v3186_v5 }
 0x3d6   : > { %v3804_v7 = vadd.f32 %v3733_v41, %v3523_v56  ;;  %5762 = vmatmul.msk.bf16.gmra.mxu0 %vm439_vm1, %v3878_v63  ;;  %v4092_v41 = vld [vmem:[#allocation2 + $0x83] sm:$0xff] }
 0x3d7   : > { %v7159_v13 = vpop.f32.mrf.mxu1  ;;  %v4121_v26 = vpack.c.bf16 %v4093_v18, %v4092_v41 }
 0x3d8   : > { %5726 = vmatmul.msk.bf16.gmra.mxu2 %vm439_vm1, %v3205_v9  ;;  %5744 = vmatmul.msk.bf16.gmra.mxu3 %vm439_vm1, %v3877_v54  ;;  %v7164_v40 = vadd.f32 %v3984_v30, %v3804_v7  ;;  %v3879_v30 = vpack.c.bf16 %v3860_v1, %v3859_v28 }
 0x3da   : > { %5771 = vmatmul.msk.bf16.gmra.mxu1 %vm439_vm1, %v4120_v31 }
 0x3db   : > { %v3525_v45 = vpop.f32.mrf.mxu2  ;;  %v3736_v44 = vpop.f32.mrf.mxu3 }
 0x3dc   : > { %v3526_v34 = vadd.f32 %v3525_v45, %v7014_v37  ;;  %v3989_v19 = vpop.f32.mrf.mxu0 }
 0x3de   : > { %v3805_v29 = vadd.f32 %v3736_v44, %v3526_v34  ;;  %v3189_v44 = vld [vmem:[#allocation2 + $0x118] sm:$0xff] }
 0x3df   : > { %v7168_v39 = vpop.f32.mrf.mxu1 }
 0x3e0   : > { %v7170_v43 = vadd.f32 %v3987_v2, %v3805_v29  ;;  %v3188_v29 = vld [vmem:[#allocation2 + $0x110] sm:$0xff] }
 0x3e1   : > { %v3207_v46 = vpack.c.bf16 %v3189_v44, %v3188_v29  ;;  %v4325_v44 = vld [vmem:[#allocation2 + $0x14] sm:$0xff] }
 0x3e3   : > { %v3527_v55 = vpop.f32.mrf.mxu2  ;;  %v3738_v48 = vpop.f32.mrf.mxu3 }
 0x3e4   : > { %v3528_v54 = vadd.f32 %v3527_v55, %v7023_v6  ;;  %v3992_v32 = vpop.f32.mrf.mxu0  ;;  %v4095_v55 = vld [vmem:[#allocation2 + $0x9b] sm:$0xff] }
 0x3e6   : > { %v3806_v27 = vadd.f32 %v3738_v48, %v3528_v54  ;;  %5763 = vmatmul.msk.bf16.gmra.mxu0 %vm439_vm1, %v3879_v30  ;;  %v4094_v54 = vld [vmem:[#allocation2 + $0x93] sm:$0xff] }
 0x3e7   : > { %v7173_v37 = vpop.f32.mrf.mxu1  ;;  %v4122_v28 = vpack.c.bf16 %v4095_v55, %v4094_v54 }
 0x3e8   : > { %5727 = vmatmul.msk.bf16.gmra.mxu2 %vm439_vm1, %v3206_v8  ;;  %5745 = vmatmul.msk.bf16.gmra.mxu3 %vm439_vm1, %v3878_v63  ;;  %v7178_v56 = vadd.f32 %v3989_v19, %v3806_v27  ;;  %v3861_v19 = vld [vmem:[#allocation2 + $0x122] sm:$0xff] }
 0x3e9   : > { %v3880_v1 = vpack.c.bf16 %v3862_v3, %v3861_v19  ;;  %v4097_v19 = vld [vmem:[#allocation2 + $0xab] sm:$0xff] }
 0x3ea   : > { %5772 = vmatmul.msk.bf16.gmra.mxu1 %vm439_vm1, %v4121_v26 }
 0x3eb   : > { %v3530_v6 = vpop.f32.mrf.mxu2  ;;  %v3741_v2 = vpop.f32.mrf.mxu3 }
 0x3ec   : > { %v3531_v10 = vadd.f32 %v3530_v6, %v7036_v59  ;;  %v3994_v24 = vpop.f32.mrf.mxu0 }
 0x3ee   : > { %v3807_v15 = vadd.f32 %v3741_v2, %v3531_v10  ;;  %v4824_v2 = vld [vmem:[#allocation2 + $0x2d] sm:$0xff] }
 0x3ef   : > { %v7182_v7 = vpop.f32.mrf.mxu1 }
 0x3f0   : > { %v7184_v9 = vadd.f32 %v3992_v32, %v3807_v15  ;;  %v4326_v15 = vld [vmem:[#allocation2 + $0x1c] sm:$0xff] }
 0x3f3   : > { %v3532_v31 = vpop.f32.mrf.mxu2  ;;  %v3743_v45 = vpop.f32.mrf.mxu3 }
 0x3f4   : > { %v3533_v63 = vadd.f32 %v3532_v31, %v7053_v53  ;;  %v3997_v34 = vpop.f32.mrf.mxu0 }
 0x3f6   : > { %v3808_v48 = vadd.f32 %v3743_v45, %v3533_v63  ;;  %5764 = vmatmul.msk.bf16.gmra.mxu0 %vm439_vm1, %v3880_v1  ;;  %v4823_v45 = vld [vmem:[#allocation2 + $0x25] sm:$0xff]  ;;  %v4361_v1 = vpack.c.bf16 %v4326_v15, %v4325_v44  ;;  %v4099_v44 = vld [vmem:[#allocation2 + $0xbb] sm:$0xff] }
 0x3f7   : > { %v4199_v59 = vpop.f32.mrf.mxu1  ;;  %v4576_v63 = vld [vmem:[#allocation2 + $0x24] sm:$0xff] }
 0x3f8   : > { %v7189_v32 = vadd.f32 %v4199_v59, %v7072_v20  ;;  %5728 = vmatmul.msk.bf16.gmra.mxu2 %vm439_vm1, %v3207_v46  ;;  %5746 = vmatmul.msk.bf16.gmra.mxu3 %vm439_vm1, %v3879_v30  ;;  %v7193_v53 = vadd.f32 %v3994_v24, %v3808_v48  ;;  %v4577_v24 = vld [vmem:[#allocation2 + $0x2c] sm:$0xff] }
 0x3f9   : > { %v4612_v55 = vpack.c.bf16 %v4577_v24, %v4576_v63  ;;  %v4825_v24 = vld [vmem:[#allocation2 + $0x35] sm:$0xff] }
 0x3fa   : > { %5773 = vmatmul.msk.bf16.gmra.mxu1 %vm439_vm1, %v4122_v28 }
 0x3fb   : > { %v3535_v5 = vpop.f32.mrf.mxu2  ;;  %v3746_v18 = vpop.f32.mrf.mxu3 }
 0x3fc   : > { %v3536_v27 = vadd.f32 %v3535_v5, %v7060_v60  ;;  %v3999_v8 = vpop.f32.mrf.mxu0  ;;  %v4859_v60 = vpack.c.bf16 %v4824_v2, %v4823_v45 }
 0x3fe   : > { %v3809_v41 = vadd.f32 %v3746_v18, %v3536_v27 }
 0x3ff   : > { %v4201_v26 = vpop.f32.mrf.mxu1 }
 0x400   : > { %v7198_v6 = vadd.f32 %v4201_v26, %v7080_v25  ;;  %v7200_v20 = vadd.f32 %v3997_v34, %v3809_v41  ;;  %v4096_v34 = vld [vmem:[#allocation2 + $0xa3] sm:$0xff] }
 0x401   : > { %v4826_v26 = vld [vmem:[#allocation2 + $0x3d] sm:$0xff] }
 0x402   : > { %v4860_v45 = vpack.c.bf16 %v4826_v26, %v4825_v24 }
 0x403   : > { %v3537_v10 = vpop.f32.mrf.mxu2  ;;  %v3748_v30 = vpop.f32.mrf.mxu3 }
 0x404   : > { %v3538_v3 = vadd.f32 %v3537_v10, %v7069_v51  ;;  %v4002_v31 = vpop.f32.mrf.mxu0  ;;  %v4123_v51 = vpack.c.bf16 %v4097_v19, %v4096_v34 }
 0x406   : > { %v3810_v29 = vadd.f32 %v3748_v30, %v3538_v3  ;;  %5819 = vmatmul.msk.bf16.vlgmr.msra.gmra.mxu0 %vm439_vm1, %v4859_v60  ;;  %v4579_v30 = vld [vmem:[#allocation2 + $0x3c] sm:$0xff]  ;;  %v4578_v3 = vld [vmem:[#allocation2 + $0x34] sm:$0xff] }
 0x407   : > { %v4204_v25 = vpop.f32.mrf.mxu1  ;;  %v4613_v63 = vpack.c.bf16 %v4579_v30, %v4578_v3 }
 0x408   : > { %v7205_v48 = vadd.f32 %v4204_v25, %v7086_v12  ;;  %5783 = vmatmul.msk.bf16.vlgmr.msra.gmra.mxu2 %vm439_vm1, %v4361_v1  ;;  %5801 = vmatmul.msk.bf16.vlgmr.msra.gmra.mxu3 %vm439_vm1, %v4612_v55  ;;  %v7209_v46 = vadd.f32 %v3999_v8, %v3810_v29 }
 0x40a   : > { %5774 = vmatmul.msk.bf16.gmra.mxu1 %vm439_vm1, %v4123_v51 }
 0x40b   : > { %v3540_v59 = vpop.f32.mrf.mxu2  ;;  %v3751_v54 = vpop.f32.mrf.mxu3 }
 0x40c   : > { %v3541_v28 = vadd.f32 %v3540_v59, %v7075_v52  ;;  %v4004_v5 = vpop.f32.mrf.mxu0 }
 0x40e   : > { %v3811_v18 = vadd.f32 %v3751_v54, %v3541_v28 }
 0x40f   : > { %v4206_v27 = vpop.f32.mrf.mxu1 }
 0x410   : > { %v7214_v41 = vadd.f32 %v4206_v27, %v7094_v38  ;;  %v7216_v12 = vadd.f32 %v4002_v31, %v3811_v18  ;;  %v4098_v38 = vld [vmem:[#allocation2 + $0xb3] sm:$0xff] }
 0x411   : > { %v4124_v19 = vpack.c.bf16 %v4099_v44, %v4098_v38  ;;  %v4581_v27 = vld [vmem:[#allocation2 + $0x4c] sm:$0xff] }
 0x413   : > { %v3542_v2 = vpop.f32.mrf.mxu2  ;;  %v3753_v10 = vpop.f32.mrf.mxu3 }
 0x414   : > { %v3543_v8 = vadd.f32 %v3542_v2, %v7084_v33  ;;  %v4007_v15 = vpop.f32.mrf.mxu0  ;;  %v4827_v2 = vld [vmem:[#allocation2 + $0x45] sm:$0xff] }
 0x416   : > { %v3812_v52 = vadd.f32 %v3753_v10, %v3543_v8  ;;  %5820 = vmatmul.msk.bf16.gmra.mxu0 %vm439_vm1, %v4860_v45  ;;  %v4580_v10 = vld [vmem:[#allocation2 + $0x44] sm:$0xff] }
 0x417   : > { %v4209_v60 = vpop.f32.mrf.mxu1  ;;  %v4101_v8 = vld [vmem:[#allocation2 + $0xcb] sm:$0xff]  ;;  %v4614_v24 = vpack.c.bf16 %v4581_v27, %v4580_v10 }
 0x418   : > { %v7221_v31 = vadd.f32 %v4209_v60, %v7100_v42  ;;  %5784 = vmatmul.msk.bf16.gmra.mxu2 %vm439_vm1, %v4612_v55  ;;  %5802 = vmatmul.msk.bf16.gmra.mxu3 %vm439_vm1, %v4613_v63  ;;  %v7225_v33 = vadd.f32 %v4004_v5, %v3812_v52  ;;  %v4828_v55 = vld [vmem:[#allocation2 + $0x4d] sm:$0xff] }
 0x419   : > { %v4861_v30 = vpack.c.bf16 %v4828_v55, %v4827_v2 }
 0x41a   : > { %5775 = vmatmul.msk.bf16.gmra.mxu1 %vm439_vm1, %v4124_v19 }
 0x41b   : > { %v3545_v29 = vpop.f32.mrf.mxu2  ;;  %v3756_v1 = vpop.f32.mrf.mxu3 }
 0x41c   : > { %v3546_v25 = vadd.f32 %v3545_v29, %v7089_v35  ;;  %v4009_v34 = vpop.f32.mrf.mxu0 }
 0x41e   : > { %v3813_v51 = vadd.f32 %v3756_v1, %v3546_v25 }
 0x41f   : > { %v4211_v59 = vpop.f32.mrf.mxu1 }
 0x420   : > { %v7230_v54 = vadd.f32 %v4211_v59, %v7108_v47  ;;  %v7232_v42 = vadd.f32 %v4007_v15, %v3813_v51  ;;  %v4100_v47 = vld [vmem:[#allocation2 + $0xc3] sm:$0xff] }
 0x421   : > { %v4125_v45 = vpack.c.bf16 %v4101_v8, %v4100_v47  ;;  %v4583_v59 = vld [vmem:[#allocation2 + $0x5c] sm:$0xff] }
 0x423   : > { %v3547_v28 = vpop.f32.mrf.mxu2  ;;  %v3758_v18 = vpop.f32.mrf.mxu3 }
 0x424   : > { %v3548_v5 = vadd.f32 %v3547_v28, %v7098_v61  ;;  %v4012_v26 = vpop.f32.mrf.mxu0  ;;  %v4829_v28 = vld [vmem:[#allocation2 + $0x55] sm:$0xff] }
 0x426   : > { %v3814_v35 = vadd.f32 %v3758_v18, %v3548_v5  ;;  %5821 = vmatmul.msk.bf16.gmra.mxu0 %vm439_vm1, %v4861_v30  ;;  %v4582_v18 = vld [vmem:[#allocation2 + $0x54] sm:$0xff] }
 0x427   : > { %v4214_v3 = vpop.f32.mrf.mxu1  ;;  %v4103_v5 = vld [vmem:[#allocation2 + $0xdb] sm:$0xff]  ;;  %v4615_v2 = vpack.c.bf16 %v4583_v59, %v4582_v18 }
 0x428   : > { %v7237_v15 = vadd.f32 %v4214_v3, %v7114_v0  ;;  %5785 = vmatmul.msk.bf16.gmra.mxu2 %vm439_vm1, %v4613_v63  ;;  %5803 = vmatmul.msk.bf16.gmra.mxu3 %vm439_vm1, %v4614_v24  ;;  %v7241_v61 = vadd.f32 %v4009_v34, %v3814_v35  ;;  %v4830_v63 = vld [vmem:[#allocation2 + $0x5d] sm:$0xff] }
 0x429   : > { %v4862_v27 = vpack.c.bf16 %v4830_v63, %v4829_v28 }
 0x42a   : > { %5776 = vmatmul.msk.bf16.gmra.mxu1 %vm439_vm1, %v4125_v45 }
 0x42b   : > { %v3550_v44 = vpop.f32.mrf.mxu2  ;;  %v3761_v52 = vpop.f32.mrf.mxu3 }
 0x42c   : > { %v3551_v60 = vadd.f32 %v3550_v44, %v7103_v16  ;;  %v4014_v38 = vpop.f32.mrf.mxu0 }
 0x42e   : > { %v3815_v19 = vadd.f32 %v3761_v52, %v3551_v60 }
 0x42f   : > { %v4216_v29 = vpop.f32.mrf.mxu1 }
 0x430   : > { %v7246_v1 = vadd.f32 %v4216_v29, %v7122_v36  ;;  %v7248_v0 = vadd.f32 %v4012_v26, %v3815_v19  ;;  %v4102_v36 = vld [vmem:[#allocation2 + $0xd3] sm:$0xff] }
 0x431   : > { %v4126_v30 = vpack.c.bf16 %v4103_v5, %v4102_v36  ;;  %v4585_v29 = vld [vmem:[#allocation2 + $0x6c] sm:$0xff] }
 0x433   : > { %v3552_v25 = vpop.f32.mrf.mxu2  ;;  %v3763_v51 = vpop.f32.mrf.mxu3 }
 0x434   : > { %v3553_v34 = vadd.f32 %v3552_v25, %v7112_v14  ;;  %v4017_v55 = vpop.f32.mrf.mxu0  ;;  %v4831_v25 = vld [vmem:[#allocation2 + $0x65] sm:$0xff] }
 0x436   : > { %v3816_v16 = vadd.f32 %v3763_v51, %v3553_v34  ;;  %5822 = vmatmul.msk.bf16.gmra.mxu0 %vm439_vm1, %v4862_v27  ;;  %v4584_v51 = vld [vmem:[#allocation2 + $0x64] sm:$0xff] }
 0x437   : > { %v4219_v10 = vpop.f32.mrf.mxu1  ;;  %v4105_v34 = vld [vmem:[#allocation2 + $0xeb] sm:$0xff]  ;;  %v4616_v28 = vpack.c.bf16 %v4585_v29, %v4584_v51 }
 0x438   : > { %v7253_v26 = vadd.f32 %v4219_v10, %v7128_v62  ;;  %5786 = vmatmul.msk.bf16.gmra.mxu2 %vm439_vm1, %v4614_v24  ;;  %5804 = vmatmul.msk.bf16.gmra.mxu3 %vm439_vm1, %v4615_v2  ;;  %v7257_v14 = vadd.f32 %v4014_v38, %v3816_v16  ;;  %v4832_v24 = vld [vmem:[#allocation2 + $0x6d] sm:$0xff] }
 0x439   : > { %v4863_v59 = vpack.c.bf16 %v4832_v24, %v4831_v25 }
 0x43a   : > { %5777 = vmatmul.msk.bf16.gmra.mxu1 %vm439_vm1, %v4126_v30 }
 0x43b   : > { %v3555_v8 = vpop.f32.mrf.mxu2  ;;  %v3766_v35 = vpop.f32.mrf.mxu3 }
 0x43c   : > { %v3556_v3 = vadd.f32 %v3555_v8, %v7117_v50  ;;  %v4019_v47 = vpop.f32.mrf.mxu0 }
 0x43e   : > { %v3817_v45 = vadd.f32 %v3766_v35, %v3556_v3 }
 0x43f   : > { %v4221_v44 = vpop.f32.mrf.mxu1 }
 0x440   : > { %v7262_v52 = vadd.f32 %v4221_v44, %v7136_v23  ;;  %v7264_v62 = vadd.f32 %v4017_v55, %v3817_v45  ;;  %v4104_v23 = vld [vmem:[#allocation2 + $0xe3] sm:$0xff] }
 0x441   : > { %v4127_v27 = vpack.c.bf16 %v4105_v34, %v4104_v23  ;;  %v4587_v44 = vld [vmem:[#allocation2 + $0x7c] sm:$0xff] }
 0x443   : > { %v3557_v60 = vpop.f32.mrf.mxu2  ;;  %v3768_v19 = vpop.f32.mrf.mxu3 }
 0x444   : > { %v3558_v38 = vadd.f32 %v3557_v60, %v7126_v22  ;;  %v4022_v63 = vpop.f32.mrf.mxu0  ;;  %v4833_v60 = vld [vmem:[#allocation2 + $0x75] sm:$0xff] }
 0x446   : > { %v3818_v50 = vadd.f32 %v3768_v19, %v3558_v38  ;;  %5823 = vmatmul.msk.bf16.gmra.mxu0 %vm439_vm1, %v4863_v59  ;;  %v4586_v19 = vld [vmem:[#allocation2 + $0x74] sm:$0xff] }
 0x447   : > { %v4224_v18 = vpop.f32.mrf.mxu1  ;;  %v4107_v38 = vld [vmem:[#allocation2 + $0xfb] sm:$0xff]  ;;  %v4617_v25 = vpack.c.bf16 %v4587_v44, %v4586_v19 }
 0x448   : > { %v7269_v55 = vadd.f32 %v4224_v18, %v7142_v4  ;;  %5787 = vmatmul.msk.bf16.gmra.mxu2 %vm439_vm1, %v4615_v2  ;;  %5805 = vmatmul.msk.bf16.gmra.mxu3 %vm439_vm1, %v4616_v28  ;;  %v7273_v22 = vadd.f32 %v4019_v47, %v3818_v50  ;;  %v4834_v2 = vld [vmem:[#allocation2 + $0x7d] sm:$0xff] }
 0x449   : > { %v4864_v29 = vpack.c.bf16 %v4834_v2, %v4833_v60 }
 0x44a   : > { %5778 = vmatmul.msk.bf16.gmra.mxu1 %vm439_vm1, %v4127_v27 }
 0x44b   : > { %v3560_v5 = vpop.f32.mrf.mxu2  ;;  %v3771_v16 = vpop.f32.mrf.mxu3 }
 0x44c   : > { %v3561_v10 = vadd.f32 %v3560_v5, %v7131_v21  ;;  %v4024_v36 = vpop.f32.mrf.mxu0 }
 0x44e   : > { %v3819_v30 = vadd.f32 %v3771_v16, %v3561_v10 }
 0x44f   : > { %v4226_v8 = vpop.f32.mrf.mxu1 }
 0x450   : > { %v7278_v35 = vadd.f32 %v4226_v8, %v7150_v11  ;;  %v7280_v4 = vadd.f32 %v4022_v63, %v3819_v30  ;;  %v4106_v11 = vld [vmem:[#allocation2 + $0xf3] sm:$0xff] }
 0x451   : > { %v4128_v59 = vpack.c.bf16 %v4107_v38, %v4106_v11  ;;  %v4589_v8 = vld [vmem:[#allocation2 + $0x8c] sm:$0xff] }
 0x453   : > { %v3562_v3 = vpop.f32.mrf.mxu2  ;;  %v3773_v45 = vpop.f32.mrf.mxu3 }
 0x454   : > { %v3563_v47 = vadd.f32 %v3562_v3, %v7140_v49  ;;  %v4027_v24 = vpop.f32.mrf.mxu0  ;;  %v4835_v3 = vld [vmem:[#allocation2 + $0x85] sm:$0xff] }
 0x456   : > { %v3820_v21 = vadd.f32 %v3773_v45, %v3563_v47  ;;  %5824 = vmatmul.msk.bf16.gmra.mxu0 %vm439_vm1, %v4864_v29  ;;  %v4588_v45 = vld [vmem:[#allocation2 + $0x84] sm:$0xff] }
 0x457   : > { %v4229_v51 = vpop.f32.mrf.mxu1  ;;  %v4109_v47 = vld [vmem:[#allocation2 + $0x10b] sm:$0xff]  ;;  %v4618_v60 = vpack.c.bf16 %v4589_v8, %v4588_v45 }
 0x458   : > { %v7285_v63 = vadd.f32 %v4229_v51, %v7156_v57  ;;  %5788 = vmatmul.msk.bf16.gmra.mxu2 %vm439_vm1, %v4616_v28  ;;  %5806 = vmatmul.msk.bf16.gmra.mxu3 %vm439_vm1, %v4617_v25  ;;  %v7289_v49 = vadd.f32 %v4024_v36, %v3820_v21  ;;  %v4836_v28 = vld [vmem:[#allocation2 + $0x8d] sm:$0xff] }
 0x459   : > { %v4865_v44 = vpack.c.bf16 %v4836_v28, %v4835_v3 }
 0x45a   : > { %5779 = vmatmul.msk.bf16.gmra.mxu1 %vm439_vm1, %v4128_v59 }
 0x45b   : > { %v3565_v34 = vpop.f32.mrf.mxu2  ;;  %v3776_v50 = vpop.f32.mrf.mxu3 }
 0x45c   : > { %v3566_v18 = vadd.f32 %v3565_v34, %v7145_v17  ;;  %v4029_v23 = vpop.f32.mrf.mxu0 }
 0x45e   : > { %v3821_v27 = vadd.f32 %v3776_v50, %v3566_v18 }
 0x45f   : > { %v4231_v5 = vpop.f32.mrf.mxu1 }
 0x460   : > { %v7294_v16 = vadd.f32 %v4231_v5, %v7164_v40  ;;  %v7296_v57 = vadd.f32 %v4027_v24, %v3821_v27  ;;  %v4108_v40 = vld [vmem:[#allocation2 + $0x103] sm:$0xff] }
 0x461   : > { %v4129_v29 = vpack.c.bf16 %v4109_v47, %v4108_v40  ;;  %v4591_v5 = vld [vmem:[#allocation2 + $0x9c] sm:$0xff] }
 0x463   : > { %v3567_v10 = vpop.f32.mrf.mxu2  ;;  %v3778_v30 = vpop.f32.mrf.mxu3 }
 0x464   : > { %v3568_v36 = vadd.f32 %v3567_v10, %v7154_v58  ;;  %v4032_v2 = vpop.f32.mrf.mxu0  ;;  %v4837_v10 = vld [vmem:[#allocation2 + $0x95] sm:$0xff] }
 0x466   : > { %v3822_v17 = vadd.f32 %v3778_v30, %v3568_v36  ;;  %5825 = vmatmul.msk.bf16.gmra.mxu0 %vm439_vm1, %v4865_v44  ;;  %v4590_v30 = vld [vmem:[#allocation2 + $0x94] sm:$0xff] }
 0x467   : > { %v4234_v19 = vpop.f32.mrf.mxu1  ;;  %v4111_v36 = vld [vmem:[#allocation2 + $0x11b] sm:$0xff]  ;;  %v4619_v3 = vpack.c.bf16 %v4591_v5, %v4590_v30 }
 0x468   : > { %v7301_v24 = vadd.f32 %v4234_v19, %v7170_v43  ;;  %5789 = vmatmul.msk.bf16.gmra.mxu2 %vm439_vm1, %v4617_v25  ;;  %5807 = vmatmul.msk.bf16.gmra.mxu3 %vm439_vm1, %v4618_v60  ;;  %v7305_v58 = vadd.f32 %v4029_v23, %v3822_v17  ;;  %v4838_v25 = vld [vmem:[#allocation2 + $0x9d] sm:$0xff] }
 0x469   : > { %v4866_v8 = vpack.c.bf16 %v4838_v25, %v4837_v10 }
 0x46a   : > { %5780 = vmatmul.msk.bf16.gmra.mxu1 %vm439_vm1, %v4129_v29 }
 0x46b   : > { %v3570_v38 = vpop.f32.mrf.mxu2  ;;  %v3781_v21 = vpop.f32.mrf.mxu3 }
 0x46c   : > { %v3571_v51 = vadd.f32 %v3570_v38, %v7159_v13  ;;  %v4034_v11 = vpop.f32.mrf.mxu0 }
 0x46e   : > { %v3823_v59 = vadd.f32 %v3781_v21, %v3571_v51 }
 0x46f   : > { %v4236_v34 = vpop.f32.mrf.mxu1 }
 0x470   : > { %v7310_v50 = vadd.f32 %v4236_v34, %v7178_v56  ;;  %v7312_v43 = vadd.f32 %v4032_v2, %v3823_v59  ;;  %v4110_v56 = vld [vmem:[#allocation2 + $0x113] sm:$0xff] }
 0x471   : > { %v4130_v44 = vpack.c.bf16 %v4111_v36, %v4110_v56  ;;  %v4593_v34 = vld [vmem:[#allocation2 + $0xac] sm:$0xff] }
 0x473   : > { %v3572_v18 = vpop.f32.mrf.mxu2  ;;  %v3783_v27 = vpop.f32.mrf.mxu3 }
 0x474   : > { %v3573_v23 = vadd.f32 %v3572_v18, %v7168_v39  ;;  %v4037_v28 = vpop.f32.mrf.mxu0  ;;  %v4839_v18 = vld [vmem:[#allocation2 + $0xa5] sm:$0xff] }
 0x476   : > { %v3824_v13 = vadd.f32 %v3783_v27, %v3573_v23  ;;  %5826 = vmatmul.msk.bf16.gmra.mxu0 %vm439_vm1, %v4866_v8  ;;  %v4592_v27 = vld [vmem:[#allocation2 + $0xa4] sm:$0xff] }
 0x477   : > { %v4239_v45 = vpop.f32.mrf.mxu1  ;;  %v4113_v23 = vld [vmem:[#allocation2 + $0x12b] sm:$0xff]  ;;  %v4620_v10 = vpack.c.bf16 %v4593_v34, %v4592_v27 }
 0x478   : > { %v7317_v2 = vadd.f32 %v4239_v45, %v7184_v9  ;;  %5790 = vmatmul.msk.bf16.gmra.mxu2 %vm439_vm1, %v4618_v60  ;;  %5808 = vmatmul.msk.bf16.gmra.mxu3 %vm439_vm1, %v4619_v3  ;;  %v7321_v39 = vadd.f32 %v4034_v11, %v3824_v13  ;;  %v4840_v60 = vld [vmem:[#allocation2 + $0xad] sm:$0xff] }
 0x479   : > { %v4867_v5 = vpack.c.bf16 %v4840_v60, %v4839_v18 }
 0x47a   : > { %5781 = vmatmul.msk.bf16.gmra.mxu1 %vm439_vm1, %v4130_v44 }
 0x47b   : > { %v3575_v47 = vpop.f32.mrf.mxu2  ;;  %v3786_v17 = vpop.f32.mrf.mxu3 }
 0x47c   : > { %v3576_v19 = vadd.f32 %v3575_v47, %v7173_v37  ;;  %v4039_v40 = vpop.f32.mrf.mxu0 }
 0x47e   : > { %v3825_v29 = vadd.f32 %v3786_v17, %v3576_v19 }
 0x47f   : > { %v4241_v38 = vpop.f32.mrf.mxu1 }
 0x480   : > { %v7326_v21 = vadd.f32 %v4241_v38, %v7193_v53  ;;  %v7328_v9 = vadd.f32 %v4037_v28, %v3825_v29  ;;  %v4112_v53 = vld [vmem:[#allocation2 + $0x123] sm:$0xff] }
 0x481   : > { %v4131_v8 = vpack.c.bf16 %v4113_v23, %v4112_v53  ;;  %v4595_v38 = vld [vmem:[#allocation2 + $0xbc] sm:$0xff] }
 0x483   : > { %v3577_v51 = vpop.f32.mrf.mxu2  ;;  %v3788_v59 = vpop.f32.mrf.mxu3 }
 0x484   : > { %v3578_v11 = vadd.f32 %v3577_v51, %v7182_v7  ;;  %v4948_v25 = vpop.f32.mrf.mxu0  ;;  %v4841_v51 = vld [vmem:[#allocation2 + $0xb5] sm:$0xff] }
 0x486   : > { %v3826_v37 = vadd.f32 %v3788_v59, %v3578_v11  ;;  %5827 = vmatmul.msk.bf16.gmra.mxu0 %vm439_vm1, %v4867_v5  ;;  %v4594_v59 = vld [vmem:[#allocation2 + $0xb4] sm:$0xff] }
 0x487   : > { %v4244_v30 = vpop.f32.mrf.mxu1  ;;  %v5075_v11 = vld [vmem:[#allocation2 + $0x2e] sm:$0xff]  ;;  %v4621_v18 = vpack.c.bf16 %v4595_v38, %v4594_v59 }
 0x488   : > { %v7333_v28 = vadd.f32 %v4244_v30, %v7200_v20  ;;  %5791 = vmatmul.msk.bf16.gmra.mxu2 %vm439_vm1, %v4619_v3  ;;  %5809 = vmatmul.msk.bf16.gmra.mxu3 %vm439_vm1, %v4620_v10  ;;  %v7337_v7 = vadd.f32 %v4039_v40, %v3826_v37  ;;  %v4842_v3 = vld [vmem:[#allocation2 + $0xbd] sm:$0xff] }
 0x489   : > { %v4868_v34 = vpack.c.bf16 %v4842_v3, %v4841_v51 }
 0x48a   : > { %5782 = vmatmul.msk.bf16.gmra.mxu1 %vm439_vm1, %v4131_v8 }
 0x48b   : > { %v4450_v36 = vpop.f32.mrf.mxu2  ;;  %v4697_v13 = vpop.f32.mrf.mxu3 }
 0x48c   : > { %v4540_v45 = vadd.f32 %v4450_v36, %v7189_v32  ;;  %v4950_v56 = vpop.f32.mrf.mxu0 }
 0x48e   : > { %v4787_v44 = vadd.f32 %v4697_v13, %v4540_v45 }
 0x48f   : > { %v4246_v47 = vpop.f32.mrf.mxu1 }
 0x490   : > { %v7342_v17 = vadd.f32 %v4246_v47, %v7209_v46  ;;  %v7344_v20 = vadd.f32 %v4948_v25, %v4787_v44  ;;  %v5074_v46 = vld [vmem:[#allocation2 + $0x26] sm:$0xff] }
 0x491   : > { %v5110_v5 = vpack.c.bf16 %v5075_v11, %v5074_v46  ;;  %v4597_v47 = vld [vmem:[#allocation2 + $0xcc] sm:$0xff] }
 0x493   : > { %v4452_v19 = vpop.f32.mrf.mxu2  ;;  %v4699_v29 = vpop.f32.mrf.mxu3 }
 0x494   : > { %v4541_v40 = vadd.f32 %v4452_v19, %v7198_v6  ;;  %v4953_v60 = vpop.f32.mrf.mxu0  ;;  %v4843_v19 = vld [vmem:[#allocation2 + $0xc5] sm:$0xff] }
 0x496   : > { %v4788_v32 = vadd.f32 %v4699_v29, %v4541_v40  ;;  %5828 = vmatmul.msk.bf16.gmra.mxu0 %vm439_vm1, %v4868_v34  ;;  %v4596_v29 = vld [vmem:[#allocation2 + $0xc4] sm:$0xff] }
 0x497   : > { %v4249_v27 = vpop.f32.mrf.mxu1  ;;  %v5077_v40 = vld [vmem:[#allocation2 + $0x3e] sm:$0xff]  ;;  %v4622_v51 = vpack.c.bf16 %v4597_v47, %v4596_v29 }
 0x498   : > { %v7349_v25 = vadd.f32 %v4249_v27, %v7216_v12  ;;  %5792 = vmatmul.msk.bf16.gmra.mxu2 %vm439_vm1, %v4620_v10  ;;  %5810 = vmatmul.msk.bf16.gmra.mxu3 %vm439_vm1, %v4621_v18  ;;  %v7353_v6 = vadd.f32 %v4950_v56, %v4788_v32  ;;  %v4844_v10 = vld [vmem:[#allocation2 + $0xcd] sm:$0xff] }
 0x499   : > { %v4869_v38 = vpack.c.bf16 %v4844_v10, %v4843_v19 }
 0x49a   : > { %5837 = vmatmul.msk.bf16.vlgmr.msra.gmra.mxu1 %vm439_vm1, %v5110_v5 }
 0x49b   : > { %v4455_v23 = vpop.f32.mrf.mxu2  ;;  %v4702_v37 = vpop.f32.mrf.mxu3 }
 0x49c   : > { %v4542_v30 = vadd.f32 %v4455_v23, %v7205_v48  ;;  %v4955_v53 = vpop.f32.mrf.mxu0 }
 0x49e   : > { %v4789_v8 = vadd.f32 %v4702_v37, %v4542_v30 }
 0x49f   : > { %v4251_v36 = vpop.f32.mrf.mxu1 }
 0x4a0   : > { %v7358_v13 = vadd.f32 %v4251_v36, %v7225_v33  ;;  %v7360_v12 = vadd.f32 %v4953_v60, %v4789_v8  ;;  %v5076_v33 = vld [vmem:[#allocation2 + $0x36] sm:$0xff] }
 0x4a1   : > { %v5111_v34 = vpack.c.bf16 %v5077_v40, %v5076_v33  ;;  %v4599_v36 = vld [vmem:[#allocation2 + $0xdc] sm:$0xff] }
 0x4a3   : > { %v4457_v45 = vpop.f32.mrf.mxu2  ;;  %v4704_v44 = vpop.f32.mrf.mxu3 }
 0x4a4   : > { %v4543_v56 = vadd.f32 %v4457_v45, %v7214_v41  ;;  %v4958_v3 = vpop.f32.mrf.mxu0  ;;  %v4845_v45 = vld [vmem:[#allocation2 + $0xd5] sm:$0xff] }
 0x4a6   : > { %v4790_v48 = vadd.f32 %v4704_v44, %v4543_v56  ;;  %5829 = vmatmul.msk.bf16.gmra.mxu0 %vm439_vm1, %v4869_v38  ;;  %v4598_v44 = vld [vmem:[#allocation2 + $0xd4] sm:$0xff] }
 0x4a7   : > { %v4254_v59 = vpop.f32.mrf.mxu1  ;;  %v5079_v56 = vld [vmem:[#allocation2 + $0x4e] sm:$0xff]  ;;  %v4623_v19 = vpack.c.bf16 %v4599_v36, %v4598_v44  ;;  %v5081_v36 = vld [vmem:[#allocation2 + $0x5e] sm:$0xff]  ;;  %v5080_v44 = vld [vmem:[#allocation2 + $0x56] sm:$0xff] }
 0x4a8   : > { %v7365_v60 = vadd.f32 %v4254_v59, %v7232_v42  ;;  %5793 = vmatmul.msk.bf16.gmra.mxu2 %vm439_vm1, %v4621_v18  ;;  %5811 = vmatmul.msk.bf16.gmra.mxu3 %vm439_vm1, %v4622_v51  ;;  %v7369_v41 = vadd.f32 %v4955_v53, %v4790_v48  ;;  %v4846_v18 = vld [vmem:[#allocation2 + $0xdd] sm:$0xff] }
 0x4a9   : > { %v4870_v47 = vpack.c.bf16 %v4846_v18, %v4845_v45  ;;  %v4847_v18 = vld [vmem:[#allocation2 + $0xe5] sm:$0xff] }
 0x4aa   : > { %5838 = vmatmul.msk.bf16.gmra.mxu1 %vm439_vm1, %v5111_v34 }
 0x4ab   : > { %v4460_v11 = vpop.f32.mrf.mxu2  ;;  %v4707_v32 = vpop.f32.mrf.mxu3 }
 0x4ac   : > { %v4544_v27 = vadd.f32 %v4460_v11, %v7221_v31  ;;  %v4960_v46 = vpop.f32.mrf.mxu0 }
 0x4ae   : > { %v4791_v5 = vadd.f32 %v4707_v32, %v4544_v27 }
 0x4af   : > { %v4256_v23 = vpop.f32.mrf.mxu1 }
 0x4b0   : > { %v7374_v37 = vadd.f32 %v4256_v23, %v7241_v61  ;;  %v7376_v42 = vadd.f32 %v4958_v3, %v4791_v5  ;;  %v5078_v61 = vld [vmem:[#allocation2 + $0x46] sm:$0xff] }
 0x4b1   : > { %v5112_v38 = vpack.c.bf16 %v5079_v56, %v5078_v61  ;;  %v4601_v23 = vld [vmem:[#allocation2 + $0xec] sm:$0xff] }
 0x4b3   : > { %v4462_v30 = vpop.f32.mrf.mxu2  ;;  %v4709_v8 = vpop.f32.mrf.mxu3 }
 0x4b4   : > { %v4545_v53 = vadd.f32 %v4462_v30, %v7230_v54  ;;  %v4963_v10 = vpop.f32.mrf.mxu0  ;;  %v4600_v30 = vld [vmem:[#allocation2 + $0xe4] sm:$0xff] }
 0x4b6   : > { %v4792_v31 = vadd.f32 %v4709_v8, %v4545_v53  ;;  %5830 = vmatmul.msk.bf16.gmra.mxu0 %vm439_vm1, %v4870_v47  ;;  %v5113_v47 = vpack.c.bf16 %v5081_v36, %v5080_v44 }
 0x4b7   : > { %v4259_v29 = vpop.f32.mrf.mxu1 }
 0x4b8   : > { %v7381_v3 = vadd.f32 %v4259_v29, %v7248_v0  ;;  %5794 = vmatmul.msk.bf16.gmra.mxu2 %vm439_vm1, %v4622_v51  ;;  %5812 = vmatmul.msk.bf16.gmra.mxu3 %vm439_vm1, %v4623_v19  ;;  %v7385_v54 = vadd.f32 %v4960_v46, %v4792_v31  ;;  %v4848_v51 = vld [vmem:[#allocation2 + $0xed] sm:$0xff] }
 0x4b9   : > { %v4871_v8 = vpack.c.bf16 %v4848_v51, %v4847_v18  ;;  %v4849_v51 = vld [vmem:[#allocation2 + $0xf5] sm:$0xff] }
 0x4ba   : > { %5839 = vmatmul.msk.bf16.gmra.mxu1 %vm439_vm1, %v5112_v38 }
 0x4bb   : > { %v4465_v40 = vpop.f32.mrf.mxu2  ;;  %v4712_v48 = vpop.f32.mrf.mxu3 }
 0x4bc   : > { %v4546_v59 = vadd.f32 %v4465_v40, %v7237_v15  ;;  %v4965_v34 = vpop.f32.mrf.mxu0  ;;  %v4624_v15 = vpack.c.bf16 %v4601_v23, %v4600_v30  ;;  %v5083_v23 = vld [vmem:[#allocation2 + $0x6e] sm:$0xff] }
 0x4be   : > { %v4793_v33 = vadd.f32 %v4712_v48, %v4546_v59 }
 0x4bf   : > { %v4261_v11 = vpop.f32.mrf.mxu1 }
 0x4c0   : > { %v7390_v32 = vadd.f32 %v4261_v11, %v7257_v14  ;;  %v7392_v0 = vadd.f32 %v4963_v10, %v4793_v33  ;;  %v4603_v11 = vld [vmem:[#allocation2 + $0xfc] sm:$0xff] }
 0x4c3   : > { %v4467_v27 = vpop.f32.mrf.mxu2  ;;  %v4714_v5 = vpop.f32.mrf.mxu3 }
 0x4c4   : > { %v4547_v46 = vadd.f32 %v4467_v27, %v7246_v1  ;;  %v4968_v14 = vpop.f32.mrf.mxu0  ;;  %v4602_v27 = vld [vmem:[#allocation2 + $0xf4] sm:$0xff] }
 0x4c6   : > { %v4794_v53 = vadd.f32 %v4714_v5, %v4547_v46  ;;  %5831 = vmatmul.msk.bf16.gmra.mxu0 %vm439_vm1, %v4871_v8 }
 0x4c7   : > { %v4264_v45 = vpop.f32.mrf.mxu1 }
 0x4c8   : > { %v7397_v10 = vadd.f32 %v4264_v45, %v7264_v62  ;;  %5795 = vmatmul.msk.bf16.gmra.mxu2 %vm439_vm1, %v4623_v19  ;;  %5813 = vmatmul.msk.bf16.gmra.mxu3 %vm439_vm1, %v4624_v15  ;;  %v7401_v1 = vadd.f32 %v4965_v34, %v4794_v53  ;;  %v4850_v19 = vld [vmem:[#allocation2 + $0xfd] sm:$0xff] }
 0x4c9   : > { %v4872_v5 = vpack.c.bf16 %v4850_v19, %v4849_v51  ;;  %v4604_v19 = vld [vmem:[#allocation2 + $0x104] sm:$0xff] }
 0x4ca   : > { %5840 = vmatmul.msk.bf16.gmra.mxu1 %vm439_vm1, %v5113_v47 }
 0x4cb   : > { %v4470_v56 = vpop.f32.mrf.mxu2  ;;  %v4717_v31 = vpop.f32.mrf.mxu3 }
 0x4cc   : > { %v4548_v29 = vadd.f32 %v4470_v56, %v7253_v26  ;;  %v4970_v48 = vpop.f32.mrf.mxu0  ;;  %v4625_v26 = vpack.c.bf16 %v4603_v11, %v4602_v27 }
 0x4ce   : > { %v4795_v61 = vadd.f32 %v4717_v31, %v4548_v29  ;;  %v4605_v29 = vld [vmem:[#allocation2 + $0x10c] sm:$0xff] }
 0x4cf   : > { %v4266_v38 = vpop.f32.mrf.mxu1 }
 0x4d0   : > { %v7406_v40 = vadd.f32 %v4266_v38, %v7273_v22  ;;  %v7408_v62 = vadd.f32 %v4968_v14, %v4795_v61  ;;  %v5082_v22 = vld [vmem:[#allocation2 + $0x66] sm:$0xff] }
 0x4d1   : > { %v5114_v8 = vpack.c.bf16 %v5083_v23, %v5082_v22  ;;  %v4851_v38 = vld [vmem:[#allocation2 + $0x105] sm:$0xff]  ;;  %v4607_v22 = vld [vmem:[#allocation2 + $0x11c] sm:$0xff] }
 0x4d3   : > { %v4472_v59 = vpop.f32.mrf.mxu2  ;;  %v4719_v33 = vpop.f32.mrf.mxu3 }
 0x4d4   : > { %v4549_v34 = vadd.f32 %v4472_v59, %v7262_v52  ;;  %v4973_v44 = vpop.f32.mrf.mxu0 }
 0x4d6   : > { %v4796_v46 = vadd.f32 %v4719_v33, %v4549_v34  ;;  %5832 = vmatmul.msk.bf16.gmra.mxu0 %vm439_vm1, %v4872_v5  ;;  %v5085_v33 = vld [vmem:[#allocation2 + $0x7e] sm:$0xff] }
 0x4d7   : > { %v4269_v18 = vpop.f32.mrf.mxu1 }
 0x4d8   : > { %v7413_v30 = vadd.f32 %v4269_v18, %v7280_v4  ;;  %5796 = vmatmul.msk.bf16.gmra.mxu2 %vm439_vm1, %v4624_v15  ;;  %5814 = vmatmul.msk.bf16.gmra.mxu3 %vm439_vm1, %v4625_v26  ;;  %v7417_v36 = vadd.f32 %v4970_v48, %v4796_v46  ;;  %v4852_v15 = vld [vmem:[#allocation2 + $0x10d] sm:$0xff]  ;;  %v4854_v18 = vld [vmem:[#allocation2 + $0x11d] sm:$0xff] }
 0x4d9   : > { %v4873_v59 = vpack.c.bf16 %v4852_v15, %v4851_v38  ;;  %v4609_v38 = vld [vmem:[#allocation2 + $0x12c] sm:$0xff] }
 0x4da   : > { %5841 = vmatmul.msk.bf16.gmra.mxu1 %vm439_vm1, %v5114_v8  ;;  %v4853_v8 = vld [vmem:[#allocation2 + $0x115] sm:$0xff] }
 0x4db   : > { %v4475_v52 = vpop.f32.mrf.mxu2  ;;  %v4722_v53 = vpop.f32.mrf.mxu3 }
 0x4dc   : > { %v4550_v45 = vadd.f32 %v4475_v52, %v7269_v55  ;;  %v4626_v55 = vpack.c.bf16 %v4605_v29, %v4604_v19  ;;  %v4975_v34 = vpop.f32.mrf.mxu0  ;;  %v4606_v52 = vld [vmem:[#allocation2 + $0x114] sm:$0xff]  ;;  %v5089_v19 = vld [vmem:[#allocation2 + $0x9e] sm:$0xff] }
 0x4dd   : > { %v4856_v29 = vld [vmem:[#allocation2 + $0x12d] sm:$0xff] }
 0x4de   : > { %v4797_v14 = vadd.f32 %v4722_v53, %v4550_v45  ;;  %v4874_v53 = vpack.c.bf16 %v4854_v18, %v4853_v8  ;;  %v4627_v45 = vpack.c.bf16 %v4607_v22, %v4606_v52  ;;  %v5321_v52 = vld [vmem:[%s5952_s12 + $0x13] sm:$0xff] }
 0x4df   : > { %v4271_v47 = vpop.f32.mrf.mxu1 }
 0x4e0   : > { %v7422_v56 = vadd.f32 %v4271_v47, %v7289_v49  ;;  %v7424_v4 = vadd.f32 %v4973_v44, %v4797_v14  ;;  %v5084_v49 = vld [vmem:[#allocation2 + $0x76] sm:$0xff] }
 0x4e3   : > { %v4477_v31 = vpop.f32.mrf.mxu2  ;;  %v4724_v48 = vpop.f32.mrf.mxu3 }
 0x4e4   : > { %v4551_v61 = vadd.f32 %v4477_v31, %v7278_v35  ;;  %v5115_v35 = vpack.c.bf16 %v5085_v33, %v5084_v49  ;;  %v4855_v31 = vld [vmem:[#allocation2 + $0x125] sm:$0xff]  ;;  %v5088_v33 = vld [vmem:[#allocation2 + $0x96] sm:$0xff] }
 0x4e5   : > { %v4858_v49 = vld [vmem:[#allocation2 + $0x13d] sm:$0xff] }
 0x4e6   : > { %v4798_v11 = vadd.f32 %v4724_v48, %v4551_v61  ;;  %5833 = vmatmul.msk.bf16.gmra.mxu0 %vm439_vm1, %v4873_v59  ;;  %v4608_v61 = vld [vmem:[#allocation2 + $0x124] sm:$0xff]  ;;  %v4875_v48 = vpack.c.bf16 %v4856_v29, %v4855_v31 }
 0x4e7   : > { %v4274_v51 = vpop.f32.mrf.mxu1  ;;  %v4628_v59 = vpack.c.bf16 %v4609_v38, %v4608_v61  ;;  %v5093_v61 = vld [vmem:[#allocation2 + $0xbe] sm:$0xff] }
 0x4e8   : > { %v7429_v27 = vadd.f32 %v4274_v51, %v7296_v57  ;;  %5797 = vmatmul.msk.bf16.gmra.mxu2 %vm439_vm1, %v4625_v26  ;;  %5815 = vmatmul.msk.bf16.gmra.mxu3 %vm439_vm1, %v4626_v55  ;;  %v7433_v5 = vadd.f32 %v4975_v34, %v4798_v11  ;;  %v5087_v57 = vld [vmem:[#allocation2 + $0x8e] sm:$0xff]  ;;  %v5086_v26 = vld [vmem:[#allocation2 + $0x86] sm:$0xff] }
 0x4e9   : > { %v4857_v51 = vld [vmem:[#allocation2 + $0x135] sm:$0xff] }
 0x4ea   : > { %5842 = vmatmul.msk.bf16.gmra.mxu1 %vm439_vm1, %v5115_v35  ;;  %v4610_v35 = vld [vmem:[#allocation2 + $0x134] sm:$0xff]  ;;  %v4876_v18 = vpack.c.bf16 %v4858_v49, %v4857_v51 }
 0x4ef   : > { %v4276_v23 = vpop.f32.mrf.mxu1 }
 0x4f0   : > { %v7437_v46 = vadd.f32 %v4276_v23, %v7305_v58  ;;  %v5116_v58 = vpack.c.bf16 %v5087_v57, %v5086_v26  ;;  %v4611_v23 = vld [vmem:[#allocation2 + $0x13c] sm:$0xff] }
 0x4f1   : > { %v4629_v22 = vpack.c.bf16 %v4611_v23, %v4610_v35  ;;  %v5095_v23 = vld [vmem:[#allocation2 + $0xce] sm:$0xff] }
 0x4f6   : > { %5834 = vmatmul.msk.bf16.gmra.mxu0 %vm439_vm1, %v4874_v53  ;;  %v5090_v53 = vld [vmem:[#allocation2 + $0xa6] sm:$0xff] }
 0x4f7   : > { %v4279_v44 = vpop.f32.mrf.mxu1 }
 0x4f8   : > { %v7441_v14 = vadd.f32 %v4279_v44, %v7312_v43  ;;  %5798 = vmatmul.msk.bf16.gmra.mxu2 %vm439_vm1, %v4626_v55  ;;  %5816 = vmatmul.msk.bf16.gmra.mxu3 %vm439_vm1, %v4627_v45 }
 0x4fa   : > { %5843 = vmatmul.msk.bf16.gmra.mxu1 %vm439_vm1, %v5116_v58  ;;  %v5322_v58 = vld [vmem:[%s5952_s12 + $0x1b] sm:$0xff] }
 0x4ff   : > { %v4281_v47 = vpop.f32.mrf.mxu1 }
 0x500   : > { %v7447_v15 = vadd.f32 %v4281_v47, %v7321_v39  ;;  %v5117_v39 = vpack.c.bf16 %v5089_v19, %v5088_v33  ;;  %v5092_v19 = vld [vmem:[#allocation2 + $0xb6] sm:$0xff] }
 0x506   : > { %5835 = vmatmul.msk.bf16.gmra.mxu0 %vm439_vm1, %v4875_v48  ;;  %v5323_v48 = vld [vmem:[%s5952_s12 + $0x23] sm:$0xff] }
 0x507   : > { %v4284_v43 = vpop.f32.mrf.mxu1 }
 0x508   : > { %v7451_v11 = vadd.f32 %v4284_v43, %v7328_v9  ;;  %5799 = vmatmul.msk.bf16.gmra.mxu2 %vm439_vm1, %v4627_v45  ;;  %5817 = vmatmul.msk.bf16.gmra.mxu3 %vm439_vm1, %v4628_v59  ;;  %v5091_v9 = vld [vmem:[#allocation2 + $0xae] sm:$0xff]  ;;  %v5119_v43 = vpack.c.bf16 %v5093_v61, %v5092_v19  ;;  %v5327_v61 = vld [vmem:[%s5952_s12 + $0x43] sm:$0xff] }
 0x509   : > { %v5118_v45 = vpack.c.bf16 %v5091_v9, %v5090_v53  ;;  %v4480_v53 = vpop.f32.mrf.mxu2 }
 0x50a   : > { %5844 = vmatmul.msk.bf16.gmra.mxu1 %vm439_vm1, %v5117_v39 }
 0x50f   : > { %v4286_v55 = vpop.f32.mrf.mxu1 }
 0x510   : > { %v7457_v34 = vadd.f32 %v4286_v55, %v7337_v7  ;;  %v7466_v7 = vld [vmem:[%s7712_s4] ss:$0 sm:$0xff]  ;;  %v5324_v55 = vld [vmem:[%s5952_s12 + $0x2b] sm:$0xff] }
 0x516   : > { %5836 = vmatmul.msk.bf16.gmra.mxu0 %vm439_vm1, %v4876_v18  ;;  %v5325_v18 = vld [vmem:[%s5952_s12 + $0x33] sm:$0xff] }
 0x517   : > { %v5195_v8 = vpop.f32.mrf.mxu1 }
 0x518   : > { %v5285_v57 = vadd.f32 %v5195_v8, %v7344_v20  ;;  %5800 = vmatmul.msk.bf16.gmra.mxu2 %vm439_vm1, %v4628_v59  ;;  %5818 = vmatmul.msk.bf16.gmra.mxu3 %vm439_vm1, %v4629_v22  ;;  %v5094_v22 = vld [vmem:[#allocation2 + $0xc6] sm:$0xff] }
 0x519   : > { %v5120_v8 = vpack.c.bf16 %v5095_v23, %v5094_v22  ;;  %v5098_v22 = vld [vmem:[#allocation2 + $0xe6] sm:$0xff] }
 0x51a   : > { %v5357_v44 = vadd.f32 %v5321_v52, %v5285_v57  ;;  %5845 = vmatmul.msk.bf16.gmra.mxu1 %vm439_vm1, %v5118_v45  ;;  %v5326_v45 = vld [vmem:[%s5952_s12 + $0x3b] sm:$0xff] }
 0x51c   : > { %v5397_v20 = vadd.f32 %v7466_v7, %v5357_v44 }
 0x51e   : > { %5433 = vst.msk [vmem:[%s7474_s14] sm:$0xff] %vm439_vm1, %v5397_v20 }
 0x51f   : > { %v5197_v26 = vpop.f32.mrf.mxu1 }
 0x520   : > { %v5286_v47 = vadd.f32 %v5197_v26, %v7353_v6  ;;  %v7503_v26 = vpop.f32.mrf.mxu3 }
 0x522   : > { %v5358_v31 = vadd.f32 %v5322_v58, %v5286_v47  ;;  %v5097_v58 = vld [vmem:[#allocation2 + $0xde] sm:$0xff]  ;;  %v7506_v47 = vpop.f32.mrf.mxu0 }
 0x524   : > { %v5398_v29 = vadd.f32 %v7466_v7, %v5358_v31  ;;  %v7510_v31 = vpop.f32.mrf.mxu2 }
 0x526   : > { %5434 = vst.msk [vmem:[%s7474_s14 + $0x8] sm:$0xff] %vm439_vm1, %v5398_v29 }
 0x527   : > { %v5200_v38 = vpop.f32.mrf.mxu1 }
 0x528   : > { %v5287_v59 = vadd.f32 %v5200_v38, %v7360_v12  ;;  %v5096_v38 = vld [vmem:[#allocation2 + $0xd6] sm:$0xff] }
 0x52a   : > { %v5359_v33 = vadd.f32 %v5323_v48, %v5287_v59  ;;  %5846 = vmatmul.msk.bf16.gmra.mxu1 %vm439_vm1, %v5119_v43  ;;  %v5121_v48 = vpack.c.bf16 %v5097_v58, %v5096_v38  ;;  %v7516_v43 = vpop.f32.mrf.mxu3  ;;  %v5101_v38 = vld [vmem:[#allocation2 + $0xfe] sm:$0xff] }
 0x52c   : > { %v5399_v39 = vadd.f32 %v7466_v7, %v5359_v33 }
 0x52e   : > { %5435 = vst.msk [vmem:[%s7474_s14 + $0x10] sm:$0xff] %vm439_vm1, %v5399_v39  ;;  %v5328_v39 = vld [vmem:[%s5952_s12 + $0x4b] sm:$0xff] }
 0x52f   : > { %v5202_v6 = vpop.f32.mrf.mxu1 }
 0x530   : > { %v5288_v51 = vadd.f32 %v5202_v6, %v7369_v41  ;;  %v7521_v6 = vpop.f32.mrf.mxu0 }
 0x532   : > { %v5360_v49 = vadd.f32 %v5324_v55, %v5288_v51  ;;  %v4485_v51 = vpop.f32.mrf.mxu2  ;;  %v7527_v23 = vpop.f32.mrf.mxu3 }
 0x534   : > { %v5400_v35 = vadd.f32 %v7466_v7, %v5360_v49 }
 0x536   : > { %5436 = vst.msk [vmem:[%s7474_s14 + $0x18] sm:$0xff] %vm439_vm1, %v5400_v35  ;;  %v5099_v35 = vld [vmem:[#allocation2 + $0xee] sm:$0xff] }
 0x537   : > { %v5205_v12 = vpop.f32.mrf.mxu1 }
 0x538   : > { %v5289_v9 = vadd.f32 %v5205_v12, %v7376_v42 }
 0x53a   : > { %v5361_v52 = vadd.f32 %v5325_v18, %v5289_v9  ;;  %5847 = vmatmul.msk.bf16.gmra.mxu1 %vm439_vm1, %v5120_v8  ;;  %v5329_v18 = vld [vmem:[%s5952_s12 + $0x53] sm:$0xff]  ;;  %v5122_v8 = vpack.c.bf16 %v5099_v35, %v5098_v22 }
 0x53c   : > { %v5401_v41 = vadd.f32 %v7466_v7, %v5361_v52  ;;  %v7531_v52 = vpop.f32.mrf.mxu0 }
 0x53e   : > { %5437 = vst.msk [vmem:[%s7474_s14 + $0x20] sm:$0xff] %vm439_vm1, %v5401_v41  ;;  %v4487_v41 = vpop.f32.mrf.mxu2 }
 0x53f   : > { %v5207_v57 = vpop.f32.mrf.mxu1 }
 0x540   : > { %v5290_v44 = vadd.f32 %v5207_v57, %v7385_v54 }
 0x542   : > { %v5362_v20 = vadd.f32 %v5326_v45, %v5290_v44  ;;  %v5330_v44 = vld [vmem:[%s5952_s12 + $0x5b] sm:$0xff] }
 0x544   : > { %v5402_v42 = vadd.f32 %v7466_v7, %v5362_v20  ;;  %v7541_v58 = vpop.f32.mrf.mxu0 }
 0x546   : > { %5438 = vst.msk [vmem:[%s7474_s14 + $0x28] sm:$0xff] %vm439_vm1, %v5402_v42  ;;  %v7539_v42 = vpop.f32.mrf.mxu3 }
 0x547   : > { %v5210_v29 = vpop.f32.mrf.mxu1 }
 0x548   : > { %v5291_v54 = vadd.f32 %v5210_v29, %v7392_v0 }
 0x54a   : > { %v5363_v19 = vadd.f32 %v5327_v61, %v5291_v54  ;;  %5848 = vmatmul.msk.bf16.gmra.mxu1 %vm439_vm1, %v5121_v48  ;;  %v7544_v61 = vpop.f32.mrf.mxu2  ;;  %v5331_v48 = vld [vmem:[%s5952_s12 + $0x63] sm:$0xff] }
 0x54c   : > { %v5403_v59 = vadd.f32 %v7466_v7, %v5363_v19  ;;  %v5100_v19 = vld [vmem:[#allocation2 + $0xf6] sm:$0xff] }
 0x54e   : > { %5439 = vst.msk [vmem:[%s7474_s14 + $0x30] sm:$0xff] %vm439_vm1, %v5403_v59 }
 0x54f   : > { %v5212_v33 = vpop.f32.mrf.mxu1 }
 0x550   : > { %v5292_v55 = vadd.f32 %v5212_v33, %v7401_v1 }
 0x552   : > { %v5364_v0 = vadd.f32 %v5328_v39, %v5292_v55  ;;  %v4737_v39 = vpop.f32.mrf.mxu3  ;;  %v7557_v35 = vpop.f32.mrf.mxu2 }
 0x554   : > { %v5404_v49 = vadd.f32 %v7466_v7, %v5364_v0  ;;  %v4552_v0 = vadd.f32 %v4480_v53, %v7285_v63  ;;  %v4553_v63 = vadd.f32 %v7510_v31, %v7294_v16  ;;  %v4554_v31 = vadd.f32 %v4485_v51, %v7301_v24  ;;  %v5335_v51 = vld [vmem:[%s5952_s12 + $0x83] sm:$0xff] }
 0x556   : > { %5440 = vst.msk [vmem:[%s7474_s14 + $0x38] sm:$0xff] %vm439_vm1, %v5404_v49  ;;  %v7553_v49 = vpop.f32.mrf.mxu0  ;;  %v4799_v22 = vadd.f32 %v7503_v26, %v4552_v0 }
 0x557   : > { %v5215_v12 = vpop.f32.mrf.mxu1 }
 0x558   : > { %v5293_v9 = vadd.f32 %v5215_v12, %v7408_v62  ;;  %v5050_v53 = vadd.f32 %v7506_v47, %v4799_v22  ;;  %v5104_v22 = vld [vmem:[#allocation2 + $0x116] sm:$0xff] }
 0x55a   : > { %v5365_v1 = vadd.f32 %v5329_v18, %v5293_v9  ;;  %5849 = vmatmul.msk.bf16.gmra.mxu1 %vm439_vm1, %v5122_v8  ;;  %v5332_v18 = vld [vmem:[%s5952_s12 + $0x6b] sm:$0xff] }
 0x55c   : > { %v5405_v57 = vadd.f32 %v7466_v7, %v5365_v1  ;;  %v7563_v1 = vpop.f32.mrf.mxu3 }
 0x55e   : > { %5441 = vst.msk [vmem:[%s7474_s14 + $0x40] sm:$0xff] %vm439_vm1, %v5405_v57  ;;  %v5103_v57 = vld [vmem:[#allocation2 + $0x10e] sm:$0xff] }
 0x55f   : > { %v5217_v45 = vpop.f32.mrf.mxu1 }
 0x560   : > { %v5294_v20 = vadd.f32 %v5217_v45, %v7417_v36  ;;  %v5123_v36 = vpack.c.bf16 %v5101_v38, %v5100_v19  ;;  %v4800_v38 = vadd.f32 %v7516_v43, %v4553_v63 }
 0x562   : > { %v5366_v62 = vadd.f32 %v5330_v44, %v5294_v20  ;;  %v5333_v44 = vld [vmem:[%s5952_s12 + $0x73] sm:$0xff]  ;;  %v7571_v20 = vpop.f32.mrf.mxu0  ;;  %v5051_v47 = vadd.f32 %v7521_v6, %v4800_v38 }
 0x564   : > { %v5406_v29 = vadd.f32 %v7466_v7, %v5366_v62 }
 0x566   : > { %5442 = vst.msk [vmem:[%s7474_s14 + $0x48] sm:$0xff] %vm439_vm1, %v5406_v29  ;;  %v4495_v29 = vpop.f32.mrf.mxu2 }
 0x567   : > { %v5220_v54 = vpop.f32.mrf.mxu1 }
 0x568   : > { %v5295_v59 = vadd.f32 %v5220_v54, %v7424_v4 }
 0x56a   : > { %v5367_v33 = vadd.f32 %v5331_v48, %v5295_v59  ;;  %5850 = vmatmul.msk.bf16.gmra.mxu1 %vm439_vm1, %v5123_v36  ;;  %v4742_v48 = vpop.f32.mrf.mxu3  ;;  %v5334_v59 = vld [vmem:[%s5952_s12 + $0x7b] sm:$0xff]  ;;  %v4993_v43 = vpop.f32.mrf.mxu0 }
 0x56c   : > { %v5407_v55 = vadd.f32 %v7466_v7, %v5367_v33  ;;  %v4801_v33 = vadd.f32 %v7527_v23, %v4554_v31  ;;  %v5107_v31 = vld [vmem:[#allocation2 + $0x12e] sm:$0xff] }
 0x56e   : > { %5443 = vst.msk [vmem:[%s7474_s14 + $0x50] sm:$0xff] %vm439_vm1, %v5407_v55  ;;  %v4497_v0 = vpop.f32.mrf.mxu2  ;;  %v5052_v24 = vadd.f32 %v7531_v52, %v4801_v33  ;;  %v4556_v52 = vadd.f32 %v7544_v61, %v7317_v2 }
 0x56f   : > { %v5222_v12 = vpop.f32.mrf.mxu1 }
 0x570   : > { %v5296_v4 = vadd.f32 %v5222_v12, %v7433_v5  ;;  %v5102_v5 = vld [vmem:[#allocation2 + $0x106] sm:$0xff] }
 0x571   : > { %v5124_v62 = vpack.c.bf16 %v5103_v57, %v5102_v5  ;;  %v5336_v5 = vld [vmem:[%s5952_s12 + $0x8b] sm:$0xff] }
 0x572   : > { %v5368_v9 = vadd.f32 %v5332_v18, %v5296_v4  ;;  %v5105_v18 = vld [vmem:[#allocation2 + $0x11e] sm:$0xff]  ;;  %v4555_v4 = vadd.f32 %v4487_v41, %v7310_v50  ;;  %v4744_v23 = vpop.f32.mrf.mxu3 }
 0x574   : > { %v5408_v8 = vadd.f32 %v7466_v7, %v5368_v9  ;;  %v4802_v57 = vadd.f32 %v7539_v42, %v4555_v4  ;;  %v4803_v42 = vadd.f32 %v4737_v39, %v4556_v52  ;;  %v5338_v4 = vld [vmem:[%s5952_s12 + $0x9b] sm:$0xff]  ;;  %v5339_v52 = vld [vmem:[%s5952_s12 + $0xa3] sm:$0xff] }
 0x576   : > { %5444 = vst.msk [vmem:[%s7474_s14 + $0x58] sm:$0xff] %vm439_vm1, %v5408_v8  ;;  %v5125_v8 = vpack.c.bf16 %v5105_v18, %v5104_v22  ;;  %v4500_v41 = vpop.f32.mrf.mxu2 }
 0x577   : > { %v5225_v45 = vpop.f32.mrf.mxu1 }
 0x578   : > { %v5297_v26 = vadd.f32 %v5225_v45, %v5050_v53  ;;  %v4995_v53 = vpop.f32.mrf.mxu0  ;;  %v5053_v45 = vadd.f32 %v7541_v58, %v4802_v57  ;;  %v5054_v58 = vadd.f32 %v7553_v49, %v4803_v42 }
 0x57a   : > { %v5369_v54 = vadd.f32 %v5333_v44, %v5297_v26  ;;  %5851 = vmatmul.msk.bf16.gmra.mxu1 %vm439_vm1, %v5124_v62  ;;  %v4747_v38 = vpop.f32.mrf.mxu3 }
 0x57c   : > { %v5409_v16 = vadd.f32 %v7466_v7, %v5369_v54 }
 0x57e   : > { %5445 = vst.msk [vmem:[%s7474_s14 + $0x60] sm:$0xff] %vm439_vm1, %v5409_v16  ;;  %v5106_v16 = vld [vmem:[#allocation2 + $0x126] sm:$0xff]  ;;  %v4502_v61 = vpop.f32.mrf.mxu2 }
 0x57f   : > { %v5227_v19 = vpop.f32.mrf.mxu1 }
 0x580   : > { %v5298_v36 = vadd.f32 %v5227_v19, %v5051_v47  ;;  %v4557_v47 = vadd.f32 %v7557_v35, %v7326_v21  ;;  %v4998_v2 = vpop.f32.mrf.mxu0  ;;  %v4558_v35 = vadd.f32 %v4495_v29, %v7333_v28 }
 0x582   : > { %v5370_v55 = vadd.f32 %v5334_v59, %v5298_v36  ;;  %v5337_v59 = vld [vmem:[%s5952_s12 + $0x93] sm:$0xff]  ;;  %v5126_v36 = vpack.c.bf16 %v5107_v31, %v5106_v16  ;;  %v4804_v33 = vadd.f32 %v7563_v1, %v4557_v47  ;;  %v4749_v21 = vpop.f32.mrf.mxu3  ;;  %v4805_v1 = vadd.f32 %v4742_v48, %v4558_v35 }
 0x584   : > { %v5410_v12 = vadd.f32 %v7466_v7, %v5370_v55  ;;  %v5055_v49 = vadd.f32 %v7571_v20, %v4804_v33  ;;  %v5056_v28 = vadd.f32 %v4993_v43, %v4805_v1 }
 0x586   : > { %5446 = vst.msk [vmem:[%s7474_s14 + $0x68] sm:$0xff] %vm439_vm1, %v5410_v12 }
 0x587   : > { %v5230_v6 = vpop.f32.mrf.mxu1 }
 0x588   : > { %v5299_v9 = vadd.f32 %v5230_v6, %v5052_v24  ;;  %v5000_v24 = vpop.f32.mrf.mxu0 }
 0x58a   : > { %v5371_v63 = vadd.f32 %v5335_v51, %v5299_v9  ;;  %5852 = vmatmul.msk.bf16.gmra.mxu1 %vm439_vm1, %v5125_v8  ;;  %v4505_v51 = vpop.f32.mrf.mxu2  ;;  %v5108_v9 = vld [vmem:[#allocation2 + $0x136] sm:$0xff]  ;;  %v5109_v8 = vld [vmem:[#allocation2 + $0x13e] sm:$0xff]  ;;  %v4752_v29 = vpop.f32.mrf.mxu3 }
 0x58b   : > { %v5127_v20 = vpack.c.bf16 %v5109_v8, %v5108_v9  ;;  %v5343_v9 = vld [vmem:[%s5952_s12 + $0xc3] sm:$0xff] }
 0x58c   : > { %v5411_v50 = vadd.f32 %v7466_v7, %v5371_v63  ;;  %v4559_v63 = vadd.f32 %v4497_v0, %v7342_v17  ;;  %v4560_v17 = vadd.f32 %v4500_v41, %v7349_v25 }
 0x58e   : > { %5447 = vst.msk [vmem:[%s7474_s14 + $0x70] sm:$0xff] %vm439_vm1, %v5411_v50  ;;  %v4807_v31 = vadd.f32 %v4747_v38, %v4560_v17 }
 0x58f   : > { %v5232_v44 = vpop.f32.mrf.mxu1 }
 0x590   : > { %v5300_v26 = vadd.f32 %v5232_v44, %v5053_v45  ;;  %v4806_v44 = vadd.f32 %v4744_v23, %v4559_v63  ;;  %v5058_v25 = vadd.f32 %v4998_v2, %v4807_v31 }
 0x592   : > { %v5372_v62 = vadd.f32 %v5336_v5, %v5300_v26  ;;  %v5003_v5 = vpop.f32.mrf.mxu0  ;;  %v4507_v26 = vpop.f32.mrf.mxu2  ;;  %v5057_v43 = vadd.f32 %v4995_v53, %v4806_v44 }
 0x593   : > { %v4754_v16 = vpop.f32.mrf.mxu3 }
 0x594   : > { %v5412_v54 = vadd.f32 %v7466_v7, %v5372_v62  ;;  %v5340_v62 = vld [vmem:[%s5952_s12 + $0xab] sm:$0xff] }
 0x596   : > { %5448 = vst.msk [vmem:[%s7474_s14 + $0x78] sm:$0xff] %vm439_vm1, %v5412_v54 }
 0x597   : > { %v5235_v19 = vpop.f32.mrf.mxu1 }
 0x598   : > { %v5301_v39 = vadd.f32 %v5235_v19, %v5054_v58 }
 0x59a   : > { %v5373_v55 = vadd.f32 %v5337_v59, %v5301_v39  ;;  %5853 = vmatmul.msk.bf16.gmra.mxu1 %vm439_vm1, %v5126_v36  ;;  %v5005_v47 = vpop.f32.mrf.mxu0  ;;  %v4510_v19 = vpop.f32.mrf.mxu2  ;;  %v4561_v59 = vadd.f32 %v4502_v61, %v7358_v13  ;;  %v5341_v39 = vld [vmem:[%s5952_s12 + $0xb3] sm:$0xff] }
 0x59c   : > { %v5413_v12 = vadd.f32 %v7466_v7, %v5373_v55  ;;  %v4808_v36 = vadd.f32 %v4749_v21, %v4561_v59  ;;  %v4757_v55 = vpop.f32.mrf.mxu3 }
 0x59e   : > { %5449 = vst.msk [vmem:[%s7474_s14 + $0x80] sm:$0xff] %vm439_vm1, %v5413_v12  ;;  %v4562_v12 = vadd.f32 %v4505_v51, %v7365_v60  ;;  %v5059_v13 = vadd.f32 %v5000_v24, %v4808_v36 }
 0x59f   : > { %v5237_v18 = vpop.f32.mrf.mxu1 }
 0x5a0   : > { %v5302_v6 = vadd.f32 %v5237_v18, %v5055_v49  ;;  %v5342_v18 = vld [vmem:[%s5952_s12 + $0xbb] sm:$0xff] }
 0x5a2   : > { %v5374_v22 = vadd.f32 %v5338_v4, %v5302_v6  ;;  %v5008_v35 = vpop.f32.mrf.mxu0  ;;  %v4512_v61 = vpop.f32.mrf.mxu2  ;;  %v4809_v4 = vadd.f32 %v4752_v29, %v4562_v12  ;;  %v4564_v29 = vadd.f32 %v4510_v19, %v7381_v3 }
 0x5a4   : > { %v5414_v57 = vadd.f32 %v7466_v7, %v5374_v22  ;;  %v4759_v1 = vpop.f32.mrf.mxu3  ;;  %v4563_v22 = vadd.f32 %v4507_v26, %v7374_v37  ;;  %v5060_v60 = vadd.f32 %v5003_v5, %v4809_v4  ;;  %v4811_v5 = vadd.f32 %v4757_v55, %v4564_v29  ;;  %v5349_v29 = vld [vmem:[%s5952_s12 + $0xf3] sm:$0xff] }
 0x5a6   : > { %5450 = vst.msk [vmem:[%s7474_s14 + $0x88] sm:$0xff] %vm439_vm1, %v5414_v57  ;;  %v4810_v63 = vadd.f32 %v4754_v16, %v4563_v22  ;;  %v5062_v3 = vadd.f32 %v5008_v35, %v4811_v5  ;;  %v5348_v22 = vld [vmem:[%s5952_s12 + $0xeb] sm:$0xff] }
 0x5a7   : > { %v5240_v50 = vpop.f32.mrf.mxu1 }
 0x5a8   : > { %v5303_v45 = vadd.f32 %v5240_v50, %v5056_v28  ;;  %v5061_v37 = vadd.f32 %v5005_v47, %v4810_v63 }
 0x5aa   : > { %v5375_v48 = vadd.f32 %v5339_v52, %v5303_v45  ;;  %5854 = vmatmul.msk.bf16.gmra.mxu1 %vm439_vm1, %v5127_v20  ;;  %v5010_v8 = vpop.f32.mrf.mxu0  ;;  %v4515_v57 = vpop.f32.mrf.mxu2  ;;  %v5344_v45 = vld [vmem:[%s5952_s12 + $0xcb] sm:$0xff] }
 0x5ab   : > { %v4566_v59 = vadd.f32 %v4515_v57, %v7397_v10 }
 0x5ac   : > { %v5415_v42 = vadd.f32 %v7466_v7, %v5375_v48  ;;  %v4762_v50 = vpop.f32.mrf.mxu3 }
 0x5ae   : > { %5451 = vst.msk [vmem:[%s7474_s14 + $0x90] sm:$0xff] %vm439_vm1, %v5415_v42 }
 0x5af   : > { %v5242_v0 = vpop.f32.mrf.mxu1 }
 0x5b0   : > { %v5304_v54 = vadd.f32 %v5242_v0, %v5057_v43  ;;  %v4565_v43 = vadd.f32 %v4512_v61, %v7390_v32  ;;  %v5347_v61 = vld [vmem:[%s5952_s12 + $0xe3] sm:$0xff] }
 0x5b2   : > { %v5376_v23 = vadd.f32 %v5340_v62, %v5304_v54  ;;  %v5013_v48 = vpop.f32.mrf.mxu0  ;;  %v4517_v42 = vpop.f32.mrf.mxu2  ;;  %v5345_v62 = vld [vmem:[%s5952_s12 + $0xd3] sm:$0xff]  ;;  %v4812_v31 = vadd.f32 %v4759_v1, %v4565_v43 }
 0x5b4   : > { %v5416_v58 = vadd.f32 %v7466_v7, %v5376_v23  ;;  %v4764_v16 = vpop.f32.mrf.mxu3  ;;  %v5063_v32 = vadd.f32 %v5010_v8, %v4812_v31 }
 0x5b6   : > { %5452 = vst.msk [vmem:[%s7474_s14 + $0x98] sm:$0xff] %vm439_vm1, %v5416_v58 }
 0x5b7   : > { %v5245_v41 = vpop.f32.mrf.mxu1 }
 0x5b8   : > { %v5305_v53 = vadd.f32 %v5245_v41, %v5058_v25  ;;  %v5346_v41 = vld [vmem:[%s5952_s12 + $0xdb] sm:$0xff] }
 0x5ba   : > { %v5377_v33 = vadd.f32 %v5341_v39, %v5305_v53  ;;  %v5015_v47 = vpop.f32.mrf.mxu0  ;;  %v4520_v19 = vpop.f32.mrf.mxu2  ;;  %v4813_v53 = vadd.f32 %v4762_v50, %v4566_v59 }
 0x5bc   : > { %v5417_v38 = vadd.f32 %v7466_v7, %v5377_v33  ;;  %v4767_v33 = vpop.f32.mrf.mxu3  ;;  %v5064_v10 = vadd.f32 %v5013_v48, %v4813_v53 }
 0x5be   : > { %5453 = vst.msk [vmem:[%s7474_s14 + $0xa0] sm:$0xff] %vm439_vm1, %v5417_v38  ;;  %v4567_v38 = vadd.f32 %v4517_v42, %v7406_v40  ;;  %v5350_v42 = vld [vmem:[%s5952_s12 + $0xfb] sm:$0xff] }
 0x5bf   : > { %v5247_v49 = vpop.f32.mrf.mxu1 }
 0x5c0   : > { %v5306_v2 = vadd.f32 %v5247_v49, %v5059_v13 }
 0x5c2   : > { %v5378_v6 = vadd.f32 %v5342_v18, %v5306_v2  ;;  %v5018_v12 = vpop.f32.mrf.mxu0  ;;  %v4522_v35 = vpop.f32.mrf.mxu2  ;;  %v4814_v18 = vadd.f32 %v4764_v16, %v4567_v38 }
 0x5c3   : > { %v4569_v63 = vadd.f32 %v4522_v35, %v7422_v56 }
 0x5c4   : > { %v5418_v21 = vadd.f32 %v7466_v7, %v5378_v6  ;;  %v4769_v6 = vpop.f32.mrf.mxu3  ;;  %v5065_v40 = vadd.f32 %v5015_v47, %v4814_v18  ;;  %v5351_v47 = vld [vmem:[%s5952_s12 + $0x103] sm:$0xff] }
 0x5c5   : > { %v4816_v50 = vadd.f32 %v4769_v6, %v4569_v63 }
 0x5c6   : > { %5454 = vst.msk [vmem:[%s7474_s14 + $0xa8] sm:$0xff] %vm439_vm1, %v5418_v21  ;;  %v4568_v21 = vadd.f32 %v4520_v19, %v7413_v30 }
 0x5c7   : > { %v5250_v51 = vpop.f32.mrf.mxu1 }
 0x5c8   : > { %v5307_v24 = vadd.f32 %v5250_v51, %v5060_v60  ;;  %v4815_v8 = vadd.f32 %v4767_v33, %v4568_v21  ;;  %v5352_v33 = vld [vmem:[%s5952_s12 + $0x10b] sm:$0xff] }
 0x5ca   : > { %v5379_v28 = vadd.f32 %v5343_v9, %v5307_v24  ;;  %v5020_v60 = vpop.f32.mrf.mxu0  ;;  %v4525_v9 = vpop.f32.mrf.mxu2  ;;  %v5066_v30 = vadd.f32 %v5018_v12, %v4815_v8 }
 0x5cb   : > { %v4570_v48 = vadd.f32 %v4525_v9, %v7429_v27  ;;  %v5067_v56 = vadd.f32 %v5020_v60, %v4816_v50 }
 0x5cc   : > { %v5419_v20 = vadd.f32 %v7466_v7, %v5379_v28  ;;  %v4772_v28 = vpop.f32.mrf.mxu3 }
 0x5ce   : > { %5455 = vst.msk [vmem:[%s7474_s14 + $0xb0] sm:$0xff] %vm439_vm1, %v5419_v20 }
 0x5cf   : > { %v5252_v52 = vpop.f32.mrf.mxu1 }
 0x5d0   : > { %v5308_v44 = vadd.f32 %v5252_v52, %v5061_v37 }
 0x5d2   : > { %v5380_v26 = vadd.f32 %v5344_v45, %v5308_v44  ;;  %v5023_v52 = vpop.f32.mrf.mxu0  ;;  %v4527_v44 = vpop.f32.mrf.mxu2 }
 0x5d3   : > { %v4571_v31 = vadd.f32 %v4527_v44, %v7437_v46 }
 0x5d4   : > { %v5420_v17 = vadd.f32 %v7466_v7, %v5380_v26  ;;  %v4774_v43 = vpop.f32.mrf.mxu3 }
 0x5d5   : > { %v4818_v19 = vadd.f32 %v4774_v43, %v4571_v31 }
 0x5d6   : > { %5456 = vst.msk [vmem:[%s7474_s14 + $0xb8] sm:$0xff] %vm439_vm1, %v5420_v17 }
 0x5d7   : > { %v5255_v0 = vpop.f32.mrf.mxu1 }
 0x5d8   : > { %v5309_v54 = vadd.f32 %v5255_v0, %v5062_v3  ;;  %v4817_v3 = vadd.f32 %v4772_v28, %v4570_v48 }
 0x5da   : > { %v5381_v23 = vadd.f32 %v5345_v62, %v5309_v54  ;;  %v5025_v62 = vpop.f32.mrf.mxu0  ;;  %v4530_v16 = vpop.f32.mrf.mxu2  ;;  %v5068_v27 = vadd.f32 %v5023_v52, %v4817_v3 }
 0x5db   : > { %v5069_v46 = vadd.f32 %v5025_v62, %v4818_v19 }
 0x5dc   : > { %v5421_v58 = vadd.f32 %v7466_v7, %v5381_v23 }
 0x5de   : > { %5457 = vst.msk [vmem:[%s7474_s14 + $0xc0] sm:$0xff] %vm439_vm1, %v5421_v58 }
 0x5df   : > { %v5257_v25 = vpop.f32.mrf.mxu1 }
 0x5e0   : > { %v5310_v39 = vadd.f32 %v5257_v25, %v5063_v32  ;;  %v4777_v32 = vpop.f32.mrf.mxu3 }
 0x5e2   : > { %v5382_v36 = vadd.f32 %v5346_v41, %v5310_v39  ;;  %v5028_v41 = vpop.f32.mrf.mxu0  ;;  %v4572_v39 = vadd.f32 %v4530_v16, %v7441_v14  ;;  %v4532_v53 = vpop.f32.mrf.mxu2 }
 0x5e4   : > { %v5422_v55 = vadd.f32 %v7466_v7, %v5382_v36  ;;  %v4819_v38 = vadd.f32 %v4777_v32, %v4572_v39 }
 0x5e6   : > { %5458 = vst.msk [vmem:[%s7474_s14 + $0xc8] sm:$0xff] %vm439_vm1, %v5422_v55 }
 0x5e7   : > { %v5260_v13 = vpop.f32.mrf.mxu1 }
 0x5e8   : > { %v5311_v49 = vadd.f32 %v5260_v13, %v5064_v10  ;;  %v4779_v35 = vpop.f32.mrf.mxu3  ;;  %v4573_v13 = vadd.f32 %v4532_v53, %v7447_v15 }
 0x5ea   : > { %v5383_v2 = vadd.f32 %v5347_v61, %v5311_v49  ;;  %v5070_v61 = vadd.f32 %v5028_v41, %v4819_v38  ;;  %v5353_v49 = vld [vmem:[%s5952_s12 + $0x113] sm:$0xff]  ;;  %v4820_v6 = vadd.f32 %v4779_v35, %v4573_v13 }
 0x5ec   : > { %v5423_v4 = vadd.f32 %v7466_v7, %v5383_v2  ;;  %v5030_v2 = vpop.f32.mrf.mxu0 }
 0x5ed   : > { %v5071_v15 = vadd.f32 %v5030_v2, %v4820_v6 }
 0x5ee   : > { %5459 = vst.msk [vmem:[%s7474_s14 + $0xd0] sm:$0xff] %vm439_vm1, %v5423_v4  ;;  %v4535_v4 = vpop.f32.mrf.mxu2 }
 0x5ef   : > { %v5262_v1 = vpop.f32.mrf.mxu1 }
 0x5f0   : > { %v5312_v51 = vadd.f32 %v5262_v1, %v5065_v40  ;;  %v4782_v1 = vpop.f32.mrf.mxu3 }
 0x5f2   : > { %v5384_v24 = vadd.f32 %v5348_v22, %v5312_v51  ;;  %v4574_v22 = vadd.f32 %v4535_v4, %v7451_v11  ;;  %v5354_v51 = vld [vmem:[%s5952_s12 + $0x11b] sm:$0xff] }
 0x5f4   : > { %v5424_v57 = vadd.f32 %v7466_v7, %v5384_v24  ;;  %v5033_v8 = vpop.f32.mrf.mxu0  ;;  %v4821_v24 = vadd.f32 %v4782_v1, %v4574_v22 }
 0x5f6   : > { %5460 = vst.msk [vmem:[%s7474_s14 + $0xd8] sm:$0xff] %vm439_vm1, %v5424_v57  ;;  %v4537_v63 = vpop.f32.mrf.mxu2  ;;  %v5072_v28 = vadd.f32 %v5033_v8, %v4821_v24 }
 0x5f7   : > { %v5265_v20 = vpop.f32.mrf.mxu1 }
 0x5f8   : > { %v5313_v37 = vadd.f32 %v5265_v20, %v5066_v30  ;;  %v4575_v20 = vadd.f32 %v4537_v63, %v7457_v34  ;;  %v4784_v11 = vpop.f32.mrf.mxu3 }
 0x5fa   : > { %v5385_v45 = vadd.f32 %v5349_v29, %v5313_v37  ;;  %v5355_v37 = vld [vmem:[%s5952_s12 + $0x123] sm:$0xff]  ;;  %v4822_v52 = vadd.f32 %v4784_v11, %v4575_v20 }
 0x5fc   : > { %v5425_v5 = vadd.f32 %v7466_v7, %v5385_v45  ;;  %v5035_v44 = vpop.f32.mrf.mxu0 }
 0x5fd   : > { %v5073_v48 = vadd.f32 %v5035_v44, %v4822_v52 }
 0x5fe   : > { %5461 = vst.msk [vmem:[%s7474_s14 + $0xe0] sm:$0xff] %vm439_vm1, %v5425_v5 }
 0x5ff   : > { %v5267_v26 = vpop.f32.mrf.mxu1 }
 0x600   : > { %v5314_v17 = vadd.f32 %v5267_v26, %v5067_v56  ;;  %v5356_v26 = vld [vmem:[%s5952_s12 + $0x12b] sm:$0xff] }
 0x602   : > { %v5386_v0 = vadd.f32 %v5350_v42, %v5314_v17 }
 0x604   : > { %v5426_v54 = vadd.f32 %v7466_v7, %v5386_v0 }
 0x606   : > { %5462 = vst.msk [vmem:[%s7474_s14 + $0xe8] sm:$0xff] %vm439_vm1, %v5426_v54 }
 0x607   : > { %v5270_v23 = vpop.f32.mrf.mxu1 }
 0x608   : > { %v5315_v58 = vadd.f32 %v5270_v23, %v5068_v27 }
 0x60a   : > { %v5387_v59 = vadd.f32 %v5351_v47, %v5315_v58 }
 0x60c   : > { %v5427_v25 = vadd.f32 %v7466_v7, %v5387_v59 }
 0x60e   : > { %5463 = vst.msk [vmem:[%s7474_s14 + $0xf0] sm:$0xff] %vm439_vm1, %v5427_v25 }
 0x60f   : > { %v5272_v36 = vpop.f32.mrf.mxu1 }
 0x610   : > { %v5316_v55 = vadd.f32 %v5272_v36, %v5069_v46 }
 0x612   : > { %v5388_v12 = vadd.f32 %v5352_v33, %v5316_v55 }
 0x614   : > { %v5428_v10 = vadd.f32 %v7466_v7, %v5388_v12 }
 0x616   : > { %5464 = vst.msk [vmem:[%s7474_s14 + $0xf8] sm:$0xff] %vm439_vm1, %v5428_v10 }
 0x617   : > { %v5275_v14 = vpop.f32.mrf.mxu1 }
 0x618   : > { %v5317_v18 = vadd.f32 %v5275_v14, %v5070_v61 }
 0x61a   : > { %v5389_v21 = vadd.f32 %v5353_v49, %v5317_v18 }
 0x61c   : > { %v5429_v40 = vadd.f32 %v7466_v7, %v5389_v21 }
 0x61e   : > { %5465 = vst.msk [vmem:[%s7474_s14 + $0x100] sm:$0xff] %vm439_vm1, %v5429_v40 }
 0x61f   : > { %v5277_v60 = vpop.f32.mrf.mxu1 }
 0x620   : > { %v5318_v9 = vadd.f32 %v5277_v60, %v5071_v15 }
 0x622   : > { %v5390_v57 = vadd.f32 %v5354_v51, %v5318_v9 }
 0x624   : > { %v5430_v30 = vadd.f32 %v7466_v7, %v5390_v57 }
 0x626   : > { %5466 = vst.msk [vmem:[%s7474_s14 + $0x108] sm:$0xff] %vm439_vm1, %v5430_v30 }
 0x627   : > { %v5280_v29 = vpop.f32.mrf.mxu1 }
 0x628   : > { %v5319_v50 = vadd.f32 %v5280_v29, %v5072_v28 }
 0x62a   : > { %v5391_v45 = vadd.f32 %v5355_v37, %v5319_v50 }
 0x62c   : > { %v5431_v5 = vadd.f32 %v7466_v7, %v5391_v45 }
 0x62e   : > { %5467 = vst.msk [vmem:[%s7474_s14 + $0x110] sm:$0xff] %vm439_vm1, %v5431_v5 }
 0x62f   : > { %v5282_v56 = vpop.f32.mrf.mxu1 }
 0x630   : > { %v5320_v42 = vadd.f32 %v5282_v56, %v5073_v48 }
 0x632   : > { %v5392_v17 = vadd.f32 %v5356_v26, %v5320_v42 }
 0x634   : > { %v5432_v34 = vadd.f32 %v7466_v7, %v5392_v17 }
 0x636   : > { %5468 = vst.msk [vmem:[%s7474_s14 + $0x118] sm:$0xff] %vm439_vm1, %v5432_v34 }
 0x637 PF: > { %s16_s21 = sadd.s32 1, %s5883_s21  }
 0x638   : > { %p13_p4 = scmp.ge.s32.totalorder %s16_s21, 4  }
 0x63a   :  { %15 = sbr.rel (!%p13_p4) target bundleno = 1 (0x1), region = 74 }

</bundles_post_ra>
